<compile_context>
chip_gen: v5e
topology: v5e:2x2
jax: 0.10.0
libtpu: 0.0.40
codegen_flags: <defaults>
</compile_context>

<pallas_src>
import jax
import jax.numpy as jnp
from jax.experimental import pallas as pl
from jax.experimental.pallas import tpu as pltpu


def ego_aware_deform_conv(ego_x, x, w_om, b_om, w_dcn, b_dcn,
                          bn_gamma, bn_beta, bn_mean, bn_var, eps=1e-5):
    """Fused forward of EGOAWAREDeformConv (DCNv2 + folded BatchNorm + ReLU)."""
    N, Cin, H, W = x.shape
    Cout = w_dcn.shape[0]
    HW = H * W
    NTAP = 9                       # 3x3 taps
    NOM = 3 * NTAP                 # 27 offset/mask channels
    PADF = W + 1                   # flat zero-pad so every tap shift is a static in-bounds slice
    HWP = HW + 2 * PADF
    f32 = jnp.float32

    # ---- trace-time weight re-layout -------------------------------------------------------
    # offset/mask conv channels re-ordered to [dy(9); dx(9); mask(9)] (DCNv2: dy_k = ch 2k,
    # dx_k = ch 2k+1, mask_k = ch 18+k), and both convs flattened to one big-K matmul weight.
    perm = jnp.array(list(range(0, 2 * NTAP, 2)) +
                     list(range(1, 2 * NTAP, 2)) +
                     list(range(2 * NTAP, NOM)), dtype=jnp.int32)
    w_om_all = jnp.transpose(w_om[perm].astype(f32), (0, 2, 3, 1)).reshape(NOM, NTAP * Cin)
    b_om_col = b_om[perm].astype(f32).reshape(NOM, 1)
    w_dcn_all = jnp.transpose(w_dcn.astype(f32), (0, 2, 3, 1)).reshape(Cout, NTAP * Cin)

    bn_scale = (bn_gamma / jnp.sqrt(bn_var + eps)).astype(f32)
    bn_shift = ((b_dcn - bn_mean) * bn_scale + bn_beta).astype(f32)   # conv bias folded in
    scale = bn_scale.reshape(Cout, 1)
    shift = bn_shift.reshape(Cout, 1)

    # lane-dense flattened inputs
    ego_flat = jnp.pad(ego_x.astype(f32).reshape(N, Cin, HW),
                       ((0, 0), (0, 0), (PADF, PADF)))                # (N, Cin, HWP)
    x_rows = x.astype(f32).reshape(N, Cin * H, W)                     # (N, Cin*H, W)
    pos = jnp.stack([jnp.repeat(jnp.arange(H, dtype=f32), W),
                     jnp.tile(jnp.arange(W, dtype=f32), H)], axis=0)  # (2, HW): [h; w]

    def fused_kernel(ego_ref, x_ref, pos_ref, wom_ref, bom_ref, wdcn_ref,
                     sc_ref, sh_ref, o_ref, eg_stack, smp_stack):
        eg = ego_ref[0]                          # (Cin, HWP)
        xr = x_ref[0]                            # (Cin*H, W)
        pos_y = pos_ref[0:1, :]                  # (1, HW)
        pos_x = pos_ref[1:2, :]                  # (1, HW)

        col_ok_l = jnp.where(pos_x >= 1.0, 1.0, 0.0)             # column w-1 in range
        col_ok_r = jnp.where(pos_x <= float(W - 2), 1.0, 0.0)    # column w+1 in range

        # ---- stage 1: 3x3 offset/mask conv on ego: 9 shifted views -> one K=9*Cin matmul ----
        for k in range(NTAP):                     # static unroll
            ki, kj = k // 3 - 1, k % 3 - 1
            start = PADF + ki * W + kj
            v = eg[:, start:start + HW]           # (Cin, HW) shifted flat view
            if kj == -1:
                v = v * col_ok_l                  # kill column wrap-around
            elif kj == 1:
                v = v * col_ok_r
            eg_stack[k * Cin:(k + 1) * Cin, :] = v
        om = jnp.dot(wom_ref[...], eg_stack[...],
                     preferred_element_type=jnp.float32) + bom_ref[...]   # (27, HW)

        # ---- stage 2: per-tap bilinear sampling via separable one-hot weight matmuls --------
        iota_w = jax.lax.broadcasted_iota(jnp.int32, (W, HW), 0)
        iota_h = jax.lax.broadcasted_iota(jnp.int32, (H, HW), 0)
        for k in range(NTAP):                     # static unroll
            ki, kj = k // 3 - 1, k % 3 - 1
            dy = om[k:k + 1, :]
            dx = om[NTAP + k:NTAP + k + 1, :]
            ml = om[2 * NTAP + k:2 * NTAP + k + 1, :]
            m = pl.reciprocal(1.0 + jnp.exp(-ml))          # sigmoid on the EUP path

            py = pos_y + float(ki) + dy                    # (1, HW) sample row
            px = pos_x + float(kj) + dx                    # (1, HW) sample col
            y0f = jnp.floor(py)
            x0f = jnp.floor(px)
            ly = py - y0f
            lx = px - x0f
            y0 = y0f.astype(jnp.int32)
            x0 = x0f.astype(jnp.int32)

            # one-hot bilinear column/row weights; out-of-range corners get weight 0
            wx = (jnp.where(iota_w == x0, 1.0 - lx, 0.0) +
                  jnp.where(iota_w == x0 + 1, lx, 0.0))            # (W, HW)
            wy = (jnp.where(iota_h == y0, 1.0 - ly, 0.0) +
                  jnp.where(iota_h == y0 + 1, ly, 0.0)) * m        # (H, HW), mask folded in

            t = jnp.dot(xr, wx, preferred_element_type=jnp.float32)   # (Cin*H, HW), MXU
            for c in range(Cin):                   # cheap sublane reduce over the row axis
                row = jnp.sum(t[c * H:(c + 1) * H, :] * wy, axis=0, keepdims=True)
                smp_stack[k * Cin + c:k * Cin + c + 1, :] = row

        # ---- stage 3: single big-K weight matmul + folded BN + ReLU --------------------------
        acc = jnp.dot(wdcn_ref[...], smp_stack[...], preferred_element_type=jnp.float32)
        o_ref[0] = jnp.maximum(acc * sc_ref[...] + sh_ref[...], 0.0)

    flops = N * (2 * NOM * NTAP * Cin * HW              # offset/mask conv matmul
                 + NTAP * 2 * (Cin * H) * W * HW        # sampling matmuls
                 + 2 * Cout * NTAP * Cin * HW)          # weight matmul
    bytes_accessed = 4 * (N * (Cin * HWP + Cin * HW + Cout * HW) + 2 * HW
                          + (NOM + Cout) * (NTAP * Cin + 1) + 2 * Cout)

    out = pl.pallas_call(
        fused_kernel,
        out_shape=jax.ShapeDtypeStruct((N, Cout, HW), f32),
        grid=(N,),
        in_specs=[
            pl.BlockSpec((1, Cin, HWP), lambda n: (n, 0, 0)),
            pl.BlockSpec((1, Cin * H, W), lambda n: (n, 0, 0)),
            pl.BlockSpec((2, HW), lambda n: (0, 0)),
            pl.BlockSpec((NOM, NTAP * Cin), lambda n: (0, 0)),
            pl.BlockSpec((NOM, 1), lambda n: (0, 0)),
            pl.BlockSpec((Cout, NTAP * Cin), lambda n: (0, 0)),
            pl.BlockSpec((Cout, 1), lambda n: (0, 0)),
            pl.BlockSpec((Cout, 1), lambda n: (0, 0)),
        ],
        out_specs=pl.BlockSpec((1, Cout, HW), lambda n: (n, 0, 0)),
        scratch_shapes=[pltpu.VMEM((NTAP * Cin, HW), f32),   # stacked ego tap views
                        pltpu.VMEM((NTAP * Cin, HW), f32)],  # stacked sampled taps
        compiler_params=pltpu.CompilerParams(
            dimension_semantics=("parallel",),
            vmem_limit_bytes=16 * 1024 * 1024),
        cost_estimate=pl.CostEstimate(flops=flops,
                                      transcendentals=N * 2 * NTAP * HW,
                                      bytes_accessed=bytes_accessed),
    )(ego_flat, x_rows, pos, w_om_all, b_om_col, w_dcn_all, scale, shift)

    return out.reshape(N, Cout, H, W)


def reference_forward(ego_x, x, w_om, b_om, w_dcn, b_dcn,
                      bn_gamma, bn_beta, bn_mean, bn_var, eps=1e-5):
    """Pure-JAX (gather based) reference of the same forward, for correctness checking."""
    N, Cin, H, W = x.shape
    Cout = w_dcn.shape[0]
    HW = H * W
    hp = jax.lax.Precision.HIGHEST

    om = jax.lax.conv_general_dilated(
        ego_x, w_om, window_strides=(1, 1), padding=((1, 1), (1, 1)),
        dimension_numbers=("NCHW", "OIHW", "NCHW"), precision=hp)
    om = om + b_om[None, :, None, None]
    o1, o2, ml = om[:, 0:9], om[:, 9:18], om[:, 18:27]
    offset = jnp.concatenate([o1, o2], axis=1)
    dy = offset[:, 0::2]
    dx = offset[:, 1::2]
    mask = jax.nn.sigmoid(ml)

    x_flat = x.reshape(N, Cin, HW)
    hh = jnp.arange(H, dtype=jnp.float32)[:, None]
    ww = jnp.arange(W, dtype=jnp.float32)[None, :]
    out = jnp.zeros((N, Cout, H, W), jnp.float32)
    for k in range(9):
        ki, kj = k // 3 - 1, k % 3 - 1
        py = hh + ki + dy[:, k]
        px = ww + kj + dx[:, k]
        y0f = jnp.floor(py)
        x0f = jnp.floor(px)
        ly = py - y0f
        lx = px - x0f
        y0 = y0f.astype(jnp.int32)
        x0 = x0f.astype(jnp.int32)
        val = jnp.zeros((N, Cin, H, W), jnp.float32)
        for cy, cx, wgt in [(y0, x0, (1 - ly) * (1 - lx)),
                            (y0, x0 + 1, (1 - ly) * lx),
                            (y0 + 1, x0, ly * (1 - lx)),
                            (y0 + 1, x0 + 1, ly * lx)]:
            valid = (cy >= 0) & (cy < H) & (cx >= 0) & (cx < W)
            q = jnp.clip(cy, 0, H - 1) * W + jnp.clip(cx, 0, W - 1)
            qb = jnp.broadcast_to(q.reshape(N, 1, HW), (N, Cin, HW))
            g = jnp.take_along_axis(x_flat, qb, axis=2).reshape(N, Cin, H, W)
            val = val + jnp.where(valid, wgt, 0.0)[:, None] * g
        val = val * mask[:, k][:, None]
        out = out + jnp.einsum("oc,nchw->nohw", w_dcn[:, :, ki + 1, kj + 1], val,
                               precision=hp)
    out = out + b_dcn[None, :, None, None]
    scale = (bn_gamma / jnp.sqrt(bn_var + eps))[None, :, None, None]
    out = (out - bn_mean[None, :, None, None]) * scale + bn_beta[None, :, None, None]
    return jnp.maximum(out, 0.0)


if __name__ == "__main__":
    key = jax.random.PRNGKey(0)
    ks = jax.random.split(key, 10)
    N, chi, cho, H, W = 2, 4, 8, 16, 16

    ego_x = jax.random.normal(ks[0], (N, chi, H, W), jnp.float32)
    x = jax.random.normal(ks[1], (N, chi, H, W), jnp.float32)
    w_om = 0.1 * jax.random.normal(ks[2], (27, chi, 3, 3), jnp.float32)   # offset/mask conv weight
    b_om = 0.1 * jax.random.normal(ks[3], (27,), jnp.float32)             # offset/mask conv bias
    w_dcn = 0.1 * jax.random.normal(ks[4], (cho, chi, 3, 3), jnp.float32)  # deform conv weight
    b_dcn = 0.1 * jax.random.normal(ks[5], (cho,), jnp.float32)            # deform conv bias
    bn_gamma = 1.0 + 0.1 * jax.random.normal(ks[6], (cho,), jnp.float32)
    bn_beta = 0.1 * jax.random.normal(ks[7], (cho,), jnp.float32)
    bn_mean = 0.1 * jax.random.normal(ks[8], (cho,), jnp.float32)
    bn_var = 0.5 + jnp.abs(jax.random.normal(ks[9], (cho,), jnp.float32))

    y = ego_aware_deform_conv(ego_x, x, w_om, b_om, w_dcn, b_dcn,
                              bn_gamma, bn_beta, bn_mean, bn_var)
    y = jax.block_until_ready(y)
    assert y.shape == (N, cho, H, W)

    ref = reference_forward(ego_x, x, w_om, b_om, w_dcn, b_dcn,
                            bn_gamma, bn_beta, bn_mean, bn_var)
    ref = jax.block_until_ready(ref)
    err = float(jnp.max(jnp.abs(y - ref)))
    assert err < 1e-2, f"max abs err vs reference = {err}"
    print("KERNEL_OK")
</pallas_src>

<mosaic_0001>
module attributes {stable_mosaic.version = 11 : i64} {
  func.func @fused_kernel(%arg0: i32, %arg1: memref<1x4x290xf32, #tpu.memory_space<vmem>>, %arg2: memref<1x64x16xf32, #tpu.memory_space<vmem>>, %arg3: memref<2x256xf32, #tpu.memory_space<vmem>>, %arg4: memref<27x36xf32, #tpu.memory_space<vmem>>, %arg5: memref<27x1xf32, #tpu.memory_space<vmem>>, %arg6: memref<8x36xf32, #tpu.memory_space<vmem>>, %arg7: memref<8x1xf32, #tpu.memory_space<vmem>>, %arg8: memref<8x1xf32, #tpu.memory_space<vmem>>, %arg9: memref<1x8x256xf32, #tpu.memory_space<vmem>>, %arg10: memref<36x256xf32, #tpu.memory_space<vmem>>, %arg11: memref<36x256xf32, #tpu.memory_space<vmem>>) attributes {dimension_semantics = [#tpu.dimension_semantics<parallel>], iteration_bounds = array<i64: 2>, scalar_prefetch = 0 : i64, scratch_operands = 2 : i64, tpu.core_type = #tpu.core_type<tc>, window_params = [{transform_indices = @transform_0, window_bounds = array<i64: 1, 4, 290>}, {transform_indices = @transform_1, window_bounds = array<i64: 1, 64, 16>}, {pipeline_mode = #tpu.pipeline_mode<synchronous>, transform_indices = @transform_2, window_bounds = array<i64: 2, 256>}, {pipeline_mode = #tpu.pipeline_mode<synchronous>, transform_indices = @transform_3, window_bounds = array<i64: 27, 36>}, {pipeline_mode = #tpu.pipeline_mode<synchronous>, transform_indices = @transform_4, window_bounds = array<i64: 27, 1>}, {pipeline_mode = #tpu.pipeline_mode<synchronous>, transform_indices = @transform_5, window_bounds = array<i64: 8, 36>}, {pipeline_mode = #tpu.pipeline_mode<synchronous>, transform_indices = @transform_6, window_bounds = array<i64: 8, 1>}, {pipeline_mode = #tpu.pipeline_mode<synchronous>, transform_indices = @transform_7, window_bounds = array<i64: 8, 1>}, {transform_indices = @transform_8, window_bounds = array<i64: 1, 8, 256>}]} {
    %c0 = arith.constant 0 : index
    %c0_0 = arith.constant 0 : index
    %c0_1 = arith.constant 0 : index
    %0 = vector.load %arg1[%c0, %c0_0, %c0_1] : memref<1x4x290xf32, #tpu.memory_space<vmem>>, vector<1x4x290xf32>
    %1 = vector.shape_cast %0 : vector<1x4x290xf32> to vector<4x290xf32>
    %c0_2 = arith.constant 0 : index
    %c0_3 = arith.constant 0 : index
    %c0_4 = arith.constant 0 : index
    %2 = vector.load %arg2[%c0_2, %c0_3, %c0_4] : memref<1x64x16xf32, #tpu.memory_space<vmem>>, vector<1x64x16xf32>
    %3 = vector.shape_cast %2 : vector<1x64x16xf32> to vector<64x16xf32>
    %c0_5 = arith.constant 0 : index
    %c0_6 = arith.constant 0 : index
    %4 = vector.load %arg3[%c0_5, %c0_6] : memref<2x256xf32, #tpu.memory_space<vmem>>, vector<1x256xf32>
    %c1 = arith.constant 1 : index
    %c0_7 = arith.constant 0 : index
    %5 = vector.load %arg3[%c1, %c0_7] : memref<2x256xf32, #tpu.memory_space<vmem>>, vector<1x256xf32>
    %cst = arith.constant 1.000000e+00 : f32
    %6 = vector.broadcast %cst : f32 to vector<1x256xf32>
    %7 = arith.cmpf oge, %5, %6 : vector<1x256xf32>
    %cst_8 = arith.constant 1.000000e+00 : f32
    %cst_9 = arith.constant 0.000000e+00 : f32
    %8 = vector.broadcast %cst_8 : f32 to vector<1x256xf32>
    %9 = vector.broadcast %cst_9 : f32 to vector<1x256xf32>
    %10 = arith.select %7, %8, %9 : vector<1x256xi1>, vector<1x256xf32>
    %cst_10 = arith.constant 1.400000e+01 : f32
    %11 = vector.broadcast %cst_10 : f32 to vector<1x256xf32>
    %12 = arith.cmpf ole, %5, %11 : vector<1x256xf32>
    %cst_11 = arith.constant 1.000000e+00 : f32
    %cst_12 = arith.constant 0.000000e+00 : f32
    %13 = vector.broadcast %cst_11 : f32 to vector<1x256xf32>
    %14 = vector.broadcast %cst_12 : f32 to vector<1x256xf32>
    %15 = arith.select %12, %13, %14 : vector<1x256xi1>, vector<1x256xf32>
    %16 = vector.extract_strided_slice %1 {offsets = [0, 0], sizes = [4, 256], strides = [1, 1]} : vector<4x290xf32> to vector<4x256xf32>
    %17 = vector.broadcast %10 : vector<1x256xf32> to vector<4x256xf32>
    %18 = arith.mulf %16, %17 : vector<4x256xf32>
    %c0_13 = arith.constant 0 : index
    %c0_14 = arith.constant 0 : index
    %19 = vector.load %arg10[%c0_13, %c0_14] : memref<36x256xf32, #tpu.memory_space<vmem>>, vector<4x256xf32>
    tpu.vector_store %arg10[%c0_13, %c0_14], %18 {strides = array<i32>} : memref<36x256xf32, #tpu.memory_space<vmem>>, vector<4x256xf32>,
    %20 = vector.extract_strided_slice %1 {offsets = [0, 1], sizes = [4, 256], strides = [1, 1]} : vector<4x290xf32> to vector<4x256xf32>
    %c4 = arith.constant 4 : index
    %c0_15 = arith.constant 0 : index
    %21 = vector.load %arg10[%c4, %c0_15] : memref<36x256xf32, #tpu.memory_space<vmem>>, vector<4x256xf32>
    tpu.vector_store %arg10[%c4, %c0_15], %20 {strides = array<i32>} : memref<36x256xf32, #tpu.memory_space<vmem>>, vector<4x256xf32>,
    %22 = vector.extract_strided_slice %1 {offsets = [0, 2], sizes = [4, 256], strides = [1, 1]} : vector<4x290xf32> to vector<4x256xf32>
    %23 = vector.broadcast %15 : vector<1x256xf32> to vector<4x256xf32>
    %24 = arith.mulf %22, %23 : vector<4x256xf32>
    %c8 = arith.constant 8 : index
    %c0_16 = arith.constant 0 : index
    %25 = vector.load %arg10[%c8, %c0_16] : memref<36x256xf32, #tpu.memory_space<vmem>>, vector<4x256xf32>
    tpu.vector_store %arg10[%c8, %c0_16], %24 {strides = array<i32>} : memref<36x256xf32, #tpu.memory_space<vmem>>, vector<4x256xf32>,
    %26 = vector.extract_strided_slice %1 {offsets = [0, 16], sizes = [4, 256], strides = [1, 1]} : vector<4x290xf32> to vector<4x256xf32>
    %27 = vector.broadcast %10 : vector<1x256xf32> to vector<4x256xf32>
    %28 = arith.mulf %26, %27 : vector<4x256xf32>
    %c12 = arith.constant 12 : index
    %c0_17 = arith.constant 0 : index
    %29 = vector.load %arg10[%c12, %c0_17] : memref<36x256xf32, #tpu.memory_space<vmem>>, vector<4x256xf32>
    tpu.vector_store %arg10[%c12, %c0_17], %28 {strides = array<i32>} : memref<36x256xf32, #tpu.memory_space<vmem>>, vector<4x256xf32>,
    %30 = vector.extract_strided_slice %1 {offsets = [0, 17], sizes = [4, 256], strides = [1, 1]} : vector<4x290xf32> to vector<4x256xf32>
    %c16 = arith.constant 16 : index
    %c0_18 = arith.constant 0 : index
    %31 = vector.load %arg10[%c16, %c0_18] : memref<36x256xf32, #tpu.memory_space<vmem>>, vector<4x256xf32>
    tpu.vector_store %arg10[%c16, %c0_18], %30 {strides = array<i32>} : memref<36x256xf32, #tpu.memory_space<vmem>>, vector<4x256xf32>,
    %32 = vector.extract_strided_slice %1 {offsets = [0, 18], sizes = [4, 256], strides = [1, 1]} : vector<4x290xf32> to vector<4x256xf32>
    %33 = vector.broadcast %15 : vector<1x256xf32> to vector<4x256xf32>
    %34 = arith.mulf %32, %33 : vector<4x256xf32>
    %c20 = arith.constant 20 : index
    %c0_19 = arith.constant 0 : index
    %35 = vector.load %arg10[%c20, %c0_19] : memref<36x256xf32, #tpu.memory_space<vmem>>, vector<4x256xf32>
    tpu.vector_store %arg10[%c20, %c0_19], %34 {strides = array<i32>} : memref<36x256xf32, #tpu.memory_space<vmem>>, vector<4x256xf32>,
    %36 = vector.extract_strided_slice %1 {offsets = [0, 32], sizes = [4, 256], strides = [1, 1]} : vector<4x290xf32> to vector<4x256xf32>
    %37 = vector.broadcast %10 : vector<1x256xf32> to vector<4x256xf32>
    %38 = arith.mulf %36, %37 : vector<4x256xf32>
    %c24 = arith.constant 24 : index
    %c0_20 = arith.constant 0 : index
    %39 = vector.load %arg10[%c24, %c0_20] : memref<36x256xf32, #tpu.memory_space<vmem>>, vector<4x256xf32>
    tpu.vector_store %arg10[%c24, %c0_20], %38 {strides = array<i32>} : memref<36x256xf32, #tpu.memory_space<vmem>>, vector<4x256xf32>,
    %40 = vector.extract_strided_slice %1 {offsets = [0, 33], sizes = [4, 256], strides = [1, 1]} : vector<4x290xf32> to vector<4x256xf32>
    %c28 = arith.constant 28 : index
    %c0_21 = arith.constant 0 : index
    %41 = vector.load %arg10[%c28, %c0_21] : memref<36x256xf32, #tpu.memory_space<vmem>>, vector<4x256xf32>
    tpu.vector_store %arg10[%c28, %c0_21], %40 {strides = array<i32>} : memref<36x256xf32, #tpu.memory_space<vmem>>, vector<4x256xf32>,
    %42 = vector.extract_strided_slice %1 {offsets = [0, 34], sizes = [4, 256], strides = [1, 1]} : vector<4x290xf32> to vector<4x256xf32>
    %43 = vector.broadcast %15 : vector<1x256xf32> to vector<4x256xf32>
    %44 = arith.mulf %42, %43 : vector<4x256xf32>
    %c32 = arith.constant 32 : index
    %c0_22 = arith.constant 0 : index
    %45 = vector.load %arg10[%c32, %c0_22] : memref<36x256xf32, #tpu.memory_space<vmem>>, vector<4x256xf32>
    tpu.vector_store %arg10[%c32, %c0_22], %44 {strides = array<i32>} : memref<36x256xf32, #tpu.memory_space<vmem>>, vector<4x256xf32>,
    %c0_23 = arith.constant 0 : index
    %c0_24 = arith.constant 0 : index
    %46 = vector.load %arg4[%c0_23, %c0_24] : memref<27x36xf32, #tpu.memory_space<vmem>>, vector<27x36xf32>
    %c0_25 = arith.constant 0 : index
    %c0_26 = arith.constant 0 : index
    %47 = vector.load %arg10[%c0_25, %c0_26] : memref<36x256xf32, #tpu.memory_space<vmem>>, vector<36x256xf32>
    %cst_27 = arith.constant dense<0.000000e+00> : vector<27x256xf32>
    %48 = tpu.matmul %46, %47, %cst_27 {dimension_numbers = #tpu.dot_dimension_numbers<[1], [0], [0], [1], [0, 0, 1, 1], [], []>} : vector<27x36xf32>, vector<36x256xf32>, vector<27x256xf32> -> vector<27x256xf32>
    %c0_28 = arith.constant 0 : index
    %c0_29 = arith.constant 0 : index
    %49 = vector.load %arg5[%c0_28, %c0_29] : memref<27x1xf32, #tpu.memory_space<vmem>>, vector<27x1xf32>
    %50 = vector.broadcast %49 : vector<27x1xf32> to vector<27x256xf32>
    %51 = arith.addf %48, %50 : vector<27x256xf32>
    %52 = tpu.iota {dimensions = array<i32: 0>} : vector<16x256xi32>
    %53 = tpu.iota {dimensions = array<i32: 0>} : vector<16x256xi32>
    %54 = vector.extract_strided_slice %51 {offsets = [0, 0], sizes = [1, 256], strides = [1, 1]} : vector<27x256xf32> to vector<1x256xf32>
    %55 = vector.extract_strided_slice %51 {offsets = [9, 0], sizes = [1, 256], strides = [1, 1]} : vector<27x256xf32> to vector<1x256xf32>
    %56 = vector.extract_strided_slice %51 {offsets = [18, 0], sizes = [1, 256], strides = [1, 1]} : vector<27x256xf32> to vector<1x256xf32>
    %cst_30 = arith.constant 0.000000e+00 : f32
    %57 = vector.broadcast %cst_30 : f32 to vector<1x256xf32>
    %58 = arith.subf %57, %56 : vector<1x256xf32>
    %59 = math.exp %58 : vector<1x256xf32>
    %cst_31 = arith.constant 1.000000e+00 : f32
    %60 = vector.broadcast %cst_31 : f32 to vector<1x256xf32>
    %61 = arith.addf %60, %59 : vector<1x256xf32>
    %62 = tpu.reciprocal %61 : vector<1x256xf32> -> vector<1x256xf32>
    %cst_32 = arith.constant -1.000000e+00 : f32
    %63 = vector.broadcast %cst_32 : f32 to vector<1x256xf32>
    %64 = arith.addf %4, %63 : vector<1x256xf32>
    %65 = arith.addf %64, %54 : vector<1x256xf32>
    %cst_33 = arith.constant -1.000000e+00 : f32
    %66 = vector.broadcast %cst_33 : f32 to vector<1x256xf32>
    %67 = arith.addf %5, %66 : vector<1x256xf32>
    %68 = arith.addf %67, %55 : vector<1x256xf32>
    %69 = math.floor %65 : vector<1x256xf32>
    %70 = math.floor %68 : vector<1x256xf32>
    %71 = arith.subf %65, %69 : vector<1x256xf32>
    %72 = arith.subf %68, %70 : vector<1x256xf32>
    %73 = arith.fptosi %69 : vector<1x256xf32> to vector<1x256xi32>
    %74 = arith.fptosi %70 : vector<1x256xf32> to vector<1x256xi32>
    %75 = vector.broadcast %74 : vector<1x256xi32> to vector<16x256xi32>
    %76 = arith.cmpi eq, %52, %75 : vector<16x256xi32>
    %cst_34 = arith.constant 1.000000e+00 : f32
    %77 = vector.broadcast %cst_34 : f32 to vector<1x256xf32>
    %78 = arith.subf %77, %72 : vector<1x256xf32>
    %cst_35 = arith.constant 0.000000e+00 : f32
    %79 = vector.shape_cast %78 : vector<1x256xf32> to vector<1x256xf32>
    %80 = vector.broadcast %79 : vector<1x256xf32> to vector<16x256xf32>
    %81 = vector.broadcast %cst_35 : f32 to vector<16x256xf32>
    %82 = arith.select %76, %80, %81 : vector<16x256xi1>, vector<16x256xf32>
    %c1_i32 = arith.constant 1 : i32
    %83 = vector.broadcast %c1_i32 : i32 to vector<1x256xi32>
    %84 = arith.addi %74, %83 : vector<1x256xi32>
    %85 = vector.broadcast %84 : vector<1x256xi32> to vector<16x256xi32>
    %86 = arith.cmpi eq, %52, %85 : vector<16x256xi32>
    %cst_36 = arith.constant 0.000000e+00 : f32
    %87 = vector.shape_cast %72 : vector<1x256xf32> to vector<1x256xf32>
    %88 = vector.broadcast %87 : vector<1x256xf32> to vector<16x256xf32>
    %89 = vector.broadcast %cst_36 : f32 to vector<16x256xf32>
    %90 = arith.select %86, %88, %89 : vector<16x256xi1>, vector<16x256xf32>
    %91 = arith.addf %82, %90 : vector<16x256xf32>
    %92 = vector.broadcast %73 : vector<1x256xi32> to vector<16x256xi32>
    %93 = arith.cmpi eq, %53, %92 : vector<16x256xi32>
    %cst_37 = arith.constant 1.000000e+00 : f32
    %94 = vector.broadcast %cst_37 : f32 to vector<1x256xf32>
    %95 = arith.subf %94, %71 : vector<1x256xf32>
    %cst_38 = arith.constant 0.000000e+00 : f32
    %96 = vector.shape_cast %95 : vector<1x256xf32> to vector<1x256xf32>
    %97 = vector.broadcast %96 : vector<1x256xf32> to vector<16x256xf32>
    %98 = vector.broadcast %cst_38 : f32 to vector<16x256xf32>
    %99 = arith.select %93, %97, %98 : vector<16x256xi1>, vector<16x256xf32>
    %c1_i32_39 = arith.constant 1 : i32
    %100 = vector.broadcast %c1_i32_39 : i32 to vector<1x256xi32>
    %101 = arith.addi %73, %100 : vector<1x256xi32>
    %102 = vector.broadcast %101 : vector<1x256xi32> to vector<16x256xi32>
    %103 = arith.cmpi eq, %53, %102 : vector<16x256xi32>
    %cst_40 = arith.constant 0.000000e+00 : f32
    %104 = vector.shape_cast %71 : vector<1x256xf32> to vector<1x256xf32>
    %105 = vector.broadcast %104 : vector<1x256xf32> to vector<16x256xf32>
    %106 = vector.broadcast %cst_40 : f32 to vector<16x256xf32>
    %107 = arith.select %103, %105, %106 : vector<16x256xi1>, vector<16x256xf32>
    %108 = arith.addf %99, %107 : vector<16x256xf32>
    %109 = vector.broadcast %62 : vector<1x256xf32> to vector<16x256xf32>
    %110 = arith.mulf %108, %109 : vector<16x256xf32>
    %cst_41 = arith.constant dense<0.000000e+00> : vector<64x256xf32>
    %111 = tpu.matmul %3, %91, %cst_41 {dimension_numbers = #tpu.dot_dimension_numbers<[1], [0], [0], [1], [0, 0, 1, 1], [], []>} : vector<64x16xf32>, vector<16x256xf32>, vector<64x256xf32> -> vector<64x256xf32>
    %112 = vector.extract_strided_slice %111 {offsets = [0, 0], sizes = [16, 256], strides = [1, 1]} : vector<64x256xf32> to vector<16x256xf32>
    %113 = arith.mulf %112, %110 : vector<16x256xf32>
    %cst_42 = arith.constant dense<0.000000e+00> : vector<256xf32>
    %114 = vector.multi_reduction <add>, %113, %cst_42 [0] : vector<16x256xf32> to vector<256xf32>
    %115 = vector.shape_cast %114 : vector<256xf32> to vector<1x256xf32>
    %c0_43 = arith.constant 0 : index
    %c0_44 = arith.constant 0 : index
    %116 = vector.load %arg11[%c0_43, %c0_44] : memref<36x256xf32, #tpu.memory_space<vmem>>, vector<1x256xf32>
    tpu.vector_store %arg11[%c0_43, %c0_44], %115 {strides = array<i32>} : memref<36x256xf32, #tpu.memory_space<vmem>>, vector<1x256xf32>,
    %117 = vector.extract_strided_slice %111 {offsets = [16, 0], sizes = [16, 256], strides = [1, 1]} : vector<64x256xf32> to vector<16x256xf32>
    %118 = arith.mulf %117, %110 : vector<16x256xf32>
    %cst_45 = arith.constant dense<0.000000e+00> : vector<256xf32>
    %119 = vector.multi_reduction <add>, %118, %cst_45 [0] : vector<16x256xf32> to vector<256xf32>
    %120 = vector.shape_cast %119 : vector<256xf32> to vector<1x256xf32>
    %c1_46 = arith.constant 1 : index
    %c0_47 = arith.constant 0 : index
    %121 = vector.load %arg11[%c1_46, %c0_47] : memref<36x256xf32, #tpu.memory_space<vmem>>, vector<1x256xf32>
    tpu.vector_store %arg11[%c1_46, %c0_47], %120 {strides = array<i32>} : memref<36x256xf32, #tpu.memory_space<vmem>>, vector<1x256xf32>,
    %122 = vector.extract_strided_slice %111 {offsets = [32, 0], sizes = [16, 256], strides = [1, 1]} : vector<64x256xf32> to vector<16x256xf32>
    %123 = arith.mulf %122, %110 : vector<16x256xf32>
    %cst_48 = arith.constant dense<0.000000e+00> : vector<256xf32>
    %124 = vector.multi_reduction <add>, %123, %cst_48 [0] : vector<16x256xf32> to vector<256xf32>
    %125 = vector.shape_cast %124 : vector<256xf32> to vector<1x256xf32>
    %c2 = arith.constant 2 : index
    %c0_49 = arith.constant 0 : index
    %126 = vector.load %arg11[%c2, %c0_49] : memref<36x256xf32, #tpu.memory_space<vmem>>, vector<1x256xf32>
    tpu.vector_store %arg11[%c2, %c0_49], %125 {strides = array<i32>} : memref<36x256xf32, #tpu.memory_space<vmem>>, vector<1x256xf32>,
    %127 = vector.extract_strided_slice %111 {offsets = [48, 0], sizes = [16, 256], strides = [1, 1]} : vector<64x256xf32> to vector<16x256xf32>
    %128 = arith.mulf %127, %110 : vector<16x256xf32>
    %cst_50 = arith.constant dense<0.000000e+00> : vector<256xf32>
    %129 = vector.multi_reduction <add>, %128, %cst_50 [0] : vector<16x256xf32> to vector<256xf32>
    %130 = vector.shape_cast %129 : vector<256xf32> to vector<1x256xf32>
    %c3 = arith.constant 3 : index
    %c0_51 = arith.constant 0 : index
    %131 = vector.load %arg11[%c3, %c0_51] : memref<36x256xf32, #tpu.memory_space<vmem>>, vector<1x256xf32>
    tpu.vector_store %arg11[%c3, %c0_51], %130 {strides = array<i32>} : memref<36x256xf32, #tpu.memory_space<vmem>>, vector<1x256xf32>,
    %132 = vector.extract_strided_slice %51 {offsets = [1, 0], sizes = [1, 256], strides = [1, 1]} : vector<27x256xf32> to vector<1x256xf32>
    %133 = vector.extract_strided_slice %51 {offsets = [10, 0], sizes = [1, 256], strides = [1, 1]} : vector<27x256xf32> to vector<1x256xf32>
    %134 = vector.extract_strided_slice %51 {offsets = [19, 0], sizes = [1, 256], strides = [1, 1]} : vector<27x256xf32> to vector<1x256xf32>
    %cst_52 = arith.constant 0.000000e+00 : f32
    %135 = vector.broadcast %cst_52 : f32 to vector<1x256xf32>
    %136 = arith.subf %135, %134 : vector<1x256xf32>
    %137 = math.exp %136 : vector<1x256xf32>
    %cst_53 = arith.constant 1.000000e+00 : f32
    %138 = vector.broadcast %cst_53 : f32 to vector<1x256xf32>
    %139 = arith.addf %138, %137 : vector<1x256xf32>
    %140 = tpu.reciprocal %139 : vector<1x256xf32> -> vector<1x256xf32>
    %cst_54 = arith.constant -1.000000e+00 : f32
    %141 = vector.broadcast %cst_54 : f32 to vector<1x256xf32>
    %142 = arith.addf %4, %141 : vector<1x256xf32>
    %143 = arith.addf %142, %132 : vector<1x256xf32>
    %cst_55 = arith.constant 0.000000e+00 : f32
    %144 = vector.broadcast %cst_55 : f32 to vector<1x256xf32>
    %145 = arith.addf %5, %144 : vector<1x256xf32>
    %146 = arith.addf %145, %133 : vector<1x256xf32>
    %147 = math.floor %143 : vector<1x256xf32>
    %148 = math.floor %146 : vector<1x256xf32>
    %149 = arith.subf %143, %147 : vector<1x256xf32>
    %150 = arith.subf %146, %148 : vector<1x256xf32>
    %151 = arith.fptosi %147 : vector<1x256xf32> to vector<1x256xi32>
    %152 = arith.fptosi %148 : vector<1x256xf32> to vector<1x256xi32>
    %153 = vector.broadcast %152 : vector<1x256xi32> to vector<16x256xi32>
    %154 = arith.cmpi eq, %52, %153 : vector<16x256xi32>
    %cst_56 = arith.constant 1.000000e+00 : f32
    %155 = vector.broadcast %cst_56 : f32 to vector<1x256xf32>
    %156 = arith.subf %155, %150 : vector<1x256xf32>
    %cst_57 = arith.constant 0.000000e+00 : f32
    %157 = vector.shape_cast %156 : vector<1x256xf32> to vector<1x256xf32>
    %158 = vector.broadcast %157 : vector<1x256xf32> to vector<16x256xf32>
    %159 = vector.broadcast %cst_57 : f32 to vector<16x256xf32>
    %160 = arith.select %154, %158, %159 : vector<16x256xi1>, vector<16x256xf32>
    %c1_i32_58 = arith.constant 1 : i32
    %161 = vector.broadcast %c1_i32_58 : i32 to vector<1x256xi32>
    %162 = arith.addi %152, %161 : vector<1x256xi32>
    %163 = vector.broadcast %162 : vector<1x256xi32> to vector<16x256xi32>
    %164 = arith.cmpi eq, %52, %163 : vector<16x256xi32>
    %cst_59 = arith.constant 0.000000e+00 : f32
    %165 = vector.shape_cast %150 : vector<1x256xf32> to vector<1x256xf32>
    %166 = vector.broadcast %165 : vector<1x256xf32> to vector<16x256xf32>
    %167 = vector.broadcast %cst_59 : f32 to vector<16x256xf32>
    %168 = arith.select %164, %166, %167 : vector<16x256xi1>, vector<16x256xf32>
    %169 = arith.addf %160, %168 : vector<16x256xf32>
    %170 = vector.broadcast %151 : vector<1x256xi32> to vector<16x256xi32>
    %171 = arith.cmpi eq, %53, %170 : vector<16x256xi32>
    %cst_60 = arith.constant 1.000000e+00 : f32
    %172 = vector.broadcast %cst_60 : f32 to vector<1x256xf32>
    %173 = arith.subf %172, %149 : vector<1x256xf32>
    %cst_61 = arith.constant 0.000000e+00 : f32
    %174 = vector.shape_cast %173 : vector<1x256xf32> to vector<1x256xf32>
    %175 = vector.broadcast %174 : vector<1x256xf32> to vector<16x256xf32>
    %176 = vector.broadcast %cst_61 : f32 to vector<16x256xf32>
    %177 = arith.select %171, %175, %176 : vector<16x256xi1>, vector<16x256xf32>
    %c1_i32_62 = arith.constant 1 : i32
    %178 = vector.broadcast %c1_i32_62 : i32 to vector<1x256xi32>
    %179 = arith.addi %151, %178 : vector<1x256xi32>
    %180 = vector.broadcast %179 : vector<1x256xi32> to vector<16x256xi32>
    %181 = arith.cmpi eq, %53, %180 : vector<16x256xi32>
    %cst_63 = arith.constant 0.000000e+00 : f32
    %182 = vector.shape_cast %149 : vector<1x256xf32> to vector<1x256xf32>
    %183 = vector.broadcast %182 : vector<1x256xf32> to vector<16x256xf32>
    %184 = vector.broadcast %cst_63 : f32 to vector<16x256xf32>
    %185 = arith.select %181, %183, %184 : vector<16x256xi1>, vector<16x256xf32>
    %186 = arith.addf %177, %185 : vector<16x256xf32>
    %187 = vector.broadcast %140 : vector<1x256xf32> to vector<16x256xf32>
    %188 = arith.mulf %186, %187 : vector<16x256xf32>
    %cst_64 = arith.constant dense<0.000000e+00> : vector<64x256xf32>
    %189 = tpu.matmul %3, %169, %cst_64 {dimension_numbers = #tpu.dot_dimension_numbers<[1], [0], [0], [1], [0, 0, 1, 1], [], []>} : vector<64x16xf32>, vector<16x256xf32>, vector<64x256xf32> -> vector<64x256xf32>
    %190 = vector.extract_strided_slice %189 {offsets = [0, 0], sizes = [16, 256], strides = [1, 1]} : vector<64x256xf32> to vector<16x256xf32>
    %191 = arith.mulf %190, %188 : vector<16x256xf32>
    %cst_65 = arith.constant dense<0.000000e+00> : vector<256xf32>
    %192 = vector.multi_reduction <add>, %191, %cst_65 [0] : vector<16x256xf32> to vector<256xf32>
    %193 = vector.shape_cast %192 : vector<256xf32> to vector<1x256xf32>
    %c4_66 = arith.constant 4 : index
    %c0_67 = arith.constant 0 : index
    %194 = vector.load %arg11[%c4_66, %c0_67] : memref<36x256xf32, #tpu.memory_space<vmem>>, vector<1x256xf32>
    tpu.vector_store %arg11[%c4_66, %c0_67], %193 {strides = array<i32>} : memref<36x256xf32, #tpu.memory_space<vmem>>, vector<1x256xf32>,
    %195 = vector.extract_strided_slice %189 {offsets = [16, 0], sizes = [16, 256], strides = [1, 1]} : vector<64x256xf32> to vector<16x256xf32>
    %196 = arith.mulf %195, %188 : vector<16x256xf32>
    %cst_68 = arith.constant dense<0.000000e+00> : vector<256xf32>
    %197 = vector.multi_reduction <add>, %196, %cst_68 [0] : vector<16x256xf32> to vector<256xf32>
    %198 = vector.shape_cast %197 : vector<256xf32> to vector<1x256xf32>
    %c5 = arith.constant 5 : index
    %c0_69 = arith.constant 0 : index
    %199 = vector.load %arg11[%c5, %c0_69] : memref<36x256xf32, #tpu.memory_space<vmem>>, vector<1x256xf32>
    tpu.vector_store %arg11[%c5, %c0_69], %198 {strides = array<i32>} : memref<36x256xf32, #tpu.memory_space<vmem>>, vector<1x256xf32>,
    %200 = vector.extract_strided_slice %189 {offsets = [32, 0], sizes = [16, 256], strides = [1, 1]} : vector<64x256xf32> to vector<16x256xf32>
    %201 = arith.mulf %200, %188 : vector<16x256xf32>
    %cst_70 = arith.constant dense<0.000000e+00> : vector<256xf32>
    %202 = vector.multi_reduction <add>, %201, %cst_70 [0] : vector<16x256xf32> to vector<256xf32>
    %203 = vector.shape_cast %202 : vector<256xf32> to vector<1x256xf32>
    %c6 = arith.constant 6 : index
    %c0_71 = arith.constant 0 : index
    %204 = vector.load %arg11[%c6, %c0_71] : memref<36x256xf32, #tpu.memory_space<vmem>>, vector<1x256xf32>
    tpu.vector_store %arg11[%c6, %c0_71], %203 {strides = array<i32>} : memref<36x256xf32, #tpu.memory_space<vmem>>, vector<1x256xf32>,
    %205 = vector.extract_strided_slice %189 {offsets = [48, 0], sizes = [16, 256], strides = [1, 1]} : vector<64x256xf32> to vector<16x256xf32>
    %206 = arith.mulf %205, %188 : vector<16x256xf32>
    %cst_72 = arith.constant dense<0.000000e+00> : vector<256xf32>
    %207 = vector.multi_reduction <add>, %206, %cst_72 [0] : vector<16x256xf32> to vector<256xf32>
    %208 = vector.shape_cast %207 : vector<256xf32> to vector<1x256xf32>
    %c7 = arith.constant 7 : index
    %c0_73 = arith.constant 0 : index
    %209 = vector.load %arg11[%c7, %c0_73] : memref<36x256xf32, #tpu.memory_space<vmem>>, vector<1x256xf32>
    tpu.vector_store %arg11[%c7, %c0_73], %208 {strides = array<i32>} : memref<36x256xf32, #tpu.memory_space<vmem>>, vector<1x256xf32>,
    %210 = vector.extract_strided_slice %51 {offsets = [2, 0], sizes = [1, 256], strides = [1, 1]} : vector<27x256xf32> to vector<1x256xf32>
    %211 = vector.extract_strided_slice %51 {offsets = [11, 0], sizes = [1, 256], strides = [1, 1]} : vector<27x256xf32> to vector<1x256xf32>
    %212 = vector.extract_strided_slice %51 {offsets = [20, 0], sizes = [1, 256], strides = [1, 1]} : vector<27x256xf32> to vector<1x256xf32>
    %cst_74 = arith.constant 0.000000e+00 : f32
    %213 = vector.broadcast %cst_74 : f32 to vector<1x256xf32>
    %214 = arith.subf %213, %212 : vector<1x256xf32>
    %215 = math.exp %214 : vector<1x256xf32>
    %cst_75 = arith.constant 1.000000e+00 : f32
    %216 = vector.broadcast %cst_75 : f32 to vector<1x256xf32>
    %217 = arith.addf %216, %215 : vector<1x256xf32>
    %218 = tpu.reciprocal %217 : vector<1x256xf32> -> vector<1x256xf32>
    %cst_76 = arith.constant -1.000000e+00 : f32
    %219 = vector.broadcast %cst_76 : f32 to vector<1x256xf32>
    %220 = arith.addf %4, %219 : vector<1x256xf32>
    %221 = arith.addf %220, %210 : vector<1x256xf32>
    %cst_77 = arith.constant 1.000000e+00 : f32
    %222 = vector.broadcast %cst_77 : f32 to vector<1x256xf32>
    %223 = arith.addf %5, %222 : vector<1x256xf32>
    %224 = arith.addf %223, %211 : vector<1x256xf32>
    %225 = math.floor %221 : vector<1x256xf32>
    %226 = math.floor %224 : vector<1x256xf32>
    %227 = arith.subf %221, %225 : vector<1x256xf32>
    %228 = arith.subf %224, %226 : vector<1x256xf32>
    %229 = arith.fptosi %225 : vector<1x256xf32> to vector<1x256xi32>
    %230 = arith.fptosi %226 : vector<1x256xf32> to vector<1x256xi32>
    %231 = vector.broadcast %230 : vector<1x256xi32> to vector<16x256xi32>
    %232 = arith.cmpi eq, %52, %231 : vector<16x256xi32>
    %cst_78 = arith.constant 1.000000e+00 : f32
    %233 = vector.broadcast %cst_78 : f32 to vector<1x256xf32>
    %234 = arith.subf %233, %228 : vector<1x256xf32>
    %cst_79 = arith.constant 0.000000e+00 : f32
    %235 = vector.shape_cast %234 : vector<1x256xf32> to vector<1x256xf32>
    %236 = vector.broadcast %235 : vector<1x256xf32> to vector<16x256xf32>
    %237 = vector.broadcast %cst_79 : f32 to vector<16x256xf32>
    %238 = arith.select %232, %236, %237 : vector<16x256xi1>, vector<16x256xf32>
    %c1_i32_80 = arith.constant 1 : i32
    %239 = vector.broadcast %c1_i32_80 : i32 to vector<1x256xi32>
    %240 = arith.addi %230, %239 : vector<1x256xi32>
    %241 = vector.broadcast %240 : vector<1x256xi32> to vector<16x256xi32>
    %242 = arith.cmpi eq, %52, %241 : vector<16x256xi32>
    %cst_81 = arith.constant 0.000000e+00 : f32
    %243 = vector.shape_cast %228 : vector<1x256xf32> to vector<1x256xf32>
    %244 = vector.broadcast %243 : vector<1x256xf32> to vector<16x256xf32>
    %245 = vector.broadcast %cst_81 : f32 to vector<16x256xf32>
    %246 = arith.select %242, %244, %245 : vector<16x256xi1>, vector<16x256xf32>
    %247 = arith.addf %238, %246 : vector<16x256xf32>
    %248 = vector.broadcast %229 : vector<1x256xi32> to vector<16x256xi32>
    %249 = arith.cmpi eq, %53, %248 : vector<16x256xi32>
    %cst_82 = arith.constant 1.000000e+00 : f32
    %250 = vector.broadcast %cst_82 : f32 to vector<1x256xf32>
    %251 = arith.subf %250, %227 : vector<1x256xf32>
    %cst_83 = arith.constant 0.000000e+00 : f32
    %252 = vector.shape_cast %251 : vector<1x256xf32> to vector<1x256xf32>
    %253 = vector.broadcast %252 : vector<1x256xf32> to vector<16x256xf32>
    %254 = vector.broadcast %cst_83 : f32 to vector<16x256xf32>
    %255 = arith.select %249, %253, %254 : vector<16x256xi1>, vector<16x256xf32>
    %c1_i32_84 = arith.constant 1 : i32
    %256 = vector.broadcast %c1_i32_84 : i32 to vector<1x256xi32>
    %257 = arith.addi %229, %256 : vector<1x256xi32>
    %258 = vector.broadcast %257 : vector<1x256xi32> to vector<16x256xi32>
    %259 = arith.cmpi eq, %53, %258 : vector<16x256xi32>
    %cst_85 = arith.constant 0.000000e+00 : f32
    %260 = vector.shape_cast %227 : vector<1x256xf32> to vector<1x256xf32>
    %261 = vector.broadcast %260 : vector<1x256xf32> to vector<16x256xf32>
    %262 = vector.broadcast %cst_85 : f32 to vector<16x256xf32>
    %263 = arith.select %259, %261, %262 : vector<16x256xi1>, vector<16x256xf32>
    %264 = arith.addf %255, %263 : vector<16x256xf32>
    %265 = vector.broadcast %218 : vector<1x256xf32> to vector<16x256xf32>
    %266 = arith.mulf %264, %265 : vector<16x256xf32>
    %cst_86 = arith.constant dense<0.000000e+00> : vector<64x256xf32>
    %267 = tpu.matmul %3, %247, %cst_86 {dimension_numbers = #tpu.dot_dimension_numbers<[1], [0], [0], [1], [0, 0, 1, 1], [], []>} : vector<64x16xf32>, vector<16x256xf32>, vector<64x256xf32> -> vector<64x256xf32>
    %268 = vector.extract_strided_slice %267 {offsets = [0, 0], sizes = [16, 256], strides = [1, 1]} : vector<64x256xf32> to vector<16x256xf32>
    %269 = arith.mulf %268, %266 : vector<16x256xf32>
    %cst_87 = arith.constant dense<0.000000e+00> : vector<256xf32>
    %270 = vector.multi_reduction <add>, %269, %cst_87 [0] : vector<16x256xf32> to vector<256xf32>
    %271 = vector.shape_cast %270 : vector<256xf32> to vector<1x256xf32>
    %c8_88 = arith.constant 8 : index
    %c0_89 = arith.constant 0 : index
    %272 = vector.load %arg11[%c8_88, %c0_89] : memref<36x256xf32, #tpu.memory_space<vmem>>, vector<1x256xf32>
    tpu.vector_store %arg11[%c8_88, %c0_89], %271 {strides = array<i32>} : memref<36x256xf32, #tpu.memory_space<vmem>>, vector<1x256xf32>,
    %273 = vector.extract_strided_slice %267 {offsets = [16, 0], sizes = [16, 256], strides = [1, 1]} : vector<64x256xf32> to vector<16x256xf32>
    %274 = arith.mulf %273, %266 : vector<16x256xf32>
    %cst_90 = arith.constant dense<0.000000e+00> : vector<256xf32>
    %275 = vector.multi_reduction <add>, %274, %cst_90 [0] : vector<16x256xf32> to vector<256xf32>
    %276 = vector.shape_cast %275 : vector<256xf32> to vector<1x256xf32>
    %c9 = arith.constant 9 : index
    %c0_91 = arith.constant 0 : index
    %277 = vector.load %arg11[%c9, %c0_91] : memref<36x256xf32, #tpu.memory_space<vmem>>, vector<1x256xf32>
    tpu.vector_store %arg11[%c9, %c0_91], %276 {strides = array<i32>} : memref<36x256xf32, #tpu.memory_space<vmem>>, vector<1x256xf32>,
    %278 = vector.extract_strided_slice %267 {offsets = [32, 0], sizes = [16, 256], strides = [1, 1]} : vector<64x256xf32> to vector<16x256xf32>
    %279 = arith.mulf %278, %266 : vector<16x256xf32>
    %cst_92 = arith.constant dense<0.000000e+00> : vector<256xf32>
    %280 = vector.multi_reduction <add>, %279, %cst_92 [0] : vector<16x256xf32> to vector<256xf32>
    %281 = vector.shape_cast %280 : vector<256xf32> to vector<1x256xf32>
    %c10 = arith.constant 10 : index
    %c0_93 = arith.constant 0 : index
    %282 = vector.load %arg11[%c10, %c0_93] : memref<36x256xf32, #tpu.memory_space<vmem>>, vector<1x256xf32>
    tpu.vector_store %arg11[%c10, %c0_93], %281 {strides = array<i32>} : memref<36x256xf32, #tpu.memory_space<vmem>>, vector<1x256xf32>,
    %283 = vector.extract_strided_slice %267 {offsets = [48, 0], sizes = [16, 256], strides = [1, 1]} : vector<64x256xf32> to vector<16x256xf32>
    %284 = arith.mulf %283, %266 : vector<16x256xf32>
    %cst_94 = arith.constant dense<0.000000e+00> : vector<256xf32>
    %285 = vector.multi_reduction <add>, %284, %cst_94 [0] : vector<16x256xf32> to vector<256xf32>
    %286 = vector.shape_cast %285 : vector<256xf32> to vector<1x256xf32>
    %c11 = arith.constant 11 : index
    %c0_95 = arith.constant 0 : index
    %287 = vector.load %arg11[%c11, %c0_95] : memref<36x256xf32, #tpu.memory_space<vmem>>, vector<1x256xf32>
    tpu.vector_store %arg11[%c11, %c0_95], %286 {strides = array<i32>} : memref<36x256xf32, #tpu.memory_space<vmem>>, vector<1x256xf32>,
    %288 = vector.extract_strided_slice %51 {offsets = [3, 0], sizes = [1, 256], strides = [1, 1]} : vector<27x256xf32> to vector<1x256xf32>
    %289 = vector.extract_strided_slice %51 {offsets = [12, 0], sizes = [1, 256], strides = [1, 1]} : vector<27x256xf32> to vector<1x256xf32>
    %290 = vector.extract_strided_slice %51 {offsets = [21, 0], sizes = [1, 256], strides = [1, 1]} : vector<27x256xf32> to vector<1x256xf32>
    %cst_96 = arith.constant 0.000000e+00 : f32
    %291 = vector.broadcast %cst_96 : f32 to vector<1x256xf32>
    %292 = arith.subf %291, %290 : vector<1x256xf32>
    %293 = math.exp %292 : vector<1x256xf32>
    %cst_97 = arith.constant 1.000000e+00 : f32
    %294 = vector.broadcast %cst_97 : f32 to vector<1x256xf32>
    %295 = arith.addf %294, %293 : vector<1x256xf32>
    %296 = tpu.reciprocal %295 : vector<1x256xf32> -> vector<1x256xf32>
    %cst_98 = arith.constant 0.000000e+00 : f32
    %297 = vector.broadcast %cst_98 : f32 to vector<1x256xf32>
    %298 = arith.addf %4, %297 : vector<1x256xf32>
    %299 = arith.addf %298, %288 : vector<1x256xf32>
    %cst_99 = arith.constant -1.000000e+00 : f32
    %300 = vector.broadcast %cst_99 : f32 to vector<1x256xf32>
    %301 = arith.addf %5, %300 : vector<1x256xf32>
    %302 = arith.addf %301, %289 : vector<1x256xf32>
    %303 = math.floor %299 : vector<1x256xf32>
    %304 = math.floor %302 : vector<1x256xf32>
    %305 = arith.subf %299, %303 : vector<1x256xf32>
    %306 = arith.subf %302, %304 : vector<1x256xf32>
    %307 = arith.fptosi %303 : vector<1x256xf32> to vector<1x256xi32>
    %308 = arith.fptosi %304 : vector<1x256xf32> to vector<1x256xi32>
    %309 = vector.broadcast %308 : vector<1x256xi32> to vector<16x256xi32>
    %310 = arith.cmpi eq, %52, %309 : vector<16x256xi32>
    %cst_100 = arith.constant 1.000000e+00 : f32
    %311 = vector.broadcast %cst_100 : f32 to vector<1x256xf32>
    %312 = arith.subf %311, %306 : vector<1x256xf32>
    %cst_101 = arith.constant 0.000000e+00 : f32
    %313 = vector.shape_cast %312 : vector<1x256xf32> to vector<1x256xf32>
    %314 = vector.broadcast %313 : vector<1x256xf32> to vector<16x256xf32>
    %315 = vector.broadcast %cst_101 : f32 to vector<16x256xf32>
    %316 = arith.select %310, %314, %315 : vector<16x256xi1>, vector<16x256xf32>
    %c1_i32_102 = arith.constant 1 : i32
    %317 = vector.broadcast %c1_i32_102 : i32 to vector<1x256xi32>
    %318 = arith.addi %308, %317 : vector<1x256xi32>
    %319 = vector.broadcast %318 : vector<1x256xi32> to vector<16x256xi32>
    %320 = arith.cmpi eq, %52, %319 : vector<16x256xi32>
    %cst_103 = arith.constant 0.000000e+00 : f32
    %321 = vector.shape_cast %306 : vector<1x256xf32> to vector<1x256xf32>
    %322 = vector.broadcast %321 : vector<1x256xf32> to vector<16x256xf32>
    %323 = vector.broadcast %cst_103 : f32 to vector<16x256xf32>
    %324 = arith.select %320, %322, %323 : vector<16x256xi1>, vector<16x256xf32>
    %325 = arith.addf %316, %324 : vector<16x256xf32>
    %326 = vector.broadcast %307 : vector<1x256xi32> to vector<16x256xi32>
    %327 = arith.cmpi eq, %53, %326 : vector<16x256xi32>
    %cst_104 = arith.constant 1.000000e+00 : f32
    %328 = vector.broadcast %cst_104 : f32 to vector<1x256xf32>
    %329 = arith.subf %328, %305 : vector<1x256xf32>
    %cst_105 = arith.constant 0.000000e+00 : f32
    %330 = vector.shape_cast %329 : vector<1x256xf32> to vector<1x256xf32>
    %331 = vector.broadcast %330 : vector<1x256xf32> to vector<16x256xf32>
    %332 = vector.broadcast %cst_105 : f32 to vector<16x256xf32>
    %333 = arith.select %327, %331, %332 : vector<16x256xi1>, vector<16x256xf32>
    %c1_i32_106 = arith.constant 1 : i32
    %334 = vector.broadcast %c1_i32_106 : i32 to vector<1x256xi32>
    %335 = arith.addi %307, %334 : vector<1x256xi32>
    %336 = vector.broadcast %335 : vector<1x256xi32> to vector<16x256xi32>
    %337 = arith.cmpi eq, %53, %336 : vector<16x256xi32>
    %cst_107 = arith.constant 0.000000e+00 : f32
    %338 = vector.shape_cast %305 : vector<1x256xf32> to vector<1x256xf32>
    %339 = vector.broadcast %338 : vector<1x256xf32> to vector<16x256xf32>
    %340 = vector.broadcast %cst_107 : f32 to vector<16x256xf32>
    %341 = arith.select %337, %339, %340 : vector<16x256xi1>, vector<16x256xf32>
    %342 = arith.addf %333, %341 : vector<16x256xf32>
    %343 = vector.broadcast %296 : vector<1x256xf32> to vector<16x256xf32>
    %344 = arith.mulf %342, %343 : vector<16x256xf32>
    %cst_108 = arith.constant dense<0.000000e+00> : vector<64x256xf32>
    %345 = tpu.matmul %3, %325, %cst_108 {dimension_numbers = #tpu.dot_dimension_numbers<[1], [0], [0], [1], [0, 0, 1, 1], [], []>} : vector<64x16xf32>, vector<16x256xf32>, vector<64x256xf32> -> vector<64x256xf32>
    %346 = vector.extract_strided_slice %345 {offsets = [0, 0], sizes = [16, 256], strides = [1, 1]} : vector<64x256xf32> to vector<16x256xf32>
    %347 = arith.mulf %346, %344 : vector<16x256xf32>
    %cst_109 = arith.constant dense<0.000000e+00> : vector<256xf32>
    %348 = vector.multi_reduction <add>, %347, %cst_109 [0] : vector<16x256xf32> to vector<256xf32>
    %349 = vector.shape_cast %348 : vector<256xf32> to vector<1x256xf32>
    %c12_110 = arith.constant 12 : index
    %c0_111 = arith.constant 0 : index
    %350 = vector.load %arg11[%c12_110, %c0_111] : memref<36x256xf32, #tpu.memory_space<vmem>>, vector<1x256xf32>
    tpu.vector_store %arg11[%c12_110, %c0_111], %349 {strides = array<i32>} : memref<36x256xf32, #tpu.memory_space<vmem>>, vector<1x256xf32>,
    %351 = vector.extract_strided_slice %345 {offsets = [16, 0], sizes = [16, 256], strides = [1, 1]} : vector<64x256xf32> to vector<16x256xf32>
    %352 = arith.mulf %351, %344 : vector<16x256xf32>
    %cst_112 = arith.constant dense<0.000000e+00> : vector<256xf32>
    %353 = vector.multi_reduction <add>, %352, %cst_112 [0] : vector<16x256xf32> to vector<256xf32>
    %354 = vector.shape_cast %353 : vector<256xf32> to vector<1x256xf32>
    %c13 = arith.constant 13 : index
    %c0_113 = arith.constant 0 : index
    %355 = vector.load %arg11[%c13, %c0_113] : memref<36x256xf32, #tpu.memory_space<vmem>>, vector<1x256xf32>
    tpu.vector_store %arg11[%c13, %c0_113], %354 {strides = array<i32>} : memref<36x256xf32, #tpu.memory_space<vmem>>, vector<1x256xf32>,
    %356 = vector.extract_strided_slice %345 {offsets = [32, 0], sizes = [16, 256], strides = [1, 1]} : vector<64x256xf32> to vector<16x256xf32>
    %357 = arith.mulf %356, %344 : vector<16x256xf32>
    %cst_114 = arith.constant dense<0.000000e+00> : vector<256xf32>
    %358 = vector.multi_reduction <add>, %357, %cst_114 [0] : vector<16x256xf32> to vector<256xf32>
    %359 = vector.shape_cast %358 : vector<256xf32> to vector<1x256xf32>
    %c14 = arith.constant 14 : index
    %c0_115 = arith.constant 0 : index
    %360 = vector.load %arg11[%c14, %c0_115] : memref<36x256xf32, #tpu.memory_space<vmem>>, vector<1x256xf32>
    tpu.vector_store %arg11[%c14, %c0_115], %359 {strides = array<i32>} : memref<36x256xf32, #tpu.memory_space<vmem>>, vector<1x256xf32>,
    %361 = vector.extract_strided_slice %345 {offsets = [48, 0], sizes = [16, 256], strides = [1, 1]} : vector<64x256xf32> to vector<16x256xf32>
    %362 = arith.mulf %361, %344 : vector<16x256xf32>
    %cst_116 = arith.constant dense<0.000000e+00> : vector<256xf32>
    %363 = vector.multi_reduction <add>, %362, %cst_116 [0] : vector<16x256xf32> to vector<256xf32>
    %364 = vector.shape_cast %363 : vector<256xf32> to vector<1x256xf32>
    %c15 = arith.constant 15 : index
    %c0_117 = arith.constant 0 : index
    %365 = vector.load %arg11[%c15, %c0_117] : memref<36x256xf32, #tpu.memory_space<vmem>>, vector<1x256xf32>
    tpu.vector_store %arg11[%c15, %c0_117], %364 {strides = array<i32>} : memref<36x256xf32, #tpu.memory_space<vmem>>, vector<1x256xf32>,
    %366 = vector.extract_strided_slice %51 {offsets = [4, 0], sizes = [1, 256], strides = [1, 1]} : vector<27x256xf32> to vector<1x256xf32>
    %367 = vector.extract_strided_slice %51 {offsets = [13, 0], sizes = [1, 256], strides = [1, 1]} : vector<27x256xf32> to vector<1x256xf32>
    %368 = vector.extract_strided_slice %51 {offsets = [22, 0], sizes = [1, 256], strides = [1, 1]} : vector<27x256xf32> to vector<1x256xf32>
    %cst_118 = arith.constant 0.000000e+00 : f32
    %369 = vector.broadcast %cst_118 : f32 to vector<1x256xf32>
    %370 = arith.subf %369, %368 : vector<1x256xf32>
    %371 = math.exp %370 : vector<1x256xf32>
    %cst_119 = arith.constant 1.000000e+00 : f32
    %372 = vector.broadcast %cst_119 : f32 to vector<1x256xf32>
    %373 = arith.addf %372, %371 : vector<1x256xf32>
    %374 = tpu.reciprocal %373 : vector<1x256xf32> -> vector<1x256xf32>
    %cst_120 = arith.constant 0.000000e+00 : f32
    %375 = vector.broadcast %cst_120 : f32 to vector<1x256xf32>
    %376 = arith.addf %4, %375 : vector<1x256xf32>
    %377 = arith.addf %376, %366 : vector<1x256xf32>
    %cst_121 = arith.constant 0.000000e+00 : f32
    %378 = vector.broadcast %cst_121 : f32 to vector<1x256xf32>
    %379 = arith.addf %5, %378 : vector<1x256xf32>
    %380 = arith.addf %379, %367 : vector<1x256xf32>
    %381 = math.floor %377 : vector<1x256xf32>
    %382 = math.floor %380 : vector<1x256xf32>
    %383 = arith.subf %377, %381 : vector<1x256xf32>
    %384 = arith.subf %380, %382 : vector<1x256xf32>
    %385 = arith.fptosi %381 : vector<1x256xf32> to vector<1x256xi32>
    %386 = arith.fptosi %382 : vector<1x256xf32> to vector<1x256xi32>
    %387 = vector.broadcast %386 : vector<1x256xi32> to vector<16x256xi32>
    %388 = arith.cmpi eq, %52, %387 : vector<16x256xi32>
    %cst_122 = arith.constant 1.000000e+00 : f32
    %389 = vector.broadcast %cst_122 : f32 to vector<1x256xf32>
    %390 = arith.subf %389, %384 : vector<1x256xf32>
    %cst_123 = arith.constant 0.000000e+00 : f32
    %391 = vector.shape_cast %390 : vector<1x256xf32> to vector<1x256xf32>
    %392 = vector.broadcast %391 : vector<1x256xf32> to vector<16x256xf32>
    %393 = vector.broadcast %cst_123 : f32 to vector<16x256xf32>
    %394 = arith.select %388, %392, %393 : vector<16x256xi1>, vector<16x256xf32>
    %c1_i32_124 = arith.constant 1 : i32
    %395 = vector.broadcast %c1_i32_124 : i32 to vector<1x256xi32>
    %396 = arith.addi %386, %395 : vector<1x256xi32>
    %397 = vector.broadcast %396 : vector<1x256xi32> to vector<16x256xi32>
    %398 = arith.cmpi eq, %52, %397 : vector<16x256xi32>
    %cst_125 = arith.constant 0.000000e+00 : f32
    %399 = vector.shape_cast %384 : vector<1x256xf32> to vector<1x256xf32>
    %400 = vector.broadcast %399 : vector<1x256xf32> to vector<16x256xf32>
    %401 = vector.broadcast %cst_125 : f32 to vector<16x256xf32>
    %402 = arith.select %398, %400, %401 : vector<16x256xi1>, vector<16x256xf32>
    %403 = arith.addf %394, %402 : vector<16x256xf32>
    %404 = vector.broadcast %385 : vector<1x256xi32> to vector<16x256xi32>
    %405 = arith.cmpi eq, %53, %404 : vector<16x256xi32>
    %cst_126 = arith.constant 1.000000e+00 : f32
    %406 = vector.broadcast %cst_126 : f32 to vector<1x256xf32>
    %407 = arith.subf %406, %383 : vector<1x256xf32>
    %cst_127 = arith.constant 0.000000e+00 : f32
    %408 = vector.shape_cast %407 : vector<1x256xf32> to vector<1x256xf32>
    %409 = vector.broadcast %408 : vector<1x256xf32> to vector<16x256xf32>
    %410 = vector.broadcast %cst_127 : f32 to vector<16x256xf32>
    %411 = arith.select %405, %409, %410 : vector<16x256xi1>, vector<16x256xf32>
    %c1_i32_128 = arith.constant 1 : i32
    %412 = vector.broadcast %c1_i32_128 : i32 to vector<1x256xi32>
    %413 = arith.addi %385, %412 : vector<1x256xi32>
    %414 = vector.broadcast %413 : vector<1x256xi32> to vector<16x256xi32>
    %415 = arith.cmpi eq, %53, %414 : vector<16x256xi32>
    %cst_129 = arith.constant 0.000000e+00 : f32
    %416 = vector.shape_cast %383 : vector<1x256xf32> to vector<1x256xf32>
    %417 = vector.broadcast %416 : vector<1x256xf32> to vector<16x256xf32>
    %418 = vector.broadcast %cst_129 : f32 to vector<16x256xf32>
    %419 = arith.select %415, %417, %418 : vector<16x256xi1>, vector<16x256xf32>
    %420 = arith.addf %411, %419 : vector<16x256xf32>
    %421 = vector.broadcast %374 : vector<1x256xf32> to vector<16x256xf32>
    %422 = arith.mulf %420, %421 : vector<16x256xf32>
    %cst_130 = arith.constant dense<0.000000e+00> : vector<64x256xf32>
    %423 = tpu.matmul %3, %403, %cst_130 {dimension_numbers = #tpu.dot_dimension_numbers<[1], [0], [0], [1], [0, 0, 1, 1], [], []>} : vector<64x16xf32>, vector<16x256xf32>, vector<64x256xf32> -> vector<64x256xf32>
    %424 = vector.extract_strided_slice %423 {offsets = [0, 0], sizes = [16, 256], strides = [1, 1]} : vector<64x256xf32> to vector<16x256xf32>
    %425 = arith.mulf %424, %422 : vector<16x256xf32>
    %cst_131 = arith.constant dense<0.000000e+00> : vector<256xf32>
    %426 = vector.multi_reduction <add>, %425, %cst_131 [0] : vector<16x256xf32> to vector<256xf32>
    %427 = vector.shape_cast %426 : vector<256xf32> to vector<1x256xf32>
    %c16_132 = arith.constant 16 : index
    %c0_133 = arith.constant 0 : index
    %428 = vector.load %arg11[%c16_132, %c0_133] : memref<36x256xf32, #tpu.memory_space<vmem>>, vector<1x256xf32>
    tpu.vector_store %arg11[%c16_132, %c0_133], %427 {strides = array<i32>} : memref<36x256xf32, #tpu.memory_space<vmem>>, vector<1x256xf32>,
    %429 = vector.extract_strided_slice %423 {offsets = [16, 0], sizes = [16, 256], strides = [1, 1]} : vector<64x256xf32> to vector<16x256xf32>
    %430 = arith.mulf %429, %422 : vector<16x256xf32>
    %cst_134 = arith.constant dense<0.000000e+00> : vector<256xf32>
    %431 = vector.multi_reduction <add>, %430, %cst_134 [0] : vector<16x256xf32> to vector<256xf32>
    %432 = vector.shape_cast %431 : vector<256xf32> to vector<1x256xf32>
    %c17 = arith.constant 17 : index
    %c0_135 = arith.constant 0 : index
    %433 = vector.load %arg11[%c17, %c0_135] : memref<36x256xf32, #tpu.memory_space<vmem>>, vector<1x256xf32>
    tpu.vector_store %arg11[%c17, %c0_135], %432 {strides = array<i32>} : memref<36x256xf32, #tpu.memory_space<vmem>>, vector<1x256xf32>,
    %434 = vector.extract_strided_slice %423 {offsets = [32, 0], sizes = [16, 256], strides = [1, 1]} : vector<64x256xf32> to vector<16x256xf32>
    %435 = arith.mulf %434, %422 : vector<16x256xf32>
    %cst_136 = arith.constant dense<0.000000e+00> : vector<256xf32>
    %436 = vector.multi_reduction <add>, %435, %cst_136 [0] : vector<16x256xf32> to vector<256xf32>
    %437 = vector.shape_cast %436 : vector<256xf32> to vector<1x256xf32>
    %c18 = arith.constant 18 : index
    %c0_137 = arith.constant 0 : index
    %438 = vector.load %arg11[%c18, %c0_137] : memref<36x256xf32, #tpu.memory_space<vmem>>, vector<1x256xf32>
    tpu.vector_store %arg11[%c18, %c0_137], %437 {strides = array<i32>} : memref<36x256xf32, #tpu.memory_space<vmem>>, vector<1x256xf32>,
    %439 = vector.extract_strided_slice %423 {offsets = [48, 0], sizes = [16, 256], strides = [1, 1]} : vector<64x256xf32> to vector<16x256xf32>
    %440 = arith.mulf %439, %422 : vector<16x256xf32>
    %cst_138 = arith.constant dense<0.000000e+00> : vector<256xf32>
    %441 = vector.multi_reduction <add>, %440, %cst_138 [0] : vector<16x256xf32> to vector<256xf32>
    %442 = vector.shape_cast %441 : vector<256xf32> to vector<1x256xf32>
    %c19 = arith.constant 19 : index
    %c0_139 = arith.constant 0 : index
    %443 = vector.load %arg11[%c19, %c0_139] : memref<36x256xf32, #tpu.memory_space<vmem>>, vector<1x256xf32>
    tpu.vector_store %arg11[%c19, %c0_139], %442 {strides = array<i32>} : memref<36x256xf32, #tpu.memory_space<vmem>>, vector<1x256xf32>,
    %444 = vector.extract_strided_slice %51 {offsets = [5, 0], sizes = [1, 256], strides = [1, 1]} : vector<27x256xf32> to vector<1x256xf32>
    %445 = vector.extract_strided_slice %51 {offsets = [14, 0], sizes = [1, 256], strides = [1, 1]} : vector<27x256xf32> to vector<1x256xf32>
    %446 = vector.extract_strided_slice %51 {offsets = [23, 0], sizes = [1, 256], strides = [1, 1]} : vector<27x256xf32> to vector<1x256xf32>
    %cst_140 = arith.constant 0.000000e+00 : f32
    %447 = vector.broadcast %cst_140 : f32 to vector<1x256xf32>
    %448 = arith.subf %447, %446 : vector<1x256xf32>
    %449 = math.exp %448 : vector<1x256xf32>
    %cst_141 = arith.constant 1.000000e+00 : f32
    %450 = vector.broadcast %cst_141 : f32 to vector<1x256xf32>
    %451 = arith.addf %450, %449 : vector<1x256xf32>
    %452 = tpu.reciprocal %451 : vector<1x256xf32> -> vector<1x256xf32>
    %cst_142 = arith.constant 0.000000e+00 : f32
    %453 = vector.broadcast %cst_142 : f32 to vector<1x256xf32>
    %454 = arith.addf %4, %453 : vector<1x256xf32>
    %455 = arith.addf %454, %444 : vector<1x256xf32>
    %cst_143 = arith.constant 1.000000e+00 : f32
    %456 = vector.broadcast %cst_143 : f32 to vector<1x256xf32>
    %457 = arith.addf %5, %456 : vector<1x256xf32>
    %458 = arith.addf %457, %445 : vector<1x256xf32>
    %459 = math.floor %455 : vector<1x256xf32>
    %460 = math.floor %458 : vector<1x256xf32>
    %461 = arith.subf %455, %459 : vector<1x256xf32>
    %462 = arith.subf %458, %460 : vector<1x256xf32>
    %463 = arith.fptosi %459 : vector<1x256xf32> to vector<1x256xi32>
    %464 = arith.fptosi %460 : vector<1x256xf32> to vector<1x256xi32>
    %465 = vector.broadcast %464 : vector<1x256xi32> to vector<16x256xi32>
    %466 = arith.cmpi eq, %52, %465 : vector<16x256xi32>
    %cst_144 = arith.constant 1.000000e+00 : f32
    %467 = vector.broadcast %cst_144 : f32 to vector<1x256xf32>
    %468 = arith.subf %467, %462 : vector<1x256xf32>
    %cst_145 = arith.constant 0.000000e+00 : f32
    %469 = vector.shape_cast %468 : vector<1x256xf32> to vector<1x256xf32>
    %470 = vector.broadcast %469 : vector<1x256xf32> to vector<16x256xf32>
    %471 = vector.broadcast %cst_145 : f32 to vector<16x256xf32>
    %472 = arith.select %466, %470, %471 : vector<16x256xi1>, vector<16x256xf32>
    %c1_i32_146 = arith.constant 1 : i32
    %473 = vector.broadcast %c1_i32_146 : i32 to vector<1x256xi32>
    %474 = arith.addi %464, %473 : vector<1x256xi32>
    %475 = vector.broadcast %474 : vector<1x256xi32> to vector<16x256xi32>
    %476 = arith.cmpi eq, %52, %475 : vector<16x256xi32>
    %cst_147 = arith.constant 0.000000e+00 : f32
    %477 = vector.shape_cast %462 : vector<1x256xf32> to vector<1x256xf32>
    %478 = vector.broadcast %477 : vector<1x256xf32> to vector<16x256xf32>
    %479 = vector.broadcast %cst_147 : f32 to vector<16x256xf32>
    %480 = arith.select %476, %478, %479 : vector<16x256xi1>, vector<16x256xf32>
    %481 = arith.addf %472, %480 : vector<16x256xf32>
    %482 = vector.broadcast %463 : vector<1x256xi32> to vector<16x256xi32>
    %483 = arith.cmpi eq, %53, %482 : vector<16x256xi32>
    %cst_148 = arith.constant 1.000000e+00 : f32
    %484 = vector.broadcast %cst_148 : f32 to vector<1x256xf32>
    %485 = arith.subf %484, %461 : vector<1x256xf32>
    %cst_149 = arith.constant 0.000000e+00 : f32
    %486 = vector.shape_cast %485 : vector<1x256xf32> to vector<1x256xf32>
    %487 = vector.broadcast %486 : vector<1x256xf32> to vector<16x256xf32>
    %488 = vector.broadcast %cst_149 : f32 to vector<16x256xf32>
    %489 = arith.select %483, %487, %488 : vector<16x256xi1>, vector<16x256xf32>
    %c1_i32_150 = arith.constant 1 : i32
    %490 = vector.broadcast %c1_i32_150 : i32 to vector<1x256xi32>
    %491 = arith.addi %463, %490 : vector<1x256xi32>
    %492 = vector.broadcast %491 : vector<1x256xi32> to vector<16x256xi32>
    %493 = arith.cmpi eq, %53, %492 : vector<16x256xi32>
    %cst_151 = arith.constant 0.000000e+00 : f32
    %494 = vector.shape_cast %461 : vector<1x256xf32> to vector<1x256xf32>
    %495 = vector.broadcast %494 : vector<1x256xf32> to vector<16x256xf32>
    %496 = vector.broadcast %cst_151 : f32 to vector<16x256xf32>
    %497 = arith.select %493, %495, %496 : vector<16x256xi1>, vector<16x256xf32>
    %498 = arith.addf %489, %497 : vector<16x256xf32>
    %499 = vector.broadcast %452 : vector<1x256xf32> to vector<16x256xf32>
    %500 = arith.mulf %498, %499 : vector<16x256xf32>
    %cst_152 = arith.constant dense<0.000000e+00> : vector<64x256xf32>
    %501 = tpu.matmul %3, %481, %cst_152 {dimension_numbers = #tpu.dot_dimension_numbers<[1], [0], [0], [1], [0, 0, 1, 1], [], []>} : vector<64x16xf32>, vector<16x256xf32>, vector<64x256xf32> -> vector<64x256xf32>
    %502 = vector.extract_strided_slice %501 {offsets = [0, 0], sizes = [16, 256], strides = [1, 1]} : vector<64x256xf32> to vector<16x256xf32>
    %503 = arith.mulf %502, %500 : vector<16x256xf32>
    %cst_153 = arith.constant dense<0.000000e+00> : vector<256xf32>
    %504 = vector.multi_reduction <add>, %503, %cst_153 [0] : vector<16x256xf32> to vector<256xf32>
    %505 = vector.shape_cast %504 : vector<256xf32> to vector<1x256xf32>
    %c20_154 = arith.constant 20 : index
    %c0_155 = arith.constant 0 : index
    %506 = vector.load %arg11[%c20_154, %c0_155] : memref<36x256xf32, #tpu.memory_space<vmem>>, vector<1x256xf32>
    tpu.vector_store %arg11[%c20_154, %c0_155], %505 {strides = array<i32>} : memref<36x256xf32, #tpu.memory_space<vmem>>, vector<1x256xf32>,
    %507 = vector.extract_strided_slice %501 {offsets = [16, 0], sizes = [16, 256], strides = [1, 1]} : vector<64x256xf32> to vector<16x256xf32>
    %508 = arith.mulf %507, %500 : vector<16x256xf32>
    %cst_156 = arith.constant dense<0.000000e+00> : vector<256xf32>
    %509 = vector.multi_reduction <add>, %508, %cst_156 [0] : vector<16x256xf32> to vector<256xf32>
    %510 = vector.shape_cast %509 : vector<256xf32> to vector<1x256xf32>
    %c21 = arith.constant 21 : index
    %c0_157 = arith.constant 0 : index
    %511 = vector.load %arg11[%c21, %c0_157] : memref<36x256xf32, #tpu.memory_space<vmem>>, vector<1x256xf32>
    tpu.vector_store %arg11[%c21, %c0_157], %510 {strides = array<i32>} : memref<36x256xf32, #tpu.memory_space<vmem>>, vector<1x256xf32>,
    %512 = vector.extract_strided_slice %501 {offsets = [32, 0], sizes = [16, 256], strides = [1, 1]} : vector<64x256xf32> to vector<16x256xf32>
    %513 = arith.mulf %512, %500 : vector<16x256xf32>
    %cst_158 = arith.constant dense<0.000000e+00> : vector<256xf32>
    %514 = vector.multi_reduction <add>, %513, %cst_158 [0] : vector<16x256xf32> to vector<256xf32>
    %515 = vector.shape_cast %514 : vector<256xf32> to vector<1x256xf32>
    %c22 = arith.constant 22 : index
    %c0_159 = arith.constant 0 : index
    %516 = vector.load %arg11[%c22, %c0_159] : memref<36x256xf32, #tpu.memory_space<vmem>>, vector<1x256xf32>
    tpu.vector_store %arg11[%c22, %c0_159], %515 {strides = array<i32>} : memref<36x256xf32, #tpu.memory_space<vmem>>, vector<1x256xf32>,
    %517 = vector.extract_strided_slice %501 {offsets = [48, 0], sizes = [16, 256], strides = [1, 1]} : vector<64x256xf32> to vector<16x256xf32>
    %518 = arith.mulf %517, %500 : vector<16x256xf32>
    %cst_160 = arith.constant dense<0.000000e+00> : vector<256xf32>
    %519 = vector.multi_reduction <add>, %518, %cst_160 [0] : vector<16x256xf32> to vector<256xf32>
    %520 = vector.shape_cast %519 : vector<256xf32> to vector<1x256xf32>
    %c23 = arith.constant 23 : index
    %c0_161 = arith.constant 0 : index
    %521 = vector.load %arg11[%c23, %c0_161] : memref<36x256xf32, #tpu.memory_space<vmem>>, vector<1x256xf32>
    tpu.vector_store %arg11[%c23, %c0_161], %520 {strides = array<i32>} : memref<36x256xf32, #tpu.memory_space<vmem>>, vector<1x256xf32>,
    %522 = vector.extract_strided_slice %51 {offsets = [6, 0], sizes = [1, 256], strides = [1, 1]} : vector<27x256xf32> to vector<1x256xf32>
    %523 = vector.extract_strided_slice %51 {offsets = [15, 0], sizes = [1, 256], strides = [1, 1]} : vector<27x256xf32> to vector<1x256xf32>
    %524 = vector.extract_strided_slice %51 {offsets = [24, 0], sizes = [1, 256], strides = [1, 1]} : vector<27x256xf32> to vector<1x256xf32>
    %cst_162 = arith.constant 0.000000e+00 : f32
    %525 = vector.broadcast %cst_162 : f32 to vector<1x256xf32>
    %526 = arith.subf %525, %524 : vector<1x256xf32>
    %527 = math.exp %526 : vector<1x256xf32>
    %cst_163 = arith.constant 1.000000e+00 : f32
    %528 = vector.broadcast %cst_163 : f32 to vector<1x256xf32>
    %529 = arith.addf %528, %527 : vector<1x256xf32>
    %530 = tpu.reciprocal %529 : vector<1x256xf32> -> vector<1x256xf32>
    %cst_164 = arith.constant 1.000000e+00 : f32
    %531 = vector.broadcast %cst_164 : f32 to vector<1x256xf32>
    %532 = arith.addf %4, %531 : vector<1x256xf32>
    %533 = arith.addf %532, %522 : vector<1x256xf32>
    %cst_165 = arith.constant -1.000000e+00 : f32
    %534 = vector.broadcast %cst_165 : f32 to vector<1x256xf32>
    %535 = arith.addf %5, %534 : vector<1x256xf32>
    %536 = arith.addf %535, %523 : vector<1x256xf32>
    %537 = math.floor %533 : vector<1x256xf32>
    %538 = math.floor %536 : vector<1x256xf32>
    %539 = arith.subf %533, %537 : vector<1x256xf32>
    %540 = arith.subf %536, %538 : vector<1x256xf32>
    %541 = arith.fptosi %537 : vector<1x256xf32> to vector<1x256xi32>
    %542 = arith.fptosi %538 : vector<1x256xf32> to vector<1x256xi32>
    %543 = vector.broadcast %542 : vector<1x256xi32> to vector<16x256xi32>
    %544 = arith.cmpi eq, %52, %543 : vector<16x256xi32>
    %cst_166 = arith.constant 1.000000e+00 : f32
    %545 = vector.broadcast %cst_166 : f32 to vector<1x256xf32>
    %546 = arith.subf %545, %540 : vector<1x256xf32>
    %cst_167 = arith.constant 0.000000e+00 : f32
    %547 = vector.shape_cast %546 : vector<1x256xf32> to vector<1x256xf32>
    %548 = vector.broadcast %547 : vector<1x256xf32> to vector<16x256xf32>
    %549 = vector.broadcast %cst_167 : f32 to vector<16x256xf32>
    %550 = arith.select %544, %548, %549 : vector<16x256xi1>, vector<16x256xf32>
    %c1_i32_168 = arith.constant 1 : i32
    %551 = vector.broadcast %c1_i32_168 : i32 to vector<1x256xi32>
    %552 = arith.addi %542, %551 : vector<1x256xi32>
    %553 = vector.broadcast %552 : vector<1x256xi32> to vector<16x256xi32>
    %554 = arith.cmpi eq, %52, %553 : vector<16x256xi32>
    %cst_169 = arith.constant 0.000000e+00 : f32
    %555 = vector.shape_cast %540 : vector<1x256xf32> to vector<1x256xf32>
    %556 = vector.broadcast %555 : vector<1x256xf32> to vector<16x256xf32>
    %557 = vector.broadcast %cst_169 : f32 to vector<16x256xf32>
    %558 = arith.select %554, %556, %557 : vector<16x256xi1>, vector<16x256xf32>
    %559 = arith.addf %550, %558 : vector<16x256xf32>
    %560 = vector.broadcast %541 : vector<1x256xi32> to vector<16x256xi32>
    %561 = arith.cmpi eq, %53, %560 : vector<16x256xi32>
    %cst_170 = arith.constant 1.000000e+00 : f32
    %562 = vector.broadcast %cst_170 : f32 to vector<1x256xf32>
    %563 = arith.subf %562, %539 : vector<1x256xf32>
    %cst_171 = arith.constant 0.000000e+00 : f32
    %564 = vector.shape_cast %563 : vector<1x256xf32> to vector<1x256xf32>
    %565 = vector.broadcast %564 : vector<1x256xf32> to vector<16x256xf32>
    %566 = vector.broadcast %cst_171 : f32 to vector<16x256xf32>
    %567 = arith.select %561, %565, %566 : vector<16x256xi1>, vector<16x256xf32>
    %c1_i32_172 = arith.constant 1 : i32
    %568 = vector.broadcast %c1_i32_172 : i32 to vector<1x256xi32>
    %569 = arith.addi %541, %568 : vector<1x256xi32>
    %570 = vector.broadcast %569 : vector<1x256xi32> to vector<16x256xi32>
    %571 = arith.cmpi eq, %53, %570 : vector<16x256xi32>
    %cst_173 = arith.constant 0.000000e+00 : f32
    %572 = vector.shape_cast %539 : vector<1x256xf32> to vector<1x256xf32>
    %573 = vector.broadcast %572 : vector<1x256xf32> to vector<16x256xf32>
    %574 = vector.broadcast %cst_173 : f32 to vector<16x256xf32>
    %575 = arith.select %571, %573, %574 : vector<16x256xi1>, vector<16x256xf32>
    %576 = arith.addf %567, %575 : vector<16x256xf32>
    %577 = vector.broadcast %530 : vector<1x256xf32> to vector<16x256xf32>
    %578 = arith.mulf %576, %577 : vector<16x256xf32>
    %cst_174 = arith.constant dense<0.000000e+00> : vector<64x256xf32>
    %579 = tpu.matmul %3, %559, %cst_174 {dimension_numbers = #tpu.dot_dimension_numbers<[1], [0], [0], [1], [0, 0, 1, 1], [], []>} : vector<64x16xf32>, vector<16x256xf32>, vector<64x256xf32> -> vector<64x256xf32>
    %580 = vector.extract_strided_slice %579 {offsets = [0, 0], sizes = [16, 256], strides = [1, 1]} : vector<64x256xf32> to vector<16x256xf32>
    %581 = arith.mulf %580, %578 : vector<16x256xf32>
    %cst_175 = arith.constant dense<0.000000e+00> : vector<256xf32>
    %582 = vector.multi_reduction <add>, %581, %cst_175 [0] : vector<16x256xf32> to vector<256xf32>
    %583 = vector.shape_cast %582 : vector<256xf32> to vector<1x256xf32>
    %c24_176 = arith.constant 24 : index
    %c0_177 = arith.constant 0 : index
    %584 = vector.load %arg11[%c24_176, %c0_177] : memref<36x256xf32, #tpu.memory_space<vmem>>, vector<1x256xf32>
    tpu.vector_store %arg11[%c24_176, %c0_177], %583 {strides = array<i32>} : memref<36x256xf32, #tpu.memory_space<vmem>>, vector<1x256xf32>,
    %585 = vector.extract_strided_slice %579 {offsets = [16, 0], sizes = [16, 256], strides = [1, 1]} : vector<64x256xf32> to vector<16x256xf32>
    %586 = arith.mulf %585, %578 : vector<16x256xf32>
    %cst_178 = arith.constant dense<0.000000e+00> : vector<256xf32>
    %587 = vector.multi_reduction <add>, %586, %cst_178 [0] : vector<16x256xf32> to vector<256xf32>
    %588 = vector.shape_cast %587 : vector<256xf32> to vector<1x256xf32>
    %c25 = arith.constant 25 : index
    %c0_179 = arith.constant 0 : index
    %589 = vector.load %arg11[%c25, %c0_179] : memref<36x256xf32, #tpu.memory_space<vmem>>, vector<1x256xf32>
    tpu.vector_store %arg11[%c25, %c0_179], %588 {strides = array<i32>} : memref<36x256xf32, #tpu.memory_space<vmem>>, vector<1x256xf32>,
    %590 = vector.extract_strided_slice %579 {offsets = [32, 0], sizes = [16, 256], strides = [1, 1]} : vector<64x256xf32> to vector<16x256xf32>
    %591 = arith.mulf %590, %578 : vector<16x256xf32>
    %cst_180 = arith.constant dense<0.000000e+00> : vector<256xf32>
    %592 = vector.multi_reduction <add>, %591, %cst_180 [0] : vector<16x256xf32> to vector<256xf32>
    %593 = vector.shape_cast %592 : vector<256xf32> to vector<1x256xf32>
    %c26 = arith.constant 26 : index
    %c0_181 = arith.constant 0 : index
    %594 = vector.load %arg11[%c26, %c0_181] : memref<36x256xf32, #tpu.memory_space<vmem>>, vector<1x256xf32>
    tpu.vector_store %arg11[%c26, %c0_181], %593 {strides = array<i32>} : memref<36x256xf32, #tpu.memory_space<vmem>>, vector<1x256xf32>,
    %595 = vector.extract_strided_slice %579 {offsets = [48, 0], sizes = [16, 256], strides = [1, 1]} : vector<64x256xf32> to vector<16x256xf32>
    %596 = arith.mulf %595, %578 : vector<16x256xf32>
    %cst_182 = arith.constant dense<0.000000e+00> : vector<256xf32>
    %597 = vector.multi_reduction <add>, %596, %cst_182 [0] : vector<16x256xf32> to vector<256xf32>
    %598 = vector.shape_cast %597 : vector<256xf32> to vector<1x256xf32>
    %c27 = arith.constant 27 : index
    %c0_183 = arith.constant 0 : index
    %599 = vector.load %arg11[%c27, %c0_183] : memref<36x256xf32, #tpu.memory_space<vmem>>, vector<1x256xf32>
    tpu.vector_store %arg11[%c27, %c0_183], %598 {strides = array<i32>} : memref<36x256xf32, #tpu.memory_space<vmem>>, vector<1x256xf32>,
    %600 = vector.extract_strided_slice %51 {offsets = [7, 0], sizes = [1, 256], strides = [1, 1]} : vector<27x256xf32> to vector<1x256xf32>
    %601 = vector.extract_strided_slice %51 {offsets = [16, 0], sizes = [1, 256], strides = [1, 1]} : vector<27x256xf32> to vector<1x256xf32>
    %602 = vector.extract_strided_slice %51 {offsets = [25, 0], sizes = [1, 256], strides = [1, 1]} : vector<27x256xf32> to vector<1x256xf32>
    %cst_184 = arith.constant 0.000000e+00 : f32
    %603 = vector.broadcast %cst_184 : f32 to vector<1x256xf32>
    %604 = arith.subf %603, %602 : vector<1x256xf32>
    %605 = math.exp %604 : vector<1x256xf32>
    %cst_185 = arith.constant 1.000000e+00 : f32
    %606 = vector.broadcast %cst_185 : f32 to vector<1x256xf32>
    %607 = arith.addf %606, %605 : vector<1x256xf32>
    %608 = tpu.reciprocal %607 : vector<1x256xf32> -> vector<1x256xf32>
    %cst_186 = arith.constant 1.000000e+00 : f32
    %609 = vector.broadcast %cst_186 : f32 to vector<1x256xf32>
    %610 = arith.addf %4, %609 : vector<1x256xf32>
    %611 = arith.addf %610, %600 : vector<1x256xf32>
    %cst_187 = arith.constant 0.000000e+00 : f32
    %612 = vector.broadcast %cst_187 : f32 to vector<1x256xf32>
    %613 = arith.addf %5, %612 : vector<1x256xf32>
    %614 = arith.addf %613, %601 : vector<1x256xf32>
    %615 = math.floor %611 : vector<1x256xf32>
    %616 = math.floor %614 : vector<1x256xf32>
    %617 = arith.subf %611, %615 : vector<1x256xf32>
    %618 = arith.subf %614, %616 : vector<1x256xf32>
    %619 = arith.fptosi %615 : vector<1x256xf32> to vector<1x256xi32>
    %620 = arith.fptosi %616 : vector<1x256xf32> to vector<1x256xi32>
    %621 = vector.broadcast %620 : vector<1x256xi32> to vector<16x256xi32>
    %622 = arith.cmpi eq, %52, %621 : vector<16x256xi32>
    %cst_188 = arith.constant 1.000000e+00 : f32
    %623 = vector.broadcast %cst_188 : f32 to vector<1x256xf32>
    %624 = arith.subf %623, %618 : vector<1x256xf32>
    %cst_189 = arith.constant 0.000000e+00 : f32
    %625 = vector.shape_cast %624 : vector<1x256xf32> to vector<1x256xf32>
    %626 = vector.broadcast %625 : vector<1x256xf32> to vector<16x256xf32>
    %627 = vector.broadcast %cst_189 : f32 to vector<16x256xf32>
    %628 = arith.select %622, %626, %627 : vector<16x256xi1>, vector<16x256xf32>
    %c1_i32_190 = arith.constant 1 : i32
    %629 = vector.broadcast %c1_i32_190 : i32 to vector<1x256xi32>
    %630 = arith.addi %620, %629 : vector<1x256xi32>
    %631 = vector.broadcast %630 : vector<1x256xi32> to vector<16x256xi32>
    %632 = arith.cmpi eq, %52, %631 : vector<16x256xi32>
    %cst_191 = arith.constant 0.000000e+00 : f32
    %633 = vector.shape_cast %618 : vector<1x256xf32> to vector<1x256xf32>
    %634 = vector.broadcast %633 : vector<1x256xf32> to vector<16x256xf32>
    %635 = vector.broadcast %cst_191 : f32 to vector<16x256xf32>
    %636 = arith.select %632, %634, %635 : vector<16x256xi1>, vector<16x256xf32>
    %637 = arith.addf %628, %636 : vector<16x256xf32>
    %638 = vector.broadcast %619 : vector<1x256xi32> to vector<16x256xi32>
    %639 = arith.cmpi eq, %53, %638 : vector<16x256xi32>
    %cst_192 = arith.constant 1.000000e+00 : f32
    %640 = vector.broadcast %cst_192 : f32 to vector<1x256xf32>
    %641 = arith.subf %640, %617 : vector<1x256xf32>
    %cst_193 = arith.constant 0.000000e+00 : f32
    %642 = vector.shape_cast %641 : vector<1x256xf32> to vector<1x256xf32>
    %643 = vector.broadcast %642 : vector<1x256xf32> to vector<16x256xf32>
    %644 = vector.broadcast %cst_193 : f32 to vector<16x256xf32>
    %645 = arith.select %639, %643, %644 : vector<16x256xi1>, vector<16x256xf32>
    %c1_i32_194 = arith.constant 1 : i32
    %646 = vector.broadcast %c1_i32_194 : i32 to vector<1x256xi32>
    %647 = arith.addi %619, %646 : vector<1x256xi32>
    %648 = vector.broadcast %647 : vector<1x256xi32> to vector<16x256xi32>
    %649 = arith.cmpi eq, %53, %648 : vector<16x256xi32>
    %cst_195 = arith.constant 0.000000e+00 : f32
    %650 = vector.shape_cast %617 : vector<1x256xf32> to vector<1x256xf32>
    %651 = vector.broadcast %650 : vector<1x256xf32> to vector<16x256xf32>
    %652 = vector.broadcast %cst_195 : f32 to vector<16x256xf32>
    %653 = arith.select %649, %651, %652 : vector<16x256xi1>, vector<16x256xf32>
    %654 = arith.addf %645, %653 : vector<16x256xf32>
    %655 = vector.broadcast %608 : vector<1x256xf32> to vector<16x256xf32>
    %656 = arith.mulf %654, %655 : vector<16x256xf32>
    %cst_196 = arith.constant dense<0.000000e+00> : vector<64x256xf32>
    %657 = tpu.matmul %3, %637, %cst_196 {dimension_numbers = #tpu.dot_dimension_numbers<[1], [0], [0], [1], [0, 0, 1, 1], [], []>} : vector<64x16xf32>, vector<16x256xf32>, vector<64x256xf32> -> vector<64x256xf32>
    %658 = vector.extract_strided_slice %657 {offsets = [0, 0], sizes = [16, 256], strides = [1, 1]} : vector<64x256xf32> to vector<16x256xf32>
    %659 = arith.mulf %658, %656 : vector<16x256xf32>
    %cst_197 = arith.constant dense<0.000000e+00> : vector<256xf32>
    %660 = vector.multi_reduction <add>, %659, %cst_197 [0] : vector<16x256xf32> to vector<256xf32>
    %661 = vector.shape_cast %660 : vector<256xf32> to vector<1x256xf32>
    %c28_198 = arith.constant 28 : index
    %c0_199 = arith.constant 0 : index
    %662 = vector.load %arg11[%c28_198, %c0_199] : memref<36x256xf32, #tpu.memory_space<vmem>>, vector<1x256xf32>
    tpu.vector_store %arg11[%c28_198, %c0_199], %661 {strides = array<i32>} : memref<36x256xf32, #tpu.memory_space<vmem>>, vector<1x256xf32>,
    %663 = vector.extract_strided_slice %657 {offsets = [16, 0], sizes = [16, 256], strides = [1, 1]} : vector<64x256xf32> to vector<16x256xf32>
    %664 = arith.mulf %663, %656 : vector<16x256xf32>
    %cst_200 = arith.constant dense<0.000000e+00> : vector<256xf32>
    %665 = vector.multi_reduction <add>, %664, %cst_200 [0] : vector<16x256xf32> to vector<256xf32>
    %666 = vector.shape_cast %665 : vector<256xf32> to vector<1x256xf32>
    %c29 = arith.constant 29 : index
    %c0_201 = arith.constant 0 : index
    %667 = vector.load %arg11[%c29, %c0_201] : memref<36x256xf32, #tpu.memory_space<vmem>>, vector<1x256xf32>
    tpu.vector_store %arg11[%c29, %c0_201], %666 {strides = array<i32>} : memref<36x256xf32, #tpu.memory_space<vmem>>, vector<1x256xf32>,
    %668 = vector.extract_strided_slice %657 {offsets = [32, 0], sizes = [16, 256], strides = [1, 1]} : vector<64x256xf32> to vector<16x256xf32>
    %669 = arith.mulf %668, %656 : vector<16x256xf32>
    %cst_202 = arith.constant dense<0.000000e+00> : vector<256xf32>
    %670 = vector.multi_reduction <add>, %669, %cst_202 [0] : vector<16x256xf32> to vector<256xf32>
    %671 = vector.shape_cast %670 : vector<256xf32> to vector<1x256xf32>
    %c30 = arith.constant 30 : index
    %c0_203 = arith.constant 0 : index
    %672 = vector.load %arg11[%c30, %c0_203] : memref<36x256xf32, #tpu.memory_space<vmem>>, vector<1x256xf32>
    tpu.vector_store %arg11[%c30, %c0_203], %671 {strides = array<i32>} : memref<36x256xf32, #tpu.memory_space<vmem>>, vector<1x256xf32>,
    %673 = vector.extract_strided_slice %657 {offsets = [48, 0], sizes = [16, 256], strides = [1, 1]} : vector<64x256xf32> to vector<16x256xf32>
    %674 = arith.mulf %673, %656 : vector<16x256xf32>
    %cst_204 = arith.constant dense<0.000000e+00> : vector<256xf32>
    %675 = vector.multi_reduction <add>, %674, %cst_204 [0] : vector<16x256xf32> to vector<256xf32>
    %676 = vector.shape_cast %675 : vector<256xf32> to vector<1x256xf32>
    %c31 = arith.constant 31 : index
    %c0_205 = arith.constant 0 : index
    %677 = vector.load %arg11[%c31, %c0_205] : memref<36x256xf32, #tpu.memory_space<vmem>>, vector<1x256xf32>
    tpu.vector_store %arg11[%c31, %c0_205], %676 {strides = array<i32>} : memref<36x256xf32, #tpu.memory_space<vmem>>, vector<1x256xf32>,
    %678 = vector.extract_strided_slice %51 {offsets = [8, 0], sizes = [1, 256], strides = [1, 1]} : vector<27x256xf32> to vector<1x256xf32>
    %679 = vector.extract_strided_slice %51 {offsets = [17, 0], sizes = [1, 256], strides = [1, 1]} : vector<27x256xf32> to vector<1x256xf32>
    %680 = vector.extract_strided_slice %51 {offsets = [26, 0], sizes = [1, 256], strides = [1, 1]} : vector<27x256xf32> to vector<1x256xf32>
    %cst_206 = arith.constant 0.000000e+00 : f32
    %681 = vector.broadcast %cst_206 : f32 to vector<1x256xf32>
    %682 = arith.subf %681, %680 : vector<1x256xf32>
    %683 = math.exp %682 : vector<1x256xf32>
    %cst_207 = arith.constant 1.000000e+00 : f32
    %684 = vector.broadcast %cst_207 : f32 to vector<1x256xf32>
    %685 = arith.addf %684, %683 : vector<1x256xf32>
    %686 = tpu.reciprocal %685 : vector<1x256xf32> -> vector<1x256xf32>
    %cst_208 = arith.constant 1.000000e+00 : f32
    %687 = vector.broadcast %cst_208 : f32 to vector<1x256xf32>
    %688 = arith.addf %4, %687 : vector<1x256xf32>
    %689 = arith.addf %688, %678 : vector<1x256xf32>
    %cst_209 = arith.constant 1.000000e+00 : f32
    %690 = vector.broadcast %cst_209 : f32 to vector<1x256xf32>
    %691 = arith.addf %5, %690 : vector<1x256xf32>
    %692 = arith.addf %691, %679 : vector<1x256xf32>
    %693 = math.floor %689 : vector<1x256xf32>
    %694 = math.floor %692 : vector<1x256xf32>
    %695 = arith.subf %689, %693 : vector<1x256xf32>
    %696 = arith.subf %692, %694 : vector<1x256xf32>
    %697 = arith.fptosi %693 : vector<1x256xf32> to vector<1x256xi32>
    %698 = arith.fptosi %694 : vector<1x256xf32> to vector<1x256xi32>
    %699 = vector.broadcast %698 : vector<1x256xi32> to vector<16x256xi32>
    %700 = arith.cmpi eq, %52, %699 : vector<16x256xi32>
    %cst_210 = arith.constant 1.000000e+00 : f32
    %701 = vector.broadcast %cst_210 : f32 to vector<1x256xf32>
    %702 = arith.subf %701, %696 : vector<1x256xf32>
    %cst_211 = arith.constant 0.000000e+00 : f32
    %703 = vector.shape_cast %702 : vector<1x256xf32> to vector<1x256xf32>
    %704 = vector.broadcast %703 : vector<1x256xf32> to vector<16x256xf32>
    %705 = vector.broadcast %cst_211 : f32 to vector<16x256xf32>
    %706 = arith.select %700, %704, %705 : vector<16x256xi1>, vector<16x256xf32>
    %c1_i32_212 = arith.constant 1 : i32
    %707 = vector.broadcast %c1_i32_212 : i32 to vector<1x256xi32>
    %708 = arith.addi %698, %707 : vector<1x256xi32>
    %709 = vector.broadcast %708 : vector<1x256xi32> to vector<16x256xi32>
    %710 = arith.cmpi eq, %52, %709 : vector<16x256xi32>
    %cst_213 = arith.constant 0.000000e+00 : f32
    %711 = vector.shape_cast %696 : vector<1x256xf32> to vector<1x256xf32>
    %712 = vector.broadcast %711 : vector<1x256xf32> to vector<16x256xf32>
    %713 = vector.broadcast %cst_213 : f32 to vector<16x256xf32>
    %714 = arith.select %710, %712, %713 : vector<16x256xi1>, vector<16x256xf32>
    %715 = arith.addf %706, %714 : vector<16x256xf32>
    %716 = vector.broadcast %697 : vector<1x256xi32> to vector<16x256xi32>
    %717 = arith.cmpi eq, %53, %716 : vector<16x256xi32>
    %cst_214 = arith.constant 1.000000e+00 : f32
    %718 = vector.broadcast %cst_214 : f32 to vector<1x256xf32>
    %719 = arith.subf %718, %695 : vector<1x256xf32>
    %cst_215 = arith.constant 0.000000e+00 : f32
    %720 = vector.shape_cast %719 : vector<1x256xf32> to vector<1x256xf32>
    %721 = vector.broadcast %720 : vector<1x256xf32> to vector<16x256xf32>
    %722 = vector.broadcast %cst_215 : f32 to vector<16x256xf32>
    %723 = arith.select %717, %721, %722 : vector<16x256xi1>, vector<16x256xf32>
    %c1_i32_216 = arith.constant 1 : i32
    %724 = vector.broadcast %c1_i32_216 : i32 to vector<1x256xi32>
    %725 = arith.addi %697, %724 : vector<1x256xi32>
    %726 = vector.broadcast %725 : vector<1x256xi32> to vector<16x256xi32>
    %727 = arith.cmpi eq, %53, %726 : vector<16x256xi32>
    %cst_217 = arith.constant 0.000000e+00 : f32
    %728 = vector.shape_cast %695 : vector<1x256xf32> to vector<1x256xf32>
    %729 = vector.broadcast %728 : vector<1x256xf32> to vector<16x256xf32>
    %730 = vector.broadcast %cst_217 : f32 to vector<16x256xf32>
    %731 = arith.select %727, %729, %730 : vector<16x256xi1>, vector<16x256xf32>
    %732 = arith.addf %723, %731 : vector<16x256xf32>
    %733 = vector.broadcast %686 : vector<1x256xf32> to vector<16x256xf32>
    %734 = arith.mulf %732, %733 : vector<16x256xf32>
    %cst_218 = arith.constant dense<0.000000e+00> : vector<64x256xf32>
    %735 = tpu.matmul %3, %715, %cst_218 {dimension_numbers = #tpu.dot_dimension_numbers<[1], [0], [0], [1], [0, 0, 1, 1], [], []>} : vector<64x16xf32>, vector<16x256xf32>, vector<64x256xf32> -> vector<64x256xf32>
    %736 = vector.extract_strided_slice %735 {offsets = [0, 0], sizes = [16, 256], strides = [1, 1]} : vector<64x256xf32> to vector<16x256xf32>
    %737 = arith.mulf %736, %734 : vector<16x256xf32>
    %cst_219 = arith.constant dense<0.000000e+00> : vector<256xf32>
    %738 = vector.multi_reduction <add>, %737, %cst_219 [0] : vector<16x256xf32> to vector<256xf32>
    %739 = vector.shape_cast %738 : vector<256xf32> to vector<1x256xf32>
    %c32_220 = arith.constant 32 : index
    %c0_221 = arith.constant 0 : index
    %740 = vector.load %arg11[%c32_220, %c0_221] : memref<36x256xf32, #tpu.memory_space<vmem>>, vector<1x256xf32>
    tpu.vector_store %arg11[%c32_220, %c0_221], %739 {strides = array<i32>} : memref<36x256xf32, #tpu.memory_space<vmem>>, vector<1x256xf32>,
    %741 = vector.extract_strided_slice %735 {offsets = [16, 0], sizes = [16, 256], strides = [1, 1]} : vector<64x256xf32> to vector<16x256xf32>
    %742 = arith.mulf %741, %734 : vector<16x256xf32>
    %cst_222 = arith.constant dense<0.000000e+00> : vector<256xf32>
    %743 = vector.multi_reduction <add>, %742, %cst_222 [0] : vector<16x256xf32> to vector<256xf32>
    %744 = vector.shape_cast %743 : vector<256xf32> to vector<1x256xf32>
    %c33 = arith.constant 33 : index
    %c0_223 = arith.constant 0 : index
    %745 = vector.load %arg11[%c33, %c0_223] : memref<36x256xf32, #tpu.memory_space<vmem>>, vector<1x256xf32>
    tpu.vector_store %arg11[%c33, %c0_223], %744 {strides = array<i32>} : memref<36x256xf32, #tpu.memory_space<vmem>>, vector<1x256xf32>,
    %746 = vector.extract_strided_slice %735 {offsets = [32, 0], sizes = [16, 256], strides = [1, 1]} : vector<64x256xf32> to vector<16x256xf32>
    %747 = arith.mulf %746, %734 : vector<16x256xf32>
    %cst_224 = arith.constant dense<0.000000e+00> : vector<256xf32>
    %748 = vector.multi_reduction <add>, %747, %cst_224 [0] : vector<16x256xf32> to vector<256xf32>
    %749 = vector.shape_cast %748 : vector<256xf32> to vector<1x256xf32>
    %c34 = arith.constant 34 : index
    %c0_225 = arith.constant 0 : index
    %750 = vector.load %arg11[%c34, %c0_225] : memref<36x256xf32, #tpu.memory_space<vmem>>, vector<1x256xf32>
    tpu.vector_store %arg11[%c34, %c0_225], %749 {strides = array<i32>} : memref<36x256xf32, #tpu.memory_space<vmem>>, vector<1x256xf32>,
    %751 = vector.extract_strided_slice %735 {offsets = [48, 0], sizes = [16, 256], strides = [1, 1]} : vector<64x256xf32> to vector<16x256xf32>
    %752 = arith.mulf %751, %734 : vector<16x256xf32>
    %cst_226 = arith.constant dense<0.000000e+00> : vector<256xf32>
    %753 = vector.multi_reduction <add>, %752, %cst_226 [0] : vector<16x256xf32> to vector<256xf32>
    %754 = vector.shape_cast %753 : vector<256xf32> to vector<1x256xf32>
    %c35 = arith.constant 35 : index
    %c0_227 = arith.constant 0 : index
    %755 = vector.load %arg11[%c35, %c0_227] : memref<36x256xf32, #tpu.memory_space<vmem>>, vector<1x256xf32>
    tpu.vector_store %arg11[%c35, %c0_227], %754 {strides = array<i32>} : memref<36x256xf32, #tpu.memory_space<vmem>>, vector<1x256xf32>,
    %c0_228 = arith.constant 0 : index
    %c0_229 = arith.constant 0 : index
    %756 = vector.load %arg6[%c0_228, %c0_229] : memref<8x36xf32, #tpu.memory_space<vmem>>, vector<8x36xf32>
    %c0_230 = arith.constant 0 : index
    %c0_231 = arith.constant 0 : index
    %757 = vector.load %arg11[%c0_230, %c0_231] : memref<36x256xf32, #tpu.memory_space<vmem>>, vector<36x256xf32>
    %cst_232 = arith.constant dense<0.000000e+00> : vector<8x256xf32>
    %758 = tpu.matmul %756, %757, %cst_232 {dimension_numbers = #tpu.dot_dimension_numbers<[1], [0], [0], [1], [0, 0, 1, 1], [], []>} : vector<8x36xf32>, vector<36x256xf32>, vector<8x256xf32> -> vector<8x256xf32>
    %c0_233 = arith.constant 0 : index
    %c0_234 = arith.constant 0 : index
    %759 = vector.load %arg7[%c0_233, %c0_234] : memref<8x1xf32, #tpu.memory_space<vmem>>, vector<8x1xf32>
    %760 = vector.broadcast %759 : vector<8x1xf32> to vector<8x256xf32>
    %761 = arith.mulf %758, %760 : vector<8x256xf32>
    %c0_235 = arith.constant 0 : index
    %c0_236 = arith.constant 0 : index
    %762 = vector.load %arg8[%c0_235, %c0_236] : memref<8x1xf32, #tpu.memory_space<vmem>>, vector<8x1xf32>
    %763 = vector.broadcast %762 : vector<8x1xf32> to vector<8x256xf32>
    %764 = arith.addf %761, %763 : vector<8x256xf32>
    %cst_237 = arith.constant 0.000000e+00 : f32
    %765 = vector.broadcast %cst_237 : f32 to vector<8x256xf32>
    %766 = arith.maximumf %764, %765 : vector<8x256xf32>
    %c0_238 = arith.constant 0 : index
    %c0_239 = arith.constant 0 : index
    %c0_240 = arith.constant 0 : index
    %767 = vector.load %arg9[%c0_238, %c0_239, %c0_240] : memref<1x8x256xf32, #tpu.memory_space<vmem>>, vector<1x8x256xf32>
    %768 = vector.shape_cast %767 : vector<1x8x256xf32> to vector<8x256xf32>
    %769 = vector.shape_cast %766 : vector<8x256xf32> to vector<1x8x256xf32>
    tpu.vector_store %arg9[%c0_238, %c0_239, %c0_240], %769 {strides = array<i32>} : memref<1x8x256xf32, #tpu.memory_space<vmem>>, vector<1x8x256xf32>,
    return
  }
  func.func @transform_0(%arg0: i32) -> (i32, i32, i32) {
    %c0_i32 = arith.constant 0 : i32
    %c0_i32_0 = arith.constant 0 : i32
    %c0_i32_1 = arith.constant 0 : i32
    return %arg0, %c0_i32, %c0_i32_0 : i32, i32, i32
  }
  func.func @transform_1(%arg0: i32) -> (i32, i32, i32) {
    %c0_i32 = arith.constant 0 : i32
    %c0_i32_0 = arith.constant 0 : i32
    %c0_i32_1 = arith.constant 0 : i32
    return %arg0, %c0_i32, %c0_i32_0 : i32, i32, i32
  }
  func.func @transform_2(%arg0: i32) -> (i32, i32) {
    %c0_i32 = arith.constant 0 : i32
    %c0_i32_0 = arith.constant 0 : i32
    %c0_i32_1 = arith.constant 0 : i32
    return %c0_i32, %c0_i32_0 : i32, i32
  }
  func.func @transform_3(%arg0: i32) -> (i32, i32) {
    %c0_i32 = arith.constant 0 : i32
    %c0_i32_0 = arith.constant 0 : i32
    %c0_i32_1 = arith.constant 0 : i32
    return %c0_i32, %c0_i32_0 : i32, i32
  }
  func.func @transform_4(%arg0: i32) -> (i32, i32) {
    %c0_i32 = arith.constant 0 : i32
    %c0_i32_0 = arith.constant 0 : i32
    %c0_i32_1 = arith.constant 0 : i32
    return %c0_i32, %c0_i32_0 : i32, i32
  }
  func.func @transform_5(%arg0: i32) -> (i32, i32) {
    %c0_i32 = arith.constant 0 : i32
    %c0_i32_0 = arith.constant 0 : i32
    %c0_i32_1 = arith.constant 0 : i32
    return %c0_i32, %c0_i32_0 : i32, i32
  }
  func.func @transform_6(%arg0: i32) -> (i32, i32) {
    %c0_i32 = arith.constant 0 : i32
    %c0_i32_0 = arith.constant 0 : i32
    %c0_i32_1 = arith.constant 0 : i32
    return %c0_i32, %c0_i32_0 : i32, i32
  }
  func.func @transform_7(%arg0: i32) -> (i32, i32) {
    %c0_i32 = arith.constant 0 : i32
    %c0_i32_0 = arith.constant 0 : i32
    %c0_i32_1 = arith.constant 0 : i32
    return %c0_i32, %c0_i32_0 : i32, i32
  }
  func.func @transform_8(%arg0: i32) -> (i32, i32, i32) {
    %c0_i32 = arith.constant 0 : i32
    %c0_i32_0 = arith.constant 0 : i32
    %c0_i32_1 = arith.constant 0 : i32
    return %arg0, %c0_i32, %c0_i32_0 : i32, i32, i32
  }
}

</mosaic_0001>

<bundles_post_ra>
// kernel: tpu_custom_call.1
= control target key start
LH: loop header
LB: loop body
LE: loop exit
PB: predicated region body
PF: predicated region fallthrough
CT: control target
= control target key end

     0   :  { %13 = vsyncpa [#allocation5], 0  ;;  %s6052_s0 = inlined_call_operand.vmem [shape: f32[2,4,290], index: 0, kind: input, shape index: {}]   ;;  %s6053_s1 = inlined_call_operand.vmem [shape: f32[2,64,16], index: 1, kind: input, shape index: {}]   ;;  %s6054_s2 = inlined_call_operand.vmem [shape: f32[2,256], index: 2, kind: input, shape index: {}]   ;;  %s6055_s3 = inlined_call_operand.vmem [shape: f32[27,36], index: 3, kind: input, shape index: {}]   ;;  %s6056_s4 = inlined_call_operand.vmem [shape: f32[27,1], index: 4, kind: input, shape index: {}]   ;;  %s6057_s5 = inlined_call_operand.vmem [shape: f32[8,36], index: 5, kind: input, shape index: {}]   ;;  %s6058_s6 = inlined_call_operand.vmem [shape: f32[8,1], index: 6, kind: input, shape index: {}]   ;;  %s6059_s7 = inlined_call_operand.vmem [shape: f32[8,1], index: 7, kind: input, shape index: {}]   ;;  %s6060_s8 = inlined_call_operand.hbm [shape: f32[2,8,256], index: 8, kind: output, shape index: {}]  }
   0x1   :  { %15 = vsyncpa [#allocation5 + $0x1], 0  ;;  %s3935_s27 = smov 0   ;;  %s3937_s28 = smov 0  }
   0x2   :  { %s3939_s29 = smov 0   ;;  %s3941_s30 = smov 0  }
   0x3 LB: > { %s3956_s9 = sadd.s32 4294967295, %s3873_s30   ;;  %s3505_s10 = sadd.s32 4294967294, %s3873_s30   ;;  %s3873_s30 = sphi %s3941_s30, %s6315_s30   ;;  %s3869_s29 = sphi %s3939_s29, %s6314_s29   ;;  %s3865_s28 = sphi %s3937_s28, %s6313_s28   ;;  %s3861_s27 = sphi %s3935_s27, %s6312_s27  }
   0x4   : > { %s3960_s11 = sadd.s32 1, %s3873_s30   ;;  %s206_s12 = sadd.s32 1, %s3869_s29 }
   0x5   : > { %s203_s13 = ssub.s32 %s3873_s30, %s3960_s11  ;;  %p216_p0 = scmp.ne.s32.totalorder %s3869_s29, %s3865_s28 }
   0x6   : > { %p204_p1 = scmp.eq.s32.totalorder %s203_s13, 0  ;;  %p217_p2 = scmp.eq.s32.totalorder %s3956_s9, 1 }
   0x7   : > { %p222_p3 = scmp.ne.s32.totalorder %s3865_s28, %s3861_s27  ;;  %p223_p4 = scmp.eq.s32.totalorder %s3505_s10, 1 }
   0x8   : > { %s3971_s14 = scalar_select %p204_p1, %s3869_s29, %s206_s12  }
   0x9   : > { %p3973_p5 = por %p217_p2, %p216_p0  ;;  %p3977_p6 = por %p223_p4, %p222_p3 }
   0xa   : > { %p3508_p7 = scmp.ge.s32.totalorder %s3873_s30, 1  ;;  %p275_p8 = scmp.lt.s32.totalorder %s3873_s30, 3 }
   0xc   : > { %p276_p9 = pnand %p3508_p7, %p275_p8 }
   0xe   : > { %279 = sbr.rel (%p276_p9) target bundleno = 1117 (0x45d), region = 52 }
  0x13   : > { %v3986_v0 = vld [vmem:[%s6054_s2 + $0x1] ss:$2 sm:$0x3]  ;;  %p314_p10 = scmp.lt.s32.totalorder %s3956_s9, 1  ;;  %v3875_v1 = vmov 0.0   ;;  %vm6063_vm2 = vcmask 1043456  }
  0x14   : > { %vm339_vm0 = vcmp.le.f32.partialorder %v3986_v0, 14.0  ;;  %vm337_vm1 = vcmp.ge.f32.partialorder %v3986_v0, 1.0  ;;  %s3876_s24 = smov 2   ;;  %s3877_s25 = smov 18   ;;  %vm387_vm3 = vcmask 15360   ;;  %vm417_vm4 = vcmask 130048  }
  0x15   : > { %v340_v2 = vsel %vm339_vm0, 1.0, %v3875_v1  ;;  %v338_v3 = vsel %vm337_vm1, 1.0, %v3875_v1  ;;  %s3992_s19 = scalar_select %p314_p10, %s3956_s9, 1  ;;  %vm467_vm5 = vcmask 146432   ;;  %vm498_vm6 = vcmask 261120  }
  0x16   : > { %v380_v4 = vperm.slane %v340_v2, 0  ;;  %v381_v5 = vperm.slane %v340_v2, 1  ;;  %v343_v6 = vperm.slane %v338_v3, 1  ;;  %v342_v7 = vperm.slane %v338_v3, 0  ;;  %s3878_s26 = smov 34   ;;  %s3879_s10 = smov 16  }
  0x17   : > { %s3683_s20 = smul.u32 12, %s3992_s19  ;;  %s3880_s12 = smov 32   ;;  %vm548_vm7 = vcmask 277504   ;;  %vm407_vm8 = vcmask 1031168   ;;  %vm438_vm9 = vcmask 916480   ;;  %vm457_vm10 = vcmask 908288  }
  0x18   : > { %v382_v8 = vrot.slane %v381_v5, 4  ;;  %v344_v9 = vrot.slane %v343_v6, 4  ;;  %s3881_s13 = smov 126   ;;  %s3882_s17 = smov 112   ;;  %vm488_vm11 = vcmask 900096   ;;  %vm518_vm12 = vcmask 785408  }
  0x19   : > { %s318_s23 = scalar_lea.vmem %s6052_s0, %s3683_s20  ;;  %s3883_s18 = smov 111   ;;  %vm538_vm13 = vcmask 777216   ;;  %vm568_vm14 = vcmask 769024   ;;  %vm372_vm15 = vcmask 1039360   ;;  %vm6062_vm0 = vcmask 293888  }
  0x1a   : > { %v383_v10 = vsel %vm6063_vm2, %v380_v4, %v382_v8  ;;  %v346_v11 = vsel %vm6063_vm2, %v342_v7, %v344_v9  ;;  %v4000_v12 = vld [vmem:[%s318_s23] sm:$0xff]  ;;  %v4004_v16 = vld [vmem:[%s318_s23 + $0x8] sm:$0xf]  ;;  %s3884_s20 = smov 110   ;;  %s3885_s21 = smov 96  }
  0x1b   : > { %384 = vrot.lane.b32.xlu0 %v383_v10, %s3876_s24  ;;  %v348_v13 = vmul.f32 %v346_v11, %v4000_v12  ;;  %464 = vrot.lane.b32.xlu1 %v383_v10, %s3877_s25  ;;  %362 = vst [vmem:[#allocation1 + $0x11] ss:$2 sm:$0xff] %v4004_v16  ;;  %s3886_s22 = smov 95   ;;  %s3887_s23 = smov 94  }
  0x1c   : > { %545 = vrot.lane.b32.xlu2 %v383_v10, %s3878_s26  ;;  %s3888_s24 = smov 127  }
  0x1d   : > { %350 = vst [vmem:[#allocation1] ss:$2 sm:$0xff] %v348_v13 }
  0x22   : > { %v4007_v19 = vld.sshfl [vmem:[#allocation1 + $0x10] sm:$0xff pattern:$0x75316420] }
  0x23   : > { %414 = vrot.lane.b32.xlu0 %v346_v11, %s3879_s10  ;;  %495 = vrot.lane.b32.xlu1 %v346_v11, %s3880_s12 }
  0x24   : > { %v351_v14 = vld.sshfl [vmem:[#allocation1] sm:$0xff pattern:$0x75316420]  ;;  %v352_v15 = vld.sshfl [vmem:[#allocation1 + $0x8] sm:$0xff pattern:$0x75316420] }
  0x25   : > { %360 = vst [vmem:[#allocation1 + $0x1] ss:$2 sm:$0xff] %v4000_v12 }
  0x26   : > { %355 = vst [vmem:[#allocation2 + $0x30] sm:$0xf] %v351_v14 }
  0x27   : > { %356 = vst [vmem:[#allocation2] sm:$0xf] %v352_v15 }
  0x2c   : > { %v4009_v20 = vld.sshfl [vmem:[#allocation1] sm:$0xff pattern:$0x75316420]  ;;  %v4011_v21 = vld.sshfl [vmem:[#allocation1 + $0x8] sm:$0xff pattern:$0x75316420] }
  0x76   : > { %v546_v52 = vpop.permute.xlu2 %545 }
  0x77   : > { %v547_v54 = vrot.slane %v546_v52, 4 }
  0x79   : > { %v553_v57 = vmul.f32 %v547_v54, %v4004_v16  ;;  %v549_v58 = vsel %vm548_vm7, %v547_v54, %v546_v52 }
  0x7a   : > { %v552_v60 = vmul.f32 %v549_v58, %v4000_v12  ;;  %v592_v58 = vld [vmem:[%s6056_s4 + $0x18] sm:$0x7] }
  0x8d   : > { %v385_v17 = vpop.permute.xlu0 %384  ;;  %v465_v33 = vpop.permute.xlu1 %464 }
  0x8e   : > { %v386_v18 = vrot.slane %v385_v17, 4  ;;  %v466_v35 = vrot.slane %v465_v33, 4 }
  0x90   : > { %v388_v22 = vsel %vm387_vm3, %v386_v18, %v385_v17  ;;  %v392_v23 = vmul.f32 %v386_v18, %v4004_v16  ;;  %v472_v38 = vmul.f32 %v466_v35, %v4004_v16  ;;  %v468_v39 = vsel %vm467_vm5, %v466_v35, %v465_v33  ;;  %v589_v33 = vld [vmem:[%s6056_s4] sm:$0xff] }
  0x91   : > { %v391_v24 = vmul.f32 %v388_v22, %v4000_v12  ;;  %v471_v42 = vmul.f32 %v468_v39, %v4000_v12 }
  0x92   : > { %397 = vst [vmem:[#allocation1 + $0x10] ss:$2 sm:$0xff] %v392_v23 }
  0x93   : > { %395 = vst [vmem:[#allocation1] ss:$2 sm:$0xff] %v391_v24 }
  0x95   : > { %v415_v25 = vpop.permute.xlu0 %414  ;;  %v496_v40 = vpop.permute.xlu1 %495 }
  0x96   : > { %v416_v26 = vrot.slane %v415_v25, 4  ;;  %v497_v43 = vrot.slane %v496_v40, 4 }
  0x98   : > { %v418_v27 = vsel %vm417_vm4, %v416_v26, %v415_v25  ;;  %v422_v28 = vmul.f32 %v416_v26, %v4004_v16  ;;  %v503_v46 = vmul.f32 %v497_v43, %v4004_v16  ;;  %v499_v47 = vsel %vm498_vm6, %v497_v43, %v496_v40 }
  0x99   : > { %v400_v29 = vld.sshfl [vmem:[#allocation1 + $0x10] sm:$0xff pattern:$0x75316420]  ;;  %v421_v30 = vmul.f32 %v418_v27, %v4000_v12  ;;  %v502_v49 = vmul.f32 %v499_v47, %v4000_v12 }
  0x9a   : > { %v399_v31 = vld.sshfl [vmem:[#allocation1 + $0x8] sm:$0xff pattern:$0x75316420]  ;;  %428 = vst [vmem:[#allocation1 + $0x11] ss:$2 sm:$0xff] %v422_v28  ;;  %405 = vrot.lane.b32.xlu1 %v400_v29, %s3881_s13 }
  0x9b   : > { %403 = vrot.lane.b32.xlu0 %v399_v31, %s3881_s13  ;;  %v398_v32 = vld.sshfl [vmem:[#allocation1] sm:$0xff pattern:$0x75316420] }
  0x9c   : > { %401 = vrot.lane.b32.xlu2 %v398_v32, %s3881_s13  ;;  %426 = vst [vmem:[#allocation1 + $0x1] ss:$2 sm:$0xff] %v421_v30 }
  0xa1   : > { %v431_v34 = vld.sshfl [vmem:[#allocation1 + $0x10] sm:$0xff pattern:$0x75316420] }
  0xa2   : > { %447 = vst [vmem:[#allocation1 + $0x10] ss:$2 sm:$0xff] %v4004_v16  ;;  %436 = vrot.lane.b32.xlu1 %v431_v34, %s3882_s17  ;;  %v3889_v34 = vmov 0  }
  0xa3   : > { %v430_v36 = vld.sshfl [vmem:[#allocation1 + $0x8] sm:$0xff pattern:$0x75316420]  ;;  %v429_v37 = vld.sshfl [vmem:[#allocation1] sm:$0xff pattern:$0x75316420]  ;;  %3775 = vset.pattern.permute.xlu0 %v3889_v34  ;;  %3776 = vset.pattern.permute.xlu1 %v3889_v34 }
  0xa4   : > { %434 = vrot.lane.b32.xlu0 %v430_v36, %s3882_s17  ;;  %432 = vrot.lane.b32.xlu2 %v429_v37, %s3882_s17  ;;  %445 = vst [vmem:[#allocation1] ss:$2 sm:$0xff] %v4000_v12 }
  0xa5   : > { %3774 = vset.pattern.permute.xlu2 %v3889_v34 }
  0xa9   : > { %v450_v41 = vld.sshfl [vmem:[#allocation1 + $0x10] sm:$0xff pattern:$0x75316420] }
  0xaa   : > { %478 = vst [vmem:[#allocation1 + $0x11] ss:$2 sm:$0xff] %v472_v38  ;;  %455 = vrot.lane.b32.xlu1 %v450_v41, %s3883_s18 }
  0xab   : > { %v449_v44 = vld.sshfl [vmem:[#allocation1 + $0x8] sm:$0xff pattern:$0x75316420]  ;;  %v448_v45 = vld.sshfl [vmem:[#allocation1] sm:$0xff pattern:$0x75316420] }
  0xac   : > { %453 = vrot.lane.b32.xlu0 %v449_v44, %s3883_s18  ;;  %451 = vrot.lane.b32.xlu2 %v448_v45, %s3883_s18  ;;  %476 = vst [vmem:[#allocation1 + $0x1] ss:$2 sm:$0xff] %v471_v42  ;;  %s3677_s18 = sshll.u32 %s3992_s19, 6 }
  0xb1   : > { %v481_v48 = vld.sshfl [vmem:[#allocation1 + $0x10] sm:$0xff pattern:$0x75316420] }
  0xb2   : > { %508 = vst [vmem:[#allocation1 + $0x10] ss:$2 sm:$0xff] %v503_v46  ;;  %486 = vrot.lane.b32.xlu1 %v481_v48, %s3884_s20 }
  0xb3   : > { %v480_v50 = vld.sshfl [vmem:[#allocation1 + $0x8] sm:$0xff pattern:$0x75316420]  ;;  %v479_v51 = vld.sshfl [vmem:[#allocation1] sm:$0xff pattern:$0x75316420] }
  0xb4   : > { %484 = vrot.lane.b32.xlu0 %v480_v50, %s3884_s20  ;;  %482 = vrot.lane.b32.xlu2 %v479_v51, %s3884_s20  ;;  %506 = vst [vmem:[#allocation1] ss:$2 sm:$0xff] %v502_v49  ;;  %v591_v49 = vld [vmem:[%s6056_s4 + $0x10] sm:$0xff]  ;;  %v590_v50 = vld [vmem:[%s6056_s4 + $0x8] sm:$0xff]  ;;  %s311_s20 = sand.u32 1, %s3865_s28  }
  0xb9   : > { %v511_v53 = vld.sshfl [vmem:[#allocation1 + $0x10] sm:$0xff pattern:$0x75316420] }
  0xba   : > { %528 = vst [vmem:[#allocation1 + $0x11] ss:$2 sm:$0xff] %v4004_v16  ;;  %516 = vrot.lane.b32.xlu1 %v511_v53, %s3885_s21 }
  0xbb   : > { %v510_v55 = vld.sshfl [vmem:[#allocation1 + $0x8] sm:$0xff pattern:$0x75316420]  ;;  %v509_v56 = vld.sshfl [vmem:[#allocation1] sm:$0xff pattern:$0x75316420] }
  0xbc   : > { %514 = vrot.lane.b32.xlu0 %v510_v55, %s3885_s21  ;;  %512 = vrot.lane.b32.xlu2 %v509_v56, %s3885_s21  ;;  %526 = vst [vmem:[#allocation1 + $0x1] ss:$2 sm:$0xff] %v4000_v12  ;;  %v575_v56 = vld [vmem:[%s6055_s3] sm:$0xff]  ;;  %s3509_s21 = sshll.u32 %s311_s20, 4 }
  0xbd   : > { %s313_s25 = scalar_lea.vmem [#allocation4], %s3509_s21  ;;  %s3831_s21 = scalar_lea.hbm %s6060_s8, 32 }
  0xbe   : > { %s3431_s26 = sshll.u32 %s313_s25, 4  ;;  %s3432_s26 = int_to_ptr.vmem [resolvable:$true] %s3431_s26 }
  0xc1   : > { %v531_v59 = vld.sshfl [vmem:[#allocation1 + $0x10] sm:$0xff pattern:$0x75316420] }
  0xc2   : > { %558 = vst [vmem:[#allocation1 + $0x10] ss:$2 sm:$0xff] %v553_v57  ;;  %536 = vrot.lane.b32.xlu1 %v531_v59, %s3886_s22  ;;  %v576_v59 = vld [vmem:[%s6055_s3 + $0x8] sm:$0xff] }
  0xc3   : > { %v530_v61 = vld.sshfl [vmem:[#allocation1 + $0x8] sm:$0xff pattern:$0x75316420]  ;;  %v529_v62 = vld.sshfl [vmem:[#allocation1] sm:$0xff pattern:$0x75316420] }
  0xc4   : > { %534 = vrot.lane.b32.xlu0 %v530_v61, %s3886_s22  ;;  %532 = vrot.lane.b32.xlu2 %v529_v62, %s3886_s22  ;;  %556 = vst [vmem:[#allocation1] ss:$2 sm:$0xff] %v552_v60  ;;  %v3405_v60 = vld [vmem:[%s6059_s7] sm:$0xff]  ;;  %v577_v61 = vld [vmem:[%s6055_s3 + $0x10] sm:$0xff]  ;;  %s4108_s22 = scalar_lea.vmem %s6053_s1, %s3677_s18 }
  0xc5   : > { %v578_v62 = vld [vmem:[%s6055_s3 + $0x18] sm:$0x7] }
  0xc9   : > { %v561_v63 = vld.sshfl [vmem:[#allocation1 + $0x10] sm:$0xff pattern:$0x75316420] }
  0xca   : > { %566 = vrot.lane.b32.xlu1 %v561_v63, %s3887_s23 }
  0xcb   : > { %v560_v1 = vld.sshfl [vmem:[#allocation1 + $0x8] sm:$0xff pattern:$0x75316420]  ;;  %v559_v2 = vld.sshfl [vmem:[#allocation1] sm:$0xff pattern:$0x75316420] }
  0xcc   : > { %564 = vrot.lane.b32.xlu0 %v560_v1, %s3887_s23  ;;  %562 = vrot.lane.b32.xlu2 %v559_v2, %s3887_s23 }
  0xd2   : > { %370 = vrot.lane.b32.xlu1 %v4007_v19, %s3888_s24 }
  0xd4   : > { %368 = vrot.lane.b32.xlu0 %v4011_v21, %s3888_s24  ;;  %366 = vrot.lane.b32.xlu2 %v4009_v20, %s3888_s24 }
  0xda   : > { %605 = vperm.xlu1 %3776, %v591_v49  }
  0xdc   : > { %595 = vperm.xlu0 %3775, %v589_v33   ;;  %600 = vperm.xlu2 %3774, %v590_v50   ;;  %v4132_v50 = vld [vmem:[%s4108_s22 + $0x10] sm:$0xff] }
  0xe4   : > { %610 = vperm.xlu2 %3774, %v592_v58  }
  0xec   : > { %3408 = vperm.xlu2 %3774, %v3405_v60  }
  0xf6   : > { %v402_v3 = vpop.permute.xlu2 %401 }
  0xfe   : > { %v433_v4 = vpop.permute.xlu2 %432 }
 0x106   : > { %v452_v9 = vpop.permute.xlu2 %451 }
 0x10c   : > { %v406_v5 = vpop.permute.xlu1 %405 }
 0x10d   : > { %v404_v6 = vpop.permute.xlu0 %403 }
 0x10e   : > { %v408_v7 = vsel %vm407_vm8, %v402_v3, %v404_v6  ;;  %v409_v8 = vsel %vm407_vm8, %v404_v6, %v406_v5  ;;  %v483_v15 = vpop.permute.xlu2 %482 }
 0x10f   : > { %412 = vst [vmem:[#allocation2 + $0x18] sm:$0xf] %v408_v7 }
 0x110   : > { %413 = vst [vmem:[#allocation2 + $0x10] sm:$0xf] %v409_v8  ;;  %v4075_v8 = vadd.f32 -1.0, %v3986_v0 }
 0x114   : > { %v437_v10 = vpop.permute.xlu1 %436 }
 0x116   : > { %v435_v11 = vpop.permute.xlu0 %434  ;;  %v513_v23 = vpop.permute.xlu2 %512 }
 0x117   : > { %v439_v12 = vsel %vm438_vm9, %v433_v4, %v435_v11  ;;  %v440_v13 = vsel %vm438_vm9, %v435_v11, %v437_v10  ;;  %v6061_v10 = vlaneseq }
 0x118   : > { %443 = vst [vmem:[#allocation2 + $0x18] sm:$0xf0] %v439_v12 }
 0x119   : > { %444 = vst [vmem:[#allocation2 + $0x10] sm:$0xf0] %v440_v13 }
 0x11c   : > { %v456_v14 = vpop.permute.xlu1 %455 }
 0x11e   : > { %v454_v16 = vpop.permute.xlu0 %453  ;;  %v533_v28 = vpop.permute.xlu2 %532 }
 0x11f   : > { %v458_v17 = vsel %vm457_vm10, %v452_v9, %v454_v16  ;;  %v459_v18 = vsel %vm457_vm10, %v454_v16, %v456_v14  ;;  %v581_v53 = vld [vmem:[#allocation2 + $0x18] sm:$0xff]  ;;  %v4085_v14 = vshrl.u32 %v6061_v10, 7 }
 0x120   : > { %462 = vst [vmem:[#allocation2 + $0x48] sm:$0xf] %v458_v17  ;;  %v582_v54 = vld [vmem:[#allocation2 + $0x10] sm:$0xff] }
 0x121   : > { %463 = vst [vmem:[#allocation2 + $0x28] sm:$0xf] %v459_v18  ;;  %v4088_v18 = vadd.s32 8, %v4085_v14 }
 0x124   : > { %v487_v19 = vpop.permute.xlu1 %486 }
 0x126   : > { %v485_v20 = vpop.permute.xlu0 %484  ;;  %v563_v35 = vpop.permute.xlu2 %562 }
 0x127   : > { %v489_v21 = vsel %vm488_vm11, %v483_v15, %v485_v20  ;;  %v490_v22 = vsel %vm488_vm11, %v485_v20, %v487_v19 }
 0x128   : > { %493 = vst [vmem:[#allocation2 + $0x48] sm:$0xf0] %v489_v21 }
 0x129   : > { %494 = vst [vmem:[#allocation2 + $0x28] sm:$0xf0] %v490_v22 }
 0x12c   : > { %v517_v24 = vpop.permute.xlu1 %516 }
 0x12e   : > { %v515_v25 = vpop.permute.xlu0 %514  ;;  %v367_v41 = vpop.permute.xlu2 %366 }
 0x12f   : > { %v519_v26 = vsel %vm518_vm12, %v513_v23, %v515_v25  ;;  %v520_v27 = vsel %vm518_vm12, %v515_v25, %v517_v24  ;;  %v583_v51 = vld [vmem:[#allocation2 + $0x48] sm:$0xff] }
 0x130   : > { %523 = vst [vmem:[#allocation2 + $0x8] sm:$0xf] %v519_v26  ;;  %v584_v52 = vld [vmem:[#allocation2 + $0x28] sm:$0xff] }
 0x131   : > { %524 = vst [vmem:[#allocation2 + $0x20] sm:$0xf] %v520_v27 }
 0x134   : > { %v537_v29 = vpop.permute.xlu1 %536 }
 0x136   : > { %v535_v30 = vpop.permute.xlu0 %534  ;;  %v601_v2 = vpop.permute.xlu2 %600 }
 0x137   : > { %v539_v31 = vsel %vm538_vm13, %v533_v28, %v535_v30  ;;  %v540_v32 = vsel %vm538_vm13, %v535_v30, %v537_v29 }
 0x138   : > { %543 = vst [vmem:[#allocation2 + $0x8] sm:$0xf0] %v539_v31 }
 0x139   : > { %544 = vst [vmem:[#allocation2 + $0x20] sm:$0xf0] %v540_v32 }
 0x13c   : > { %v567_v36 = vpop.permute.xlu1 %566 }
 0x13e   : > { %v565_v37 = vpop.permute.xlu0 %564 }
 0x13f   : > { %v569_v38 = vsel %vm568_vm14, %v563_v35, %v565_v37  ;;  %v570_v39 = vsel %vm568_vm14, %v565_v37, %v567_v36  ;;  %v585_v47 = vld [vmem:[#allocation2 + $0x8] sm:$0xff] }
 0x140   : > { %573 = vst [vmem:[#allocation2 + $0x40] sm:$0xf] %v569_v38  ;;  %v586_v48 = vld [vmem:[#allocation2 + $0x20] sm:$0xff] }
 0x141   : > { %574 = vst [vmem:[#allocation2 + $0x38] sm:$0xf] %v570_v39 }
 0x144   : > { %v371_v40 = vpop.permute.xlu1 %370 }
 0x146   : > { %v369_v42 = vpop.permute.xlu0 %368 }
 0x147   : > { %v374_v43 = vsel %vm372_vm15, %v369_v42, %v371_v40  ;;  %v373_v44 = vsel %vm372_vm15, %v367_v41, %v369_v42  ;;  %v587_v45 = vld [vmem:[#allocation2 + $0x40] sm:$0xf] }
 0x148   : > { %378 = vst [vmem:[#allocation2] sm:$0xf0] %v374_v43  ;;  %3514 = vmatpush.msk.msra.mxu0 %vm6063_vm2, %v587_v45  ;;  %v588_v46 = vld [vmem:[#allocation2 + $0x38] sm:$0xf] }
 0x149   : > { %377 = vst [vmem:[#allocation2 + $0x30] sm:$0xf0] %v373_v44  ;;  %3519 = vmatpush.msk.msra.mxu1 %vm6063_vm2, %v588_v46  ;;  %v4115_v43 = vld [vmem:[%s4108_s22] sm:$0xff]  ;;  %v4118_v44 = vld [vmem:[%s4108_s22 + $0x8] sm:$0xff] }
 0x14a   : > { %644 = vmatpush.msra.mxu0 %v585_v47 }
 0x14b   : > { %673 = vmatpush.msra.mxu1 %v586_v48 }
 0x14c   : > { %645 = vmatpush.msra.mxu0 %v583_v51 }
 0x14d   : > { %674 = vmatpush.msra.mxu1 %v584_v52 }
 0x14e   : > { %646 = vmatpush.msra.mxu0 %v581_v53  ;;  %v596_v7 = vpop.permute.xlu0 %595 }
 0x14f   : > { %675 = vmatpush.msra.mxu1 %v582_v54  ;;  %v580_v55 = vld [vmem:[#allocation2] sm:$0xff] }
 0x150   : > { %v579_v57 = vld [vmem:[#allocation2 + $0x30] sm:$0xff] }
 0x151   : > { %647 = vmatpush.msra.mxu0 %v579_v57  ;;  %676 = vmatpush.msra.mxu1 %v580_v55 }
 0x152   : > { %3515 = vmatmul.msk.f32.vlgmr.msra.gmra.mxu0 %vm6062_vm0, %v575_v56  ;;  %3520 = vmatmul.msk.f32.vlgmr.msra.gmra.mxu1 %vm6062_vm0, %v575_v56 }
 0x15a   : > { %3516 = vmatmul.msk.f32.gmra.mxu0 %vm6062_vm0, %v576_v59  ;;  %3521 = vmatmul.msk.f32.gmra.mxu1 %vm6062_vm0, %v576_v59 }
 0x162   : > { %3517 = vmatmul.msk.f32.gmra.mxu0 %vm6062_vm0, %v577_v61  ;;  %3522 = vmatmul.msk.f32.gmra.mxu1 %vm6062_vm0, %v577_v61 }
 0x16a   : > { %3518 = vmatmul.msk.f32.gmra.mxu0 %vm6062_vm0, %v578_v62  ;;  %3523 = vmatmul.msk.f32.gmra.mxu1 %vm6062_vm0, %v578_v62 }
 0x1cf   : > { %v678_v63 = vpop.f32.mrf.mxu1  ;;  %v649_v1 = vpop.f32.mrf.mxu0 }
 0x1d0   : > { %v4077_v9 = vadd.f32 %v649_v1, %v596_v7  ;;  %v4079_v11 = vadd.f32 %v678_v63, %v596_v7 }
 0x1d7   : > { %v681_v3 = vpop.f32.mrf.mxu1  ;;  %v652_v4 = vpop.f32.mrf.mxu0 }
 0x1d8   : > { %v4068_v5 = vadd.f32 %v681_v3, %v601_v2  ;;  %v4070_v6 = vadd.f32 %v652_v4, %v601_v2 }
 0x1da   : > { %741 = vst [vmem:[#allocation1 + $0x9] sm:$0xff] %v4068_v5 }
 0x1db   : > { %740 = vst [vmem:[#allocation1] sm:$0xff] %v4070_v6 }
 0x1e2   : > { %v743_v12 = vld [vmem:[#allocation1 + $0x1] ss:$9 sm:$0xff] }
 0x1e3   : > { %1043 = vst [vmem:[#allocation1] sm:$0xff] %v4077_v9  ;;  %v745_v13 = vadd.f32 %v743_v12, %v4075_v8 }
 0x1e4   : > { %1044 = vst [vmem:[#allocation1 + $0x9] sm:$0xff] %v4079_v11 }
 0x1e5   : > { %v747_v15 = vfloor.f32 %v745_v13 }
 0x1e7   : > { %v749_v16 = vsub.f32 %v745_v13, %v747_v15  ;;  %v3687_v17 = vcvt.f32.s32 %v747_v15  ;;  %v4160_v13 = vadd.f32 1.0, %v3986_v0 }
 0x1e9   : > { %v752_v19 = vperm.slane %v3687_v17, 0  ;;  %v758_v20 = vsub.f32 1.0, %v749_v16  ;;  %v768_v21 = vadd.s32 1, %v3687_v17  ;;  %v753_v22 = vperm.slane %v3687_v17, 1 }
 0x1ea   : > { %v776_v28 = vperm.slane %v749_v16, 0  ;;  %v777_v33 = vperm.slane %v749_v16, 1  ;;  %v4166_v16 = vld [vmem:[%s4108_s22 + $0x18] sm:$0xff] }
 0x1eb   : > { %v4090_v23 = vld [vmem:[#allocation1 + $0x1] ss:$9 sm:$0xff]  ;;  %vm4093_vm1 = vcmp.eq.s32.totalorder %v4088_v18, %v752_v19  ;;  %v760_v25 = vperm.slane %v758_v20, 0  ;;  %v769_v26 = vperm.slane %v768_v21, 0  ;;  %v761_v27 = vperm.slane %v758_v20, 1 }
 0x1ec   : > { %1050 = vst [vmem:[#allocation1] sm:$0xff] %v4070_v6  ;;  %vm757_vm3 = vcmp.eq.s32.totalorder %v4088_v18, %v753_v22  ;;  %v770_v29 = vperm.slane %v768_v21, 1  ;;  %vm754_vm7 = vcmp.eq.s32.totalorder %v4085_v14, %v752_v19  ;;  %vm755_vm9 = vcmp.eq.s32.totalorder %v4085_v14, %v753_v22 }
 0x1ed   : > { %1051 = vst [vmem:[#allocation1 + $0x9] sm:$0xff] %v4068_v5  ;;  %vm773_vm5 = vcmp.eq.s32.totalorder %v4088_v18, %v769_v26  ;;  %v766_v30 = vsel %vm4093_vm1, %v760_v25, 0.0  ;;  %v767_v32 = vsel %vm757_vm3, %v761_v27, 0.0  ;;  %vm771_vm8 = vcmp.eq.s32.totalorder %v4085_v14, %v769_v26 }
 0x1ee   : > { %v782_v31 = vsel %vm773_vm5, %v776_v28, 0.0  ;;  %vm774_vm6 = vcmp.eq.s32.totalorder %v4088_v18, %v770_v29  ;;  %v764_v37 = vsel %vm754_vm7, %v760_v25, 0.0  ;;  %v780_v38 = vsel %vm771_vm8, %v776_v28, 0.0 }
 0x1ef   : > { %v786_v34 = vadd.f32 %v782_v31, %v766_v30  ;;  %v783_v35 = vsel %vm774_vm6, %v777_v33, 0.0  ;;  %vm772_vm10 = vcmp.eq.s32.totalorder %v4085_v14, %v770_v29  ;;  %v784_v40 = vadd.f32 %v780_v38, %v764_v37  ;;  %v4180_v29 = vld [vmem:[%s4108_s22 + $0x20] sm:$0xff] }
 0x1f0   : > { %v787_v36 = vadd.f32 %v783_v35, %v767_v32  ;;  %v765_v41 = vsel %vm755_vm9, %v761_v27, 0.0  ;;  %v781_v42 = vsel %vm772_vm10, %v777_v33, 0.0 }
 0x1f1   : > { %868 = vmatpush.msrb.mxu0 %v786_v34  ;;  %3679 = vmatpush.msra.mxu2 %v786_v34  ;;  %v785_v45 = vadd.f32 %v781_v42, %v765_v41 }
 0x1f2   : > { %909 = vmatpush.msrb.mxu1 %v787_v36  ;;  %3681 = vmatpush.msra.mxu3 %v787_v36 }
 0x1f3   : > { %869 = vmatpush.msrb.mxu0 %v784_v40  ;;  %3680 = vmatpush.msra.mxu2 %v784_v40 }
 0x1f4   : > { %v1053_v39 = vld [vmem:[#allocation1 + $0x2] ss:$9 sm:$0xff]  ;;  %910 = vmatpush.msrb.mxu1 %v785_v45  ;;  %3682 = vmatpush.msra.mxu3 %v785_v45 }
 0x1f5   : > { %1326 = vst [vmem:[#allocation1] sm:$0xff] %v4077_v9  ;;  %v1055_v46 = vadd.f32 %v3986_v0, %v1053_v39  ;;  %3524 = vmatmul.msk.f32.vlgmr.msrb.gmra.mxu0 %vm417_vm4, %v4115_v43  ;;  %3525 = vmatmul.msk.f32.vlgmr.msra.gmra.mxu2 %vm417_vm4, %v4118_v44  ;;  %v4284_v45 = vld [vmem:[%s4108_s22 + $0x38] sm:$0xff] }
 0x1f6   : > { %1327 = vst [vmem:[#allocation1 + $0x9] sm:$0xff] %v4079_v11  ;;  %3532 = vmatmul.msk.f32.vlgmr.msrb.gmra.mxu1 %vm417_vm4, %v4115_v43  ;;  %3533 = vmatmul.msk.f32.vlgmr.msra.gmra.mxu3 %vm417_vm4, %v4118_v44 }
 0x1f7   : > { %v1057_v47 = vfloor.f32 %v1055_v46 }
 0x1f9   : > { %v1059_v48 = vsub.f32 %v1055_v46, %v1057_v47  ;;  %v3691_v49 = vcvt.f32.s32 %v1057_v47 }
 0x1fb   : > { %v1062_v52 = vperm.slane %v3691_v49, 0  ;;  %v1068_v53 = vsub.f32 1.0, %v1059_v48  ;;  %v1078_v54 = vadd.s32 1, %v3691_v49  ;;  %v1063_v55 = vperm.slane %v3691_v49, 1 }
 0x1fc   : > { %v1086_v60 = vperm.slane %v1059_v48, 0  ;;  %v1087_v2 = vperm.slane %v1059_v48, 1 }
 0x1fd   : > { %v4134_v51 = vld [vmem:[#allocation1 + $0x2] ss:$9 sm:$0xff]  ;;  %vm4139_vm11 = vcmp.eq.s32.totalorder %v4088_v18, %v1062_v52  ;;  %v1070_v57 = vperm.slane %v1068_v53, 0  ;;  %v1079_v58 = vperm.slane %v1078_v54, 0  ;;  %v1071_v59 = vperm.slane %v1068_v53, 1  ;;  %3526 = vmatmul.msk.f32.gmra.mxu2 %vm417_vm4, %v4132_v50 }
 0x1fe   : > { %1333 = vst [vmem:[#allocation1] sm:$0xff] %v4070_v6  ;;  %vm1067_vm12 = vcmp.eq.s32.totalorder %v4088_v18, %v1063_v55  ;;  %v1080_v61 = vperm.slane %v1078_v54, 1  ;;  %vm4147_vm13 = vcmp.eq.s32.totalorder %v4085_v14, %v1062_v52  ;;  %3534 = vmatmul.msk.f32.gmra.mxu3 %vm417_vm4, %v4132_v50  ;;  %vm1065_vm3 = vcmp.eq.s32.totalorder %v4085_v14, %v1063_v55 }
 0x1ff   : > { %1334 = vst [vmem:[#allocation1 + $0x9] sm:$0xff] %v4068_v5  ;;  %v1076_v63 = vsel %vm4139_vm11, %v1070_v57, 0.0  ;;  %vm1083_vm14 = vcmp.eq.s32.totalorder %v4088_v18, %v1079_v58  ;;  %v1077_v1 = vsel %vm1067_vm12, %v1071_v59, 0.0  ;;  %v1074_v12 = vsel %vm4147_vm13, %v1070_v57, 0.0 }
 0x200   : > { %v1092_v3 = vsel %vm1083_vm14, %v1086_v60, 0.0  ;;  %vm1084_vm15 = vcmp.eq.s32.totalorder %v4088_v18, %v1080_v61  ;;  %vm1081_vm1 = vcmp.eq.s32.totalorder %v4085_v14, %v1079_v58  ;;  %vm1082_vm5 = vcmp.eq.s32.totalorder %v4085_v14, %v1080_v61  ;;  %v655_v61 = vpop.f32.mrf.mxu0 }
 0x201   : > { %v1096_v4 = vadd.f32 %v1092_v3, %v1076_v63  ;;  %v1093_v7 = vsel %vm1084_vm15, %v1087_v2, 0.0  ;;  %v1090_v17 = vsel %vm1081_vm1, %v1086_v60, 0.0  ;;  %v1075_v19 = vsel %vm1065_vm3, %v1071_v59, 0.0  ;;  %v4227_v59 = vld [vmem:[%s4108_s22 + $0x28] sm:$0xff]  ;;  %v606_v60 = vpop.permute.xlu1 %605 }
 0x202   : > { %v1097_v15 = vadd.f32 %v1093_v7, %v1077_v1  ;;  %v1094_v21 = vadd.f32 %v1090_v17, %v1074_v12  ;;  %v1091_v22 = vsel %vm1082_vm5, %v1087_v2, 0.0  ;;  %v4229_v2 = vadd.f32 %v655_v61, %v606_v60  ;;  %v4244_v12 = vld [vmem:[%s4108_s22 + $0x30] sm:$0xff] }
 0x203   : > { %1154 = vmatpush.msra.mxu0 %v1096_v4  ;;  %v1095_v24 = vadd.f32 %v1091_v22, %v1075_v19 }
 0x204   : > { %1195 = vmatpush.msra.mxu1 %v1097_v15  ;;  %v693_v7 = vsub.f32 0.0, %v4229_v2  ;;  %v684_v15 = vpop.f32.mrf.mxu1 }
 0x205   : > { %1155 = vmatpush.msra.mxu0 %v1094_v21  ;;  %3527 = vmatmul.msk.f32.gmra.mxu2 %vm417_vm4, %v4166_v16 }
 0x206   : > { %v1336_v20 = vld [vmem:[#allocation1 + $0x3] ss:$9 sm:$0xff]  ;;  %1196 = vmatpush.msra.mxu1 %v1095_v24  ;;  %3535 = vmatmul.msk.f32.gmra.mxu3 %vm417_vm4, %v4166_v16  ;;  %v732_v24 = vrot.slane %v4079_v11, 7 }
 0x207   : > { %1610 = vst [vmem:[#allocation1] sm:$0xff] %v4077_v9  ;;  %v1338_v25 = vadd.f32 %v1336_v20, %v4160_v13  ;;  %3540 = vmatmul.msk.f32.vlgmr.msra.gmra.mxu0 %vm417_vm4, %v4115_v43  ;;  %3548 = vmatmul.msk.f32.vlgmr.msra.gmra.mxu1 %vm417_vm4, %v4115_v43 }
 0x208   : > { %1611 = vst [vmem:[#allocation1 + $0x9] sm:$0xff] %v4079_v11 }
 0x209   : > { %v1340_v26 = vfloor.f32 %v1338_v25 }
 0x20b   : > { %v1342_v27 = vsub.f32 %v1338_v25, %v1340_v26  ;;  %v3695_v28 = vcvt.f32.s32 %v1340_v26  ;;  %v695_v25 = vmul.f32 1.442695, %v693_v7  ;;  %v4247_v26 = vadd.f32 %v684_v15, %v606_v60 }
 0x20c   : > { %v687_v15 = vpop.f32.mrf.mxu1 }
 0x20d   : > { %v1345_v30 = vperm.slane %v3695_v28, 0  ;;  %v1351_v31 = vsub.f32 1.0, %v1342_v27  ;;  %v1361_v32 = vadd.s32 1, %v3695_v28  ;;  %v1369_v33 = vperm.slane %v1342_v27, 0  ;;  %3528 = vmatmul.msk.f32.gmra.mxu2 %vm417_vm4, %v4180_v29 }
 0x20e   : > { %v1346_v34 = vperm.slane %v3695_v28, 1  ;;  %v1370_v35 = vperm.slane %v1342_v27, 1  ;;  %3536 = vmatmul.msk.f32.gmra.mxu3 %vm417_vm4, %v4180_v29  ;;  %3777 = vpow2.f32 %v695_v25 }
 0x20f   : > { %v4182_v36 = vld [vmem:[#allocation1 + $0x3] ss:$9 sm:$0xff]  ;;  %vm4185_vm6 = vcmp.eq.s32.totalorder %v4088_v18, %v1345_v30  ;;  %v1353_v38 = vperm.slane %v1351_v31, 0  ;;  %v1362_v39 = vperm.slane %v1361_v32, 0  ;;  %v1354_v40 = vperm.slane %v1351_v31, 1  ;;  %3541 = vmatmul.msk.f32.gmra.mxu0 %vm417_vm4, %v4118_v44  ;;  %3549 = vmatmul.msk.f32.gmra.mxu1 %vm417_vm4, %v4118_v44 }
 0x210   : > { %1616 = vst [vmem:[#allocation1] sm:$0xff] %v4070_v6  ;;  %vm4193_vm7 = vcmp.eq.s32.totalorder %v4088_v18, %v1346_v34  ;;  %v1363_v42 = vperm.slane %v1361_v32, 1  ;;  %vm4198_vm8 = vcmp.eq.s32.totalorder %v4085_v14, %v1345_v30  ;;  %vm4203_vm9 = vcmp.eq.s32.totalorder %v4085_v14, %v1346_v34 }
 0x211   : > { %1617 = vst [vmem:[#allocation1 + $0x9] sm:$0xff] %v4068_v5  ;;  %v1359_v47 = vsel %vm4185_vm6, %v1353_v38, 0.0  ;;  %vm1366_vm10 = vcmp.eq.s32.totalorder %v4088_v18, %v1362_v39  ;;  %v1360_v48 = vsel %vm4193_vm7, %v1354_v40, 0.0  ;;  %v1357_v49 = vsel %vm4198_vm8, %v1353_v38, 0.0 }
 0x212   : > { %v1375_v52 = vsel %vm1366_vm10, %v1369_v33, 0.0  ;;  %vm1367_vm11 = vcmp.eq.s32.totalorder %v4088_v18, %v1363_v42  ;;  %vm1364_vm12 = vcmp.eq.s32.totalorder %v4085_v14, %v1362_v39  ;;  %v1358_v53 = vsel %vm4203_vm9, %v1354_v40, 0.0 }
 0x213   : > { %v1379_v54 = vadd.f32 %v1375_v52, %v1359_v47  ;;  %v1376_v55 = vsel %vm1367_vm11, %v1370_v35, 0.0  ;;  %v1373_v56 = vsel %vm1364_vm12, %v1369_v33, 0.0  ;;  %vm1365_vm13 = vcmp.eq.s32.totalorder %v4085_v14, %v1363_v42 }
 0x214   : > { %v1380_v57 = vadd.f32 %v1376_v55, %v1360_v48  ;;  %v1374_v58 = vsel %vm1365_vm13, %v1370_v35, 0.0  ;;  %v1377_v62 = vadd.f32 %v1373_v56, %v1357_v49  ;;  %vm6064_vm8 = vcmask 1040384  }
 0x215   : > { %1437 = vmatpush.msrb.mxu2 %v1379_v54  ;;  %v1378_v63 = vadd.f32 %v1374_v58, %v1358_v53  ;;  %v4292_v53 = vld [vmem:[%s6054_s2] ss:$2 sm:$0x3]  ;;  %v734_v61 = vsel %vm6064_vm8, %v4077_v9, %v732_v24 }
 0x216   : > { %1478 = vmatpush.msrb.mxu3 %v1380_v57  ;;  %3529 = vmatmul.msk.f32.gmra.mxu2 %vm417_vm4, %v4227_v59  ;;  %v694_v57 = vsub.f32 0.0, %v4247_v26  ;;  %v4299_v60 = vadd.f32 -1.0, %v4292_v53 }
 0x217   : > { %1438 = vmatpush.msrb.mxu2 %v1377_v62  ;;  %3537 = vmatmul.msk.f32.gmra.mxu3 %vm417_vm4, %v4227_v59 }
 0x218   : > { %v1619_v1 = vld [vmem:[#allocation1 + $0x4] ss:$9 sm:$0xff]  ;;  %1479 = vmatpush.msrb.mxu3 %v1378_v63  ;;  %3542 = vmatmul.msk.f32.gmra.mxu0 %vm417_vm4, %v4132_v50 }
 0x219   : > { %1892 = vst [vmem:[#allocation1] sm:$0xff] %v4077_v9  ;;  %v1621_v3 = vadd.f32 %v1619_v1, %v4075_v8  ;;  %3550 = vmatmul.msk.f32.gmra.mxu1 %vm417_vm4, %v4132_v50  ;;  %v697_v1 = vmul.f32 1.442695, %v694_v57 }
 0x21a   : > { %1893 = vst [vmem:[#allocation1 + $0x9] sm:$0xff] %v4079_v11 }
 0x21b   : > { %v1623_v4 = vfloor.f32 %v1621_v3  ;;  %3779 = vpow2.f32 %v697_v1 }
 0x21d   : > { %v1625_v17 = vsub.f32 %v1621_v3, %v1623_v4  ;;  %v3699_v19 = vcvt.f32.s32 %v1623_v4  ;;  %v4313_v3 = vadd.f32 %v734_v61, %v4299_v60  ;;  %v658_v4 = vpop.f32.mrf.mxu0 }
 0x21e   : > { %3530 = vmatmul.msk.f32.gmra.mxu2 %vm417_vm4, %v4244_v12 }
 0x21f   : > { %v1628_v20 = vperm.slane %v3699_v19, 0  ;;  %v1634_v21 = vsub.f32 1.0, %v1625_v17  ;;  %v1644_v22 = vadd.s32 1, %v3699_v19  ;;  %v1652_v27 = vperm.slane %v1625_v17, 0  ;;  %3538 = vmatmul.msk.f32.gmra.mxu3 %vm417_vm4, %v4244_v12 }
 0x220   : > { %v1629_v28 = vperm.slane %v3699_v19, 1  ;;  %3543 = vmatmul.msk.f32.gmra.mxu0 %vm417_vm4, %v4166_v16  ;;  %v1653_v38 = vperm.slane %v1625_v17, 1  ;;  %v3778_v17 = vpop.eup %3777  ;;  %v611_v19 = vpop.permute.xlu2 %610 }
 0x221   : > { %v4251_v30 = vld [vmem:[#allocation1 + $0x4] ss:$9 sm:$0xff]  ;;  %vm4256_vm14 = vcmp.eq.s32.totalorder %v4088_v18, %v1628_v20  ;;  %v1636_v32 = vperm.slane %v1634_v21, 0  ;;  %v1645_v33 = vperm.slane %v1644_v22, 0  ;;  %v1637_v34 = vperm.slane %v1634_v21, 1  ;;  %3551 = vmatmul.msk.f32.gmra.mxu1 %vm417_vm4, %v4166_v16 }
 0x222   : > { %1898 = vst [vmem:[#allocation1] sm:$0xff] %v4070_v6  ;;  %vm4266_vm15 = vcmp.eq.s32.totalorder %v4088_v18, %v1629_v28  ;;  %v1646_v37 = vperm.slane %v1644_v22, 1  ;;  %vm4271_vm1 = vcmp.eq.s32.totalorder %v4085_v14, %v1628_v20  ;;  %vm1631_vm7 = vcmp.eq.s32.totalorder %v4085_v14, %v1629_v28 }
 0x223   : > { %1899 = vst [vmem:[#allocation1 + $0x9] sm:$0xff] %v4068_v5  ;;  %v1642_v40 = vsel %vm4256_vm14, %v1636_v32, 0.0  ;;  %vm1649_vm3 = vcmp.eq.s32.totalorder %v4088_v18, %v1645_v33  ;;  %v1643_v41 = vsel %vm4266_vm15, %v1637_v34, 0.0  ;;  %v1640_v42 = vsel %vm4271_vm1, %v1636_v32, 0.0 }
 0x224   : > { %v1658_v46 = vsel %vm1649_vm3, %v1652_v27, 0.0  ;;  %vm1650_vm5 = vcmp.eq.s32.totalorder %v4088_v18, %v1646_v37  ;;  %vm1647_vm6 = vcmp.eq.s32.totalorder %v4085_v14, %v1645_v33  ;;  %v1641_v52 = vsel %vm1631_vm7, %v1637_v34, 0.0 }
 0x225   : > { %v1662_v47 = vadd.f32 %v1658_v46, %v1642_v40  ;;  %v1659_v48 = vsel %vm1650_vm5, %v1653_v38, 0.0  ;;  %v1656_v49 = vsel %vm1647_vm6, %v1652_v27, 0.0  ;;  %vm1648_vm9 = vcmp.eq.s32.totalorder %v4085_v14, %v1646_v37 }
 0x226   : > { %v1663_v54 = vadd.f32 %v1659_v48, %v1643_v41  ;;  %v1660_v55 = vadd.f32 %v1656_v49, %v1640_v42  ;;  %v1657_v56 = vsel %vm1648_vm9, %v1653_v38, 0.0  ;;  %3531 = vmatmul.msk.f32.gmra.mxu2 %vm417_vm4, %v4284_v45  ;;  %v659_v22 = vadd.f32 %v658_v4, %v611_v19 }
 0x227   : > { %1720 = vmatpush.msrb.mxu0 %v1662_v47  ;;  %v1661_v58 = vadd.f32 %v1657_v56, %v1641_v52  ;;  %3539 = vmatmul.msk.f32.gmra.mxu3 %vm417_vm4, %v4284_v45  ;;  %v688_v24 = vadd.f32 %v687_v15, %v611_v19  ;;  %v4320_v31 = vadd.f32 1.0, %v3778_v17 }
 0x228   : > { %1761 = vmatpush.msrb.mxu1 %v1663_v54  ;;  %3544 = vmatmul.msk.f32.gmra.mxu0 %vm417_vm4, %v4180_v29  ;;  %v3780_v54 = vpop.eup %3779  ;;  %v2456_v1 = vsub.f32 0.0, %v659_v22 }
 0x229   : > { %1721 = vmatpush.msrb.mxu0 %v1660_v55  ;;  %3552 = vmatmul.msk.f32.gmra.mxu1 %vm417_vm4, %v4180_v29  ;;  %3781 = vrcp.f32 %v4320_v31  ;;  %v2457_v17 = vsub.f32 0.0, %v688_v24  ;;  %v4375_v22 = vadd.f32 1.0, %v3780_v54 }
 0x22a   : > { %1762 = vmatpush.msrb.mxu1 %v1661_v58  ;;  %v1901_v62 = vld [vmem:[#allocation1 + $0x5] ss:$9 sm:$0xff] }
 0x22b   : > { %v1903_v63 = vadd.f32 %v3986_v0, %v1901_v62  ;;  %2174 = vst [vmem:[#allocation1] sm:$0xff] %v4077_v9  ;;  %v746_v0 = vfloor.f32 %v4313_v3 }
 0x22c   : > { %2175 = vst [vmem:[#allocation1 + $0x9] sm:$0xff] %v4079_v11 }
 0x22d   : > { %v1905_v7 = vfloor.f32 %v1903_v63  ;;  %v4368_v15 = vcvt.f32.s32 %v746_v0 }
 0x22e   : > { %3556 = vmatmul.msk.f32.vlgmr.msrb.gmra.mxu2 %vm417_vm4, %v4115_v43 }
 0x22f   : > { %v1907_v20 = vsub.f32 %v1903_v63, %v1905_v7  ;;  %v3703_v21 = vcvt.f32.s32 %v1905_v7  ;;  %3564 = vmatmul.msk.f32.vlgmr.msrb.gmra.mxu3 %vm417_vm4, %v4115_v43  ;;  %v4382_v24 = vadd.s32 1, %v4368_v15 }
 0x230   : > { %3545 = vmatmul.msk.f32.gmra.mxu0 %vm417_vm4, %v4227_v59 }
 0x231   : > { %v1910_v25 = vperm.slane %v3703_v21, 0  ;;  %v1916_v27 = vsub.f32 1.0, %v1907_v20  ;;  %v1926_v28 = vadd.s32 1, %v3703_v21  ;;  %v1934_v32 = vperm.slane %v1907_v20, 0  ;;  %3553 = vmatmul.msk.f32.gmra.mxu1 %vm417_vm4, %v4227_v59 }
 0x232   : > { %v1911_v33 = vperm.slane %v3703_v21, 1  ;;  %v1935_v34 = vperm.slane %v1907_v20, 1  ;;  %v2458_v20 = vmul.f32 1.442695, %v2456_v1 }
 0x233   : > { %vm4327_vm10 = vcmp.eq.s32.totalorder %v4088_v18, %v1910_v25  ;;  %v1918_v37 = vperm.slane %v1916_v27, 0  ;;  %v1927_v38 = vperm.slane %v1926_v28, 0  ;;  %v1919_v39 = vperm.slane %v1916_v27, 1  ;;  %v4331_v40 = vld [vmem:[#allocation1 + $0x5] ss:$9 sm:$0xff] }
 0x234   : > { %vm4334_vm11 = vcmp.eq.s32.totalorder %v4088_v18, %v1911_v33  ;;  %v1928_v42 = vperm.slane %v1926_v28, 1  ;;  %vm4339_vm12 = vcmp.eq.s32.totalorder %v4085_v14, %v1910_v25  ;;  %vm4344_vm13 = vcmp.eq.s32.totalorder %v4085_v14, %v1911_v33  ;;  %2180 = vst [vmem:[#allocation1] sm:$0xff] %v4070_v6  ;;  %v4389_v33 = vpop.eup %3781 }
 0x235   : > { %v1924_v48 = vsel %vm4327_vm10, %v1918_v37, 0.0  ;;  %vm1931_vm14 = vcmp.eq.s32.totalorder %v4088_v18, %v1927_v38  ;;  %v1925_v49 = vsel %vm4334_vm11, %v1919_v39, 0.0  ;;  %v1922_v52 = vsel %vm4339_vm12, %v1918_v37, 0.0  ;;  %2181 = vst [vmem:[#allocation1 + $0x9] sm:$0xff] %v4068_v5 }
 0x236   : > { %v1940_v55 = vsel %vm1931_vm14, %v1934_v32, 0.0  ;;  %vm1932_vm15 = vcmp.eq.s32.totalorder %v4088_v18, %v1928_v42  ;;  %vm1929_vm1 = vcmp.eq.s32.totalorder %v4085_v14, %v1927_v38  ;;  %v1923_v56 = vsel %vm4344_vm13, %v1919_v39, 0.0  ;;  %3557 = vmatmul.msk.f32.gmra.mxu2 %vm417_vm4, %v4118_v44 }
 0x237   : > { %v1944_v57 = vadd.f32 %v1940_v55, %v1924_v48  ;;  %v1941_v58 = vsel %vm1932_vm15, %v1935_v34, 0.0  ;;  %v1938_v61 = vsel %vm1929_vm1, %v1934_v32, 0.0  ;;  %vm1930_vm3 = vcmp.eq.s32.totalorder %v4085_v14, %v1928_v42  ;;  %3565 = vmatmul.msk.f32.gmra.mxu3 %vm417_vm4, %v4118_v44  ;;  %v3397_v32 = vld [vmem:[%s6058_s6] sm:$0xff] }
 0x238   : > { %v1945_v62 = vadd.f32 %v1941_v58, %v1925_v49  ;;  %v1939_v63 = vsel %vm1930_vm3, %v1935_v34, 0.0  ;;  %v1942_v4 = vadd.f32 %v1938_v61, %v1922_v52  ;;  %3546 = vmatmul.msk.f32.gmra.mxu0 %vm417_vm4, %v4244_v12  ;;  %v4379_v25 = vsub.f32 %v4313_v3, %v746_v0  ;;  %3400 = vperm.xlu1 %3776, %v3397_v32  }
 0x239   : > { %2002 = vmatpush.msra.mxu2 %v1944_v57  ;;  %v1943_v7 = vadd.f32 %v1939_v63, %v1923_v56  ;;  %3554 = vmatmul.msk.f32.gmra.mxu1 %vm417_vm4, %v4244_v12  ;;  %v2460_v27 = vmul.f32 1.442695, %v2457_v17  ;;  %3783 = vpow2.f32 %v2458_v20  ;;  %v788_v34 = vperm.slane %v4368_v15, 0 }
 0x23a   : > { %2043 = vmatpush.msra.mxu3 %v1945_v62  ;;  %3785 = vrcp.f32 %v4375_v22  ;;  %v794_v35 = vsub.f32 1.0, %v4379_v25  ;;  %v805_v37 = vperm.slane %v4382_v24, 0  ;;  %v789_v38 = vperm.slane %v4368_v15, 1 }
 0x23b   : > { %2003 = vmatpush.msra.mxu2 %v1942_v4  ;;  %3787 = vpow2.f32 %v2460_v27  ;;  %v4404_v46 = vmul.f32 %v4389_v33, %v4320_v31  ;;  %vm4457_vm14 = vcmp.eq.s32.totalorder %v4085_v14, %v788_v34  ;;  %vm4474_vm3 = vcmp.eq.s32.totalorder %v4088_v18, %v788_v34 }
 0x23c   : > { %2044 = vmatpush.msra.mxu3 %v1943_v7  ;;  %v2183_v19 = vld [vmem:[#allocation1 + $0x6] ss:$9 sm:$0xff]  ;;  %vm4464_vm15 = vcmp.eq.s32.totalorder %v4085_v14, %v789_v38  ;;  %vm807_vm1 = vcmp.eq.s32.totalorder %v4085_v14, %v805_v37  ;;  %v806_v34 = vperm.slane %v4382_v24, 1 }
 0x23d   : > { %v2185_v21 = vadd.f32 %v2183_v19, %v4160_v13  ;;  %2493 = vst [vmem:[#allocation1] sm:$0xff] %v4077_v9 }
 0x23e   : > { %2494 = vst [vmem:[#allocation1 + $0x9] sm:$0xff] %v4079_v11  ;;  %3558 = vmatmul.msk.f32.gmra.mxu2 %vm417_vm4, %v4132_v50 }
 0x23f   : > { %v2187_v28 = vfloor.f32 %v2185_v21  ;;  %3566 = vmatmul.msk.f32.gmra.mxu3 %vm417_vm4, %v4132_v50  ;;  %v3784_v1 = vpop.eup %3783 }
 0x240   : > { %3547 = vmatmul.msk.f32.gmra.mxu0 %vm417_vm4, %v4284_v45  ;;  %v4437_v19 = vpop.eup %3785 }
 0x241   : > { %v2189_v3 = vsub.f32 %v2185_v21, %v2187_v28  ;;  %v3707_v0 = vcvt.f32.s32 %v2187_v28  ;;  %3555 = vmatmul.msk.f32.gmra.mxu1 %vm417_vm4, %v4284_v45  ;;  %v3788_v27 = vpop.eup %3787 }
 0x243   : > { %v2192_v39 = vperm.slane %v3707_v0, 0  ;;  %v2198_v41 = vsub.f32 1.0, %v2189_v3  ;;  %v2208_v42 = vadd.s32 1, %v3707_v0  ;;  %v2216_v47 = vperm.slane %v2189_v3, 0 }
 0x244   : > { %v2193_v48 = vperm.slane %v3707_v0, 1  ;;  %v2217_v49 = vperm.slane %v2189_v3, 1 }
 0x245   : > { %vm4407_vm5 = vcmp.eq.s32.totalorder %v4088_v18, %v2192_v39  ;;  %v2200_v54 = vperm.slane %v2198_v41, 0  ;;  %v2209_v55 = vperm.slane %v2208_v42, 0  ;;  %v2201_v56 = vperm.slane %v2198_v41, 1  ;;  %v4411_v57 = vld [vmem:[#allocation1 + $0x6] ss:$9 sm:$0xff] }
 0x246   : > { %vm4414_vm6 = vcmp.eq.s32.totalorder %v4088_v18, %v2193_v48  ;;  %v2210_v61 = vperm.slane %v2208_v42, 1  ;;  %vm4419_vm7 = vcmp.eq.s32.totalorder %v4085_v14, %v2192_v39  ;;  %vm4424_vm9 = vcmp.eq.s32.totalorder %v4085_v14, %v2193_v48  ;;  %2499 = vst [vmem:[#allocation1] sm:$0xff] %v4070_v6  ;;  %3559 = vmatmul.msk.f32.gmra.mxu2 %vm417_vm4, %v4166_v16 }
 0x247   : > { %v2206_v4 = vsel %vm4407_vm5, %v2200_v54, 0.0  ;;  %vm2213_vm10 = vcmp.eq.s32.totalorder %v4088_v18, %v2209_v55  ;;  %v2207_v7 = vsel %vm4414_vm6, %v2201_v56, 0.0  ;;  %v2204_v17 = vsel %vm4419_vm7, %v2200_v54, 0.0  ;;  %2500 = vst [vmem:[#allocation1 + $0x9] sm:$0xff] %v4068_v5  ;;  %3567 = vmatmul.msk.f32.gmra.mxu3 %vm417_vm4, %v4166_v16 }
 0x248   : > { %v2222_v20 = vsel %vm2213_vm10, %v2216_v47, 0.0  ;;  %vm2214_vm11 = vcmp.eq.s32.totalorder %v4088_v18, %v2210_v61  ;;  %vm2211_vm12 = vcmp.eq.s32.totalorder %v4085_v14, %v2209_v55  ;;  %v2205_v21 = vsel %vm4424_vm9, %v2201_v56, 0.0  ;;  %3572 = vmatmul.msk.f32.vlgmr.msrb.gmra.mxu0 %vm417_vm4, %v4115_v43 }
 0x249   : > { %v2226_v28 = vadd.f32 %v2222_v20, %v2206_v4  ;;  %v2223_v32 = vsel %vm2214_vm11, %v2217_v49, 0.0  ;;  %v2220_v3 = vsel %vm2211_vm12, %v2216_v47, 0.0  ;;  %vm2212_vm13 = vcmp.eq.s32.totalorder %v4085_v14, %v2210_v61  ;;  %3580 = vmatmul.msk.f32.vlgmr.msrb.gmra.mxu1 %vm417_vm4, %v4115_v43 }
 0x24a   : > { %v2227_v0 = vadd.f32 %v2223_v32, %v2207_v7  ;;  %v2221_v39 = vsel %vm2212_vm13, %v2217_v49, 0.0  ;;  %v4450_v41 = vperm.slane %v794_v35, 0  ;;  %v4452_v42 = vperm.slane %v794_v35, 1 }
 0x24b   : > { %2284 = vmatpush.msra.mxu0 %v2226_v28  ;;  %v2224_v48 = vadd.f32 %v2220_v3, %v2204_v17  ;;  %v716_v35 = vmul.f32 %v4437_v19, %v4375_v22  ;;  %v2225_v52 = vadd.f32 %v2221_v39, %v2205_v21  ;;  %v703_v55 = vsub.f32 1.0, %v4404_v46 }
 0x24c   : > { %2325 = vmatpush.msra.mxu1 %v2227_v0  ;;  %v6065_v56 = vperm.slane %v4379_v25, 0  ;;  %v4488_v4 = vadd.f32 1.0, %v3784_v1  ;;  %vm706_vm5 = vweird.f32 %v4320_v31  ;;  %v4500_v21 = vadd.f32 1.0, %v3788_v27 }
 0x24d   : > { %2285 = vmatpush.msra.mxu0 %v2224_v48  ;;  %v717_v20 = vsub.f32 1.0, %v716_v35  ;;  %v710_v1 = vand.u32 2147483647, %v4320_v31  ;;  %v712_v28 = vand.u32 2147483648, %v4320_v31  ;;  %v2783_v3 = vrot.slane %v4247_v26, 7 }
 0x24e   : > { %2326 = vmatpush.msra.mxu1 %v2225_v52  ;;  %v2502_v58 = vld [vmem:[#allocation1 + $0x7] ss:$9 sm:$0xff]  ;;  %v4494_v7 = vsel %vm807_vm1, %v6065_v56, 0.0  ;;  %3560 = vmatmul.msk.f32.gmra.mxu2 %vm417_vm4, %v4180_v29  ;;  %vm707_vm7 = vweird.f32 %v4389_v33  ;;  %3789 = vrcp.f32 %v4488_v4  ;;  %vm4528_vm10 = vcmp.eq.s32.totalorder %v4085_v14, %v806_v34 }
 0x24f   : > { %v2504_v46 = vadd.f32 %v2502_v58, %v4075_v8  ;;  %2775 = vst [vmem:[#allocation1] sm:$0xff] %v4077_v9  ;;  %v4507_v8 = vadd.f32 %v4090_v23, %v4299_v60  ;;  %v704_v9 = vmul.f32 %v4389_v33, %v703_v55  ;;  %3568 = vmatmul.msk.f32.gmra.mxu3 %vm417_vm4, %v4180_v29  ;;  %3791 = vrcp.f32 %v4500_v21 }
 0x250   : > { %2776 = vst [vmem:[#allocation1 + $0x9] sm:$0xff] %v4079_v11  ;;  %3573 = vmatmul.msk.f32.gmra.mxu0 %vm417_vm4, %v4118_v44  ;;  %v718_v39 = vmul.f32 %v4437_v19, %v717_v20  ;;  %vm4535_vm11 = vcmp.eq.s32.totalorder %v4088_v18, %v805_v37  ;;  %v2784_v20 = vsel %vm6064_vm8, %v4229_v2, %v2783_v3  ;;  %v713_v63 = vor.u32 1.1754944e-38, %v712_v28 }
 0x251   : > { %v2506_v27 = vfloor.f32 %v2504_v46  ;;  %3581 = vmatmul.msk.f32.gmra.mxu1 %vm417_vm4, %v4118_v44  ;;  %v4541_v52 = vadd.f32 %v4389_v33, %v704_v9  ;;  %vm4548_vm12 = vcmp.eq.s32.totalorder %v4088_v18, %v789_v38  ;;  %vm4553_vm13 = vcmp.eq.s32.totalorder %v4088_v18, %v806_v34 }
 0x252   : > { %v719_v61 = vadd.f32 %v4437_v19, %v718_v39  ;;  %v6139_v31 = vsel %vm4457_vm14, %v4450_v41, 0.0  ;;  %v2475_v49 = vand.u32 2147483648, %v4488_v4 }
 0x253   : > { %v2508_v23 = vsub.f32 %v2504_v46, %v2506_v27  ;;  %v3711_v0 = vcvt.f32.s32 %v2506_v27 }
 0x255   : > { %v2511_v55 = vperm.slane %v3711_v0, 0  ;;  %v2517_v58 = vsub.f32 1.0, %v2508_v23  ;;  %v2527_v46 = vadd.s32 1, %v3711_v0  ;;  %v2535_v27 = vperm.slane %v2508_v23, 0 }
 0x256   : > { %v2512_v10 = vperm.slane %v3711_v0, 1  ;;  %v2536_v17 = vperm.slane %v2508_v23, 1  ;;  %3561 = vmatmul.msk.f32.gmra.mxu2 %vm417_vm4, %v4227_v59 }
 0x257   : > { %vm4558_vm1 = vcmp.eq.s32.totalorder %v4088_v18, %v2511_v55  ;;  %v2519_v3 = vperm.slane %v2517_v58, 0  ;;  %v2528_v0 = vperm.slane %v2527_v46, 0  ;;  %v4562_v23 = vld [vmem:[#allocation1 + $0x7] ss:$9 sm:$0xff]  ;;  %v2520_v15 = vperm.slane %v2517_v58, 1  ;;  %3569 = vmatmul.msk.f32.gmra.mxu3 %vm417_vm4, %v4227_v59 }
 0x258   : > { %3061 = vst [vmem:[#allocation1] sm:$0xff] %v4229_v2  ;;  %vm4566_vm0 = vcmp.eq.s32.totalorder %v4088_v18, %v2512_v10  ;;  %v2529_v34 = vperm.slane %v2527_v46, 1  ;;  %vm4571_vm2 = vcmp.eq.s32.totalorder %v4085_v14, %v2511_v55  ;;  %vm4576_vm8 = vcmp.eq.s32.totalorder %v4085_v14, %v2512_v10  ;;  %v4582_v2 = vpop.eup %3789  ;;  %3574 = vmatmul.msk.f32.gmra.mxu0 %vm417_vm4, %v4132_v50 }
 0x259   : > { %v2525_v58 = vsel %vm4558_vm1, %v2519_v3, 0.0  ;;  %vm2532_vm6 = vcmp.eq.s32.totalorder %v4088_v18, %v2528_v0  ;;  %3062 = vst [vmem:[#allocation1 + $0x9] sm:$0xff] %v4247_v26  ;;  %v2526_v55 = vsel %vm4566_vm0, %v2520_v15, 0.0  ;;  %v2523_v10 = vsel %vm4571_vm2, %v2519_v3, 0.0  ;;  %v4594_v46 = vpop.eup %3791  ;;  %vm4600_vm1 = vmor %vm706_vm5, %vm707_vm7  ;;  %3582 = vmatmul.msk.f32.gmra.mxu1 %vm417_vm4, %v4132_v50 }
 0x25a   : > { %v2541_v26 = vsel %vm2532_vm6, %v2535_v27, 0.0  ;;  %vm2533_vm9 = vcmp.eq.s32.totalorder %v4088_v18, %v2529_v34  ;;  %vm2530_vm0 = vcmp.eq.s32.totalorder %v4085_v14, %v2528_v0  ;;  %v2524_v62 = vsel %vm4576_vm8, %v2520_v15, 0.0 }
 0x25b   : > { %v2545_v3 = vadd.f32 %v2541_v26, %v2525_v58  ;;  %v2542_v38 = vsel %vm2533_vm9, %v2536_v17, 0.0  ;;  %v2539_v56 = vsel %vm2530_vm0, %v2535_v27, 0.0  ;;  %vm2531_vm2 = vcmp.eq.s32.totalorder %v4085_v14, %v2529_v34 }
 0x25c   : > { %v2546_v11 = vadd.f32 %v2542_v38, %v2526_v55  ;;  %v2540_v44 = vsel %vm2531_vm2, %v2536_v17, 0.0  ;;  %vm6133_vm5 = vweird.f32 %v4437_v19  ;;  %vm6134_vm8 = vweird.f32 %v4375_v22  ;;  %v3793_v17 = vld [vmem:[%s6054_s2 + $0x1] ss:$2 sm:$0x3] }
 0x25d   : > { %vm4618_vm6 = vmor %vm6134_vm8, %vm6133_vm5  ;;  %v2465_v27 = vmul.f32 %v4582_v2, %v4488_v4  ;;  %2603 = vmatpush.msrb.mxu2 %v2545_v3  ;;  %v2543_v0 = vadd.f32 %v2539_v56, %v2523_v10  ;;  %v709_v50 = vsel %vm4600_vm1, %v4389_v33, %v4541_v52  ;;  %vm711_vm7 = vcmp.eq.f32.partialorder %v710_v1, 8.507059e+37 }
 0x25e   : > { %v4633_v28 = vadd.f32 %v3793_v17, %v2784_v20  ;;  %v2479_v39 = vmul.f32 %v4594_v46, %v4500_v21  ;;  %2644 = vmatpush.msrb.mxu3 %v2546_v11  ;;  %v2544_v15 = vadd.f32 %v2540_v44, %v2524_v62  ;;  %v6137_v56 = vfloor.f32 %v4507_v8  ;;  %3562 = vmatmul.msk.f32.gmra.mxu2 %vm417_vm4, %v4244_v12 }
 0x25f   : > { %v6138_v33 = vand.u32 2147483648, %v4375_v22  ;;  %2604 = vmatpush.msrb.mxu2 %v2543_v0  ;;  %v820_v1 = vadd.f32 %v4494_v7, %v6139_v31  ;;  %v6140_v20 = vperm.slane %v4379_v25, 1  ;;  %v6141_v44 = vperm.slane %v4379_v25, 0  ;;  %3570 = vmatmul.msk.f32.gmra.mxu3 %vm417_vm4, %v4244_v12 }
 0x260   : > { %v4639_v34 = vcvt.f32.s32 %v6137_v56  ;;  %2645 = vmatpush.msrb.mxu3 %v2544_v15  ;;  %v3064_v55 = vld [vmem:[#allocation1 + $0x1] ss:$9 sm:$0xff]  ;;  %v4658_v47 = vsel %vm711_vm7, %v713_v63, %v709_v50  ;;  %v723_v7 = vsel %vm4618_vm6, %v4437_v19, %v719_v61  ;;  %v6142_v10 = vand.u32 2147483647, %v4375_v22  ;;  %3575 = vmatmul.msk.f32.gmra.mxu0 %vm417_vm4, %v4166_v16 }
 0x261   : > { %v727_v52 = vor.u32 1.1754944e-38, %v6138_v33  ;;  %v817_v11 = vsel %vm4528_vm10, %v6140_v20, 0.0  ;;  %v818_v58 = vsel %vm4535_vm11, %v6141_v44, 0.0  ;;  %v6143_v48 = vmov %v6137_v56  ;;  %3583 = vmatmul.msk.f32.gmra.mxu1 %vm417_vm4, %v4166_v16 }
 0x262   : > { %vm725_vm14 = vcmp.eq.f32.partialorder %v6142_v10, 8.507059e+37  ;;  %v4668_v9 = vsub.f32 %v4507_v8, %v6143_v48  ;;  %v2466_v35 = vsub.f32 1.0, %v2465_v27  ;;  %v3066_v26 = vadd.f32 %v3064_v55, %v4160_v13 }
 0x263   : > { %v803_v63 = vsel %vm4548_vm12, %v4452_v42, 0.0  ;;  %v6144_v19 = vmov %v6140_v20  ;;  %v2788_v61 = vfloor.f32 %v4633_v28  ;;  %v2480_v62 = vsub.f32 1.0, %v2479_v39 }
 0x264   : > { %v819_v22 = vsel %vm4553_vm13, %v6144_v19, 0.0  ;;  %v6145_v8 = vsel %vm4464_vm15, %v4452_v42, 0.0  ;;  %v4688_v3 = vadd.s32 1, %v4639_v34  ;;  %v3068_v25 = vfloor.f32 %v3066_v26 }
 0x265   : > { %v821_v13 = vadd.f32 %v817_v11, %v6145_v8  ;;  %v824_v24 = vperm.slane %v4658_v47, 2  ;;  %v4693_v37 = vsel %vm725_vm14, %v727_v52, %v723_v7  ;;  %v6146_v38 = vsel %vm4474_vm3, %v4450_v41, 0.0 }
 0x266   : > { %v822_v32 = vadd.f32 %v818_v58, %v6146_v38  ;;  %v823_v42 = vadd.f32 %v819_v22, %v803_v63  ;;  %v1098_v27 = vperm.slane %v4639_v34, 0  ;;  %v1104_v0 = vsub.f32 1.0, %v4668_v9  ;;  %3563 = vmatmul.msk.f32.gmra.mxu2 %vm417_vm4, %v4284_v45 }
 0x267   : > { %v4703_v50 = vmul.f32 %v4582_v2, %v2466_v35  ;;  %v2489_v16 = vand.u32 2147483648, %v4500_v21  ;;  %v3070_v17 = vsub.f32 %v3066_v26, %v3068_v25  ;;  %v3719_v39 = vcvt.f32.s32 %v3068_v25  ;;  %3571 = vmatmul.msk.f32.gmra.mxu3 %vm417_vm4, %v4284_v45 }
 0x268   : > { %v4709_v54 = vsub.f32 %v4633_v28, %v2788_v61  ;;  %v4712_v41 = vmul.f32 %v4594_v46, %v2480_v62  ;;  %v825_v15 = vperm.slane %v4693_v37, 2  ;;  %v1115_v56 = vperm.slane %v4688_v3, 0  ;;  %3576 = vmatmul.msk.f32.gmra.mxu0 %vm417_vm4, %v4180_v29 }
 0x269   : > { %v3073_v33 = vperm.slane %v3719_v39, 0  ;;  %v3079_v52 = vsub.f32 1.0, %v3070_v17  ;;  %v3089_v31 = vadd.s32 1, %v3719_v39  ;;  %v4716_v20 = vmul.f32 %v824_v24, %v820_v1  ;;  %3584 = vmatmul.msk.f32.gmra.mxu1 %vm417_vm4, %v4180_v29 }
 0x26a   : > { %v3074_v11 = vperm.slane %v3719_v39, 1  ;;  %vm4723_vm15 = vcmp.eq.s32.totalorder %v4085_v14, %v1098_v27  ;;  %v4729_v58 = vperm.slane %v1104_v0, 0  ;;  %v1122_v55 = vperm.slane %v4668_v9, 0 }
 0x26b   : > { %vm4735_vm3 = vcmp.eq.s32.totalorder %v4088_v18, %v3073_v33  ;;  %v3081_v7 = vperm.slane %v3079_v52, 0  ;;  %v3090_v10 = vperm.slane %v3089_v31, 0  ;;  %v3082_v48 = vperm.slane %v3079_v52, 1 }
 0x26c   : > { %v3097_v35 = vperm.slane %v3070_v17, 0  ;;  %vm4742_vm9 = vcmp.eq.s32.totalorder %v4088_v18, %v3074_v11  ;;  %v3091_v63 = vperm.slane %v3089_v31, 1  ;;  %vm4747_vm10 = vcmp.eq.s32.totalorder %v4085_v14, %v1115_v56 }
 0x26d   : > { %vm3094_vm11 = vcmp.eq.s32.totalorder %v4088_v18, %v3090_v10  ;;  %v3098_v22 = vperm.slane %v3070_v17, 1  ;;  %vm4755_vm12 = vcmp.eq.s32.totalorder %v4085_v14, %v3073_v33  ;;  %vm4760_vm13 = vcmp.eq.s32.totalorder %v4085_v14, %v3074_v11 }
 0x26e   : > { %v3087_v25 = vsel %vm4735_vm3, %v3081_v7, 0.0  ;;  %v3103_v38 = vsel %vm3094_vm11, %v3097_v35, 0.0  ;;  %vm3095_vm1 = vcmp.eq.s32.totalorder %v4088_v18, %v3091_v63  ;;  %vm3092_vm0 = vcmp.eq.s32.totalorder %v4085_v14, %v3090_v10  ;;  %3588 = vmatmul.msk.f32.vlgmr.msra.gmra.mxu2 %vm417_vm4, %v4115_v43 }
 0x26f   : > { %vm2469_vm2 = vweird.f32 %v4488_v4  ;;  %v3088_v29 = vsel %vm4742_vm9, %v3082_v48, 0.0  ;;  %v3104_v17 = vsel %vm3095_vm1, %v3098_v22, 0.0  ;;  %vm3093_vm5 = vcmp.eq.s32.totalorder %v4085_v14, %v3091_v63  ;;  %3596 = vmatmul.msk.f32.vlgmr.msra.gmra.mxu3 %vm417_vm4, %v4115_v43 }
 0x270   : > { %v1110_v39 = vsel %vm4723_vm15, %v4729_v58, 0.0  ;;  %v3085_v33 = vsel %vm4755_vm12, %v3081_v7, 0.0  ;;  %v3101_v52 = vsel %vm3092_vm0, %v3097_v35, 0.0  ;;  %v1126_v31 = vsel %vm4747_vm10, %v1122_v55, 0.0  ;;  %3577 = vmatmul.msk.f32.gmra.mxu0 %vm417_vm4, %v4227_v59 }
 0x271   : > { %v1099_v11 = vperm.slane %v4639_v34, 1  ;;  %v3107_v1 = vadd.f32 %v3103_v38, %v3087_v25  ;;  %v3086_v10 = vsel %vm4760_vm13, %v3082_v48, 0.0  ;;  %v3102_v26 = vsel %vm3093_vm5, %v3098_v22, 0.0  ;;  %3585 = vmatmul.msk.f32.gmra.mxu1 %vm417_vm4, %v4227_v59 }
 0x272   : > { %v4784_v63 = vmul.f32 %v824_v24, %v822_v32  ;;  %v3108_v44 = vadd.f32 %v3104_v17, %v3088_v29  ;;  %v4788_v7 = vmul.f32 %v825_v15, %v821_v13  ;;  %v1116_v35 = vperm.slane %v4688_v3, 1  ;;  %v4869_v17 = vld [vmem:[%s4108_s22 + $0x8] sm:$0xff] }
 0x273   : > { %v4792_v19 = vadd.f32 1.0, %v4292_v53  ;;  %vm2483_vm8 = vweird.f32 %v4500_v21  ;;  %3165 = vmatpush.msra.mxu2 %v3107_v1  ;;  %v3105_v48 = vadd.f32 %v3101_v52, %v3085_v33  ;;  %v4797_v24 = vmul.f32 %v825_v15, %v823_v42 }
 0x274   : > { %v4799_v32 = vadd.f32 %v1126_v31, %v1110_v39  ;;  %v3057_v22 = vrot.slane %v4068_v5, 7  ;;  %3206 = vmatpush.msra.mxu3 %v3108_v44  ;;  %v3106_v13 = vadd.f32 %v3102_v26, %v3086_v10  ;;  %vm4805_vm6 = vcmp.eq.s32.totalorder %v4085_v14, %v1099_v11 }
 0x275   : > { %v4811_v43 = vperm.slane %v1104_v0, 1  ;;  %vm4816_vm7 = vcmp.eq.s32.totalorder %v4088_v18, %v1098_v27  ;;  %3166 = vmatpush.msra.mxu2 %v3105_v48  ;;  %vm1119_vm14 = vcmp.eq.s32.totalorder %v4088_v18, %v1115_v56  ;;  %v2468_v5 = vadd.f32 %v4582_v2, %v4703_v50 }
 0x276   : > { %vm2470_vm15 = vweird.f32 %v4582_v2  ;;  %vm6163_vm3 = vcmask 1040384   ;;  %3207 = vmatpush.msra.mxu3 %v3106_v13  ;;  %v1134_v34 = vperm.slane %v4658_v47, 3  ;;  %vm1118_vm9 = vcmp.eq.s32.totalorder %v4085_v14, %v1116_v35  ;;  %3589 = vmatmul.msk.f32.gmra.mxu2 %vm417_vm4, %v4869_v17 }
 0x277   : > { %v3058_v0 = vsel %vm6163_vm3, %v4070_v6, %v3057_v22  ;;  %v1123_v27 = vperm.slane %v4668_v9, 1  ;;  %vm4834_vm10 = vcmp.eq.s32.totalorder %v4088_v18, %v1099_v11  ;;  %v4840_v6 = vadd.f32 %v4134_v51, %v4299_v60  ;;  %vm4855_vm11 = vmor %vm2469_vm2, %vm2470_vm15  ;;  %3597 = vmatmul.msk.f32.gmra.mxu3 %vm417_vm4, %v4869_v17 }
 0x278   : > { %v3060_v59 = vadd.f32 %v3058_v0, %v4792_v19  ;;  %v2473_v56 = vand.u32 2147483647, %v4488_v4  ;;  %v1111_v62 = vsel %vm4805_vm6, %v4811_v43, 0.0  ;;  %v1112_v8 = vsel %vm4816_vm7, %v4729_v58, 0.0  ;;  %3578 = vmatmul.msk.f32.gmra.mxu0 %vm417_vm4, %v4244_v12  ;;  %v874_v48 = vpop.f32.mrf.mxu2 }
 0x279   : > { %v4851_v25 = vsel %vm1119_vm14, %v1122_v55, 0.0  ;;  %v4861_v60 = vsel %vm1118_vm9, %v1123_v27, 0.0  ;;  %v2472_v29 = vsel %vm4855_vm11, %v4582_v2, %v2468_v5  ;;  %vm2484_vm12 = vweird.f32 %v4594_v46  ;;  %v871_v2 = vpop.f32.mrf.mxu0  ;;  %3586 = vmatmul.msk.f32.gmra.mxu1 %vm417_vm4, %v4244_v12 }
 0x27a   : > { %v3067_v51 = vfloor.f32 %v3060_v59  ;;  %v2487_v55 = vand.u32 2147483647, %v4500_v21  ;;  %v2476_v33 = vor.u32 1.1754944e-38, %v2475_v49  ;;  %vm4885_vm13 = vcmp.eq.s32.totalorder %v4088_v18, %v1116_v35  ;;  %v912_v49 = vpop.f32.mrf.mxu1  ;;  %vm4900_vm0 = vmor %vm2483_vm8, %vm2484_vm12 }
 0x27b   : > { %v1339_v1 = vfloor.f32 %v4840_v6  ;;  %vm2474_vm1 = vcmp.eq.f32.partialorder %v2473_v56, 8.507059e+37  ;;  %v2482_v4 = vadd.f32 %v4594_v46, %v4712_v41  ;;  %v2490_v13 = vor.u32 1.1754944e-38, %v2489_v16  ;;  %v915_v56 = vpop.f32.mrf.mxu3 }
 0x27c   : > { %v4878_v52 = vsub.f32 %v3060_v59, %v3067_v51  ;;  %v4880_v31 = vcvt.f32.s32 %v3067_v51  ;;  %v4894_v10 = vsel %vm2474_vm1, %v2476_v33, %v2472_v29  ;;  %vm2488_vm2 = vcmp.eq.f32.partialorder %v2487_v55, 8.507059e+37 }
 0x27d   : > { %v2486_v22 = vsel %vm4900_vm0, %v4594_v46, %v2482_v4  ;;  %v936_v0 = vmul.f32 %v871_v2, %v4716_v20  ;;  %v938_v59 = vmul.f32 %v874_v48, %v4784_v63  ;;  %v937_v46 = vmul.f32 %v912_v49, %v4788_v7 }
 0x27e   : > { %v3109_v44 = vperm.slane %v4880_v31, 0  ;;  %v3115_v35 = vsub.f32 1.0, %v4878_v52  ;;  %v3125_v41 = vadd.s32 1, %v4880_v31  ;;  %v3110_v5 = vperm.slane %v4880_v31, 1 }
 0x27f   : > { %v939_v51 = vmul.f32 %v915_v56, %v4797_v24  ;;  %v3133_v21 = vperm.slane %v4878_v52, 0  ;;  %v3134_v16 = vperm.slane %v4878_v52, 1  ;;  %v940_v29 = vadd.f32 %v938_v59, %v936_v0  ;;  %v4936_v56 = vld [vmem:[%s4108_s22 + $0x10] sm:$0xff] }
 0x280   : > { %vm4918_vm5 = vcmp.eq.s32.totalorder %v4085_v14, %v3109_v44  ;;  %v3117_v38 = vperm.slane %v3115_v35, 0  ;;  %v4926_v55 = vsel %vm2488_vm2, %v2490_v13, %v2486_v22  ;;  %v3126_v33 = vperm.slane %v3125_v41, 0  ;;  %3590 = vmatmul.msk.f32.gmra.mxu2 %vm417_vm4, %v4936_v56  ;;  %3598 = vmatmul.msk.f32.gmra.mxu3 %vm417_vm4, %v4936_v56 }
 0x281   : > { %vm4929_vm8 = vcmp.eq.s32.totalorder %v4085_v14, %v3110_v5  ;;  %v947_v2 = vadd.f32 %v939_v51, %v937_v46  ;;  %v3118_v49 = vperm.slane %v3115_v35, 1  ;;  %v3127_v26 = vperm.slane %v3125_v41, 1  ;;  %3579 = vmatmul.msk.f32.gmra.mxu0 %vm417_vm4, %v4284_v45  ;;  %3587 = vmatmul.msk.f32.gmra.mxu1 %vm417_vm4, %v4284_v45  ;;  %v877_v51 = vpop.f32.mrf.mxu2 }
 0x282   : > { %v3121_v4 = vsel %vm4918_vm5, %v3117_v38, 0.0  ;;  %v941_v48 = vrot.slane %v940_v29, 4  ;;  %vm3128_vm14 = vcmp.eq.s32.totalorder %v4085_v14, %v3126_v33  ;;  %vm4942_vm15 = vcmp.eq.s32.totalorder %v4088_v18, %v3109_v44 }
 0x283   : > { %vm4947_vm3 = vcmp.eq.s32.totalorder %v4088_v18, %v3126_v33  ;;  %v948_v35 = vrot.slane %v947_v2, 4  ;;  %v3137_v41 = vsel %vm3128_vm14, %v3133_v21, 0.0  ;;  %v3122_v13 = vsel %vm4929_vm8, %v3118_v49, 0.0 }
 0x284   : > { %vm3129_vm9 = vcmp.eq.s32.totalorder %v4085_v14, %v3127_v26  ;;  %v942_v0 = vadd.f32 %v941_v48, %v940_v29  ;;  %v3141_v44 = vadd.f32 %v3137_v41, %v3121_v4  ;;  %v3123_v12 = vsel %vm4942_vm15, %v3117_v38, 0.0  ;;  %v918_v29 = vpop.f32.mrf.mxu3  ;;  %v1157_v41 = vpop.f32.mrf.mxu0 }
 0x285   : > { %v3138_v59 = vsel %vm3129_vm9, %v3134_v16, 0.0  ;;  %v949_v46 = vadd.f32 %v948_v35, %v947_v2  ;;  %v3145_v33 = vperm.slane %v4894_v10, 2  ;;  %v3146_v15 = vperm.slane %v4926_v55, 2 }
 0x286   : > { %v3142_v31 = vadd.f32 %v3138_v59, %v3122_v13  ;;  %v943_v39 = vrot.slane %v942_v0, 2  ;;  %v1129_v4 = vsel %vm4885_vm13, %v1123_v27, 0.0  ;;  %v3139_v38 = vsel %vm4947_vm3, %v3133_v21, 0.0  ;;  %v1198_v13 = vpop.f32.mrf.mxu1 }
 0x287   : > { %vm4971_vm11 = vcmp.eq.s32.totalorder %v4088_v18, %v3110_v5  ;;  %v950_v45 = vrot.slane %v949_v46, 2  ;;  %v4977_v48 = vcvt.f32.s32 %v1339_v1  ;;  %v4979_v52 = vmul.f32 %v3145_v33, %v3141_v44 }
 0x288   : > { %v4981_v9 = vmul.f32 %v3146_v15, %v3142_v31  ;;  %v944_v11 = vadd.f32 %v943_v39, %v942_v0  ;;  %v3143_v27 = vadd.f32 %v3139_v38, %v3123_v12  ;;  %v3124_v21 = vsel %vm4971_vm11, %v3118_v49, 0.0 }
 0x289   : > { %vm3131_vm12 = vcmp.eq.s32.totalorder %v4088_v18, %v3127_v26  ;;  %v4988_v5 = vcvt.f32.s32 %v2788_v61  ;;  %v951_v22 = vadd.f32 %v950_v45, %v949_v46  ;;  %v4993_v35 = vmul.f32 %v1134_v34, %v4799_v32  ;;  %v5001_v26 = vld [vmem:[%s4108_s22 + $0x18] sm:$0xff]  ;;  %v880_v59 = vpop.f32.mrf.mxu2 }
 0x28a   : > { %6182 = vst [vmem:[#allocation7_spill] sm:$0xff] %v4981_v9  ;;  %v3140_v39 = vsel %vm3131_vm12, %v3134_v16, 0.0  ;;  %v1131_v49 = vadd.f32 %v4861_v60, %v1111_v62  ;;  %3591 = vmatmul.msk.f32.gmra.mxu2 %vm417_vm4, %v5001_v26  ;;  %v1132_v28 = vadd.f32 %v4851_v25, %v1112_v8  ;;  %v5011_v32 = vmul.f32 %v3145_v33, %v3143_v27  ;;  %v5024_v8 = vld [vmem:[%s4108_s22] sm:$0xff] }
 0x28b   : > { %v945_v3 = vrot.slane %v944_v11, 1  ;;  %v952_v16 = vrot.slane %v951_v22, 1  ;;  %3599 = vmatmul.msk.f32.gmra.mxu3 %vm417_vm4, %v5001_v26  ;;  %v6184_v62 = vsel %vm4834_vm10, %v4811_v43, 0.0  ;;  %v3144_v0 = vadd.f32 %v3140_v39, %v3124_v21  ;;  %3604 = vmatmul.msk.f32.vlgmr.msra.gmra.mxu0 %vm417_vm4, %v5024_v8 }
 0x28c   : > { %6183 = vst [vmem:[#allocation8_spill] sm:$0xff] %v5011_v32  ;;  %v1133_v60 = vadd.f32 %v1129_v4, %v6184_v62  ;;  %v6185_v42 = vperm.slane %v4693_v37, 3  ;;  %v5030_v25 = vmul.f32 %v1134_v34, %v1132_v28  ;;  %v5035_v50 = vsub.f32 %v4840_v6, %v1339_v1  ;;  %3612 = vmatmul.msk.f32.vlgmr.msra.gmra.mxu1 %vm417_vm4, %v5024_v8  ;;  %v921_v38 = vpop.f32.mrf.mxu3  ;;  %v3337_v1 = vld [vmem:[%s6057_s5] sm:$0xff] }
 0x28d   : > { %v5038_v43 = vadd.s32 1, %v4977_v48  ;;  %v953_v44 = vadd.f32 %v952_v16, %v951_v22  ;;  %v5048_v34 = vadd.f32 %v4182_v36, %v4292_v53  ;;  %v5050_v33 = vmul.f32 %v3146_v15, %v3144_v0  ;;  %v1160_v16 = vpop.f32.mrf.mxu0 }
 0x28e   : > { %v5021_v58 = vmul.f32 %v6185_v42, %v1131_v49  ;;  %v6186_v12 = vmov %v6185_v42  ;;  %v6188_v6 = vlaneseq  ;;  %v965_v31 = vmul.f32 %v877_v51, %v4716_v20 }
 0x28f   : > { %v5044_v46 = vmul.f32 %v6186_v12, %v1133_v60  ;;  %6187 = vst [vmem:[#allocation9_spill] sm:$0xff] %v5050_v33  ;;  %v967_v4 = vmul.f32 %v880_v59, %v4784_v63  ;;  %v1381_v2 = vperm.slane %v4977_v48, 0  ;;  %v946_v45 = vadd.f32 %v945_v3, %v944_v11  ;;  %v1201_v11 = vpop.f32.mrf.mxu1 }
 0x290   : > { %vm5053_vm6 = vcmp.lt.s32.totalorder %v6188_v6, 256  ;;  %v956_v27 = vrot.slane %v953_v44, 7  ;;  %v966_v21 = vmul.f32 %v918_v29, %v4788_v7  ;;  %v968_v36 = vmul.f32 %v921_v38, %v4797_v24 }
 0x291   : > { %v969_v53 = vadd.f32 %v967_v4, %v965_v31  ;;  %v1387_v15 = vsub.f32 1.0, %v5035_v50  ;;  %v1398_v22 = vperm.slane %v5038_v43, 0  ;;  %v1382_v39 = vperm.slane %v4977_v48, 1  ;;  %v5074_v48 = vld [vmem:[%s4108_s22 + $0x20] sm:$0xff]  ;;  %v883_v38 = vpop.f32.mrf.mxu2 }
 0x292   : > { %vm6191_vm7 = vcmask 1040384   ;;  %v1222_v49 = vmul.f32 %v1157_v41, %v4993_v35  ;;  %v976_v28 = vadd.f32 %v968_v36, %v966_v21  ;;  %v6066_v3 = vperm.slane %v5038_v43, 1  ;;  %3592 = vmatmul.msk.f32.gmra.mxu2 %vm417_vm4, %v5074_v48 }
 0x293   : > { %v957_v51 = vsel %vm6191_vm7, %v946_v45, %v956_v27  ;;  %v1223_v29 = vmul.f32 %v1198_v13, %v5021_v58  ;;  %v970_v62 = vrot.slane %v969_v53, 4  ;;  %v1224_v60 = vmul.f32 %v1160_v16, %v5030_v25  ;;  %3600 = vmatmul.msk.f32.gmra.mxu3 %vm417_vm4, %v5074_v48  ;;  %3605 = vmatmul.msk.f32.gmra.mxu0 %vm417_vm4, %v4869_v17  ;;  %vm6206_vm15 = vmmov %vm6191_vm7 }
 0x294   : > { %963 = vst.msk [vmem:[#allocation3] ss:$8 sm:$0x3] %vm5053_vm6, %v957_v51  ;;  %v1225_v0 = vmul.f32 %v1201_v11, %v5044_v46  ;;  %v977_v41 = vrot.slane %v976_v28, 4  ;;  %vm5081_vm10 = vcmp.eq.s32.totalorder %v4085_v14, %v1381_v2  ;;  %v1405_v13 = vperm.slane %v5035_v50, 0  ;;  %3613 = vmatmul.msk.f32.gmra.mxu1 %vm417_vm4, %v4869_v17  ;;  %vm6209_vm3 = vmmov %vm6191_vm7 }
 0x295   : > { %v6068_v44 = vperm.slane %v5035_v50, 1  ;;  %v971_v59 = vadd.f32 %v970_v62, %v969_v53  ;;  %v1226_v12 = vadd.f32 %v1224_v60, %v1222_v49  ;;  %v1389_v31 = vperm.slane %v1387_v15, 0  ;;  %v924_v49 = vpop.f32.mrf.mxu3  ;;  %vm6216_vm7 = vmmov %vm6209_vm3 }
 0x296   : > { %v1233_v6 = vadd.f32 %v1225_v0, %v1223_v29  ;;  %v978_v4 = vadd.f32 %v977_v41, %v976_v28  ;;  %vm5092_vm13 = vcmp.eq.s32.totalorder %v4085_v14, %v1398_v22  ;;  %vm5097_vm1 = vcmp.eq.s32.totalorder %v4085_v14, %v1382_v39  ;;  %v1163_v41 = vpop.f32.mrf.mxu0 }
 0x297   : > { %v5101_v21 = vperm.slane %v1387_v15, 1  ;;  %v972_v36 = vrot.slane %v971_v59, 2  ;;  %v1227_v53 = vrot.slane %v1226_v12, 4  ;;  %vm1401_vm0 = vcmp.eq.s32.totalorder %v4085_v14, %v6066_v3  ;;  %v1204_v61 = vpop.f32.mrf.mxu1 }
 0x298   : > { %v1234_v51 = vrot.slane %v1233_v6, 4  ;;  %v979_v28 = vrot.slane %v978_v4, 2  ;;  %vm5107_vm2 = vcmp.eq.s32.totalorder %v4088_v18, %v1381_v2  ;;  %vm5112_vm5 = vcmp.eq.s32.totalorder %v4088_v18, %v1398_v22 }
 0x299   : > { %vm5117_vm8 = vcmp.eq.s32.totalorder %v4088_v18, %v1382_v39  ;;  %v973_v29 = vadd.f32 %v972_v36, %v971_v59  ;;  %v1228_v62 = vadd.f32 %v1227_v53, %v1226_v12  ;;  %v1393_v0 = vsel %vm5081_vm10, %v1389_v31, 0.0  ;;  %v5131_v12 = vld [vmem:[%s4108_s22 + $0x28] sm:$0xff] }
 0x29a   : > { %v1235_v60 = vadd.f32 %v1234_v51, %v1233_v6  ;;  %v980_v2 = vadd.f32 %v979_v28, %v978_v4  ;;  %v1409_v22 = vsel %vm5092_vm13, %v1405_v13, 0.0  ;;  %v1394_v3 = vsel %vm5097_vm1, %v5101_v21, 0.0  ;;  %3593 = vmatmul.msk.f32.gmra.mxu2 %vm417_vm4, %v5131_v12  ;;  %vm6219_vm1 = vmmov %vm6209_vm3 }
 0x29b   : > { %v1410_v39 = vsel %vm1401_vm0, %v6068_v44, 0.0  ;;  %v1229_v33 = vrot.slane %v1228_v62, 2  ;;  %v1395_v42 = vsel %vm5107_vm2, %v1389_v31, 0.0  ;;  %v1411_v6 = vsel %vm5112_vm5, %v1405_v13, 0.0  ;;  %3601 = vmatmul.msk.f32.gmra.mxu3 %vm417_vm4, %v5131_v12  ;;  %3606 = vmatmul.msk.f32.gmra.mxu0 %vm417_vm4, %v4936_v56  ;;  %v886_v13 = vpop.f32.mrf.mxu2 }
 0x29c   : > { %v1236_v59 = vrot.slane %v1235_v60, 2  ;;  %v974_v4 = vrot.slane %v973_v29, 1  ;;  %v981_v45 = vrot.slane %v980_v2, 1  ;;  %v1622_v36 = vfloor.f32 %v5048_v34  ;;  %3614 = vmatmul.msk.f32.gmra.mxu1 %vm417_vm4, %v4936_v56 }
 0x29d   : > { %v1230_v53 = vadd.f32 %v1229_v33, %v1228_v62  ;;  %v1413_v28 = vadd.f32 %v1409_v22, %v1393_v0  ;;  %v1414_v16 = vadd.f32 %v1410_v39, %v1394_v3  ;;  %v1415_v11 = vadd.f32 %v1411_v6, %v1395_v42  ;;  %v927_v0 = vpop.f32.mrf.mxu3 }
 0x29e   : > { %v1237_v51 = vadd.f32 %v1236_v59, %v1235_v60  ;;  %v982_v31 = vadd.f32 %v981_v45, %v980_v2  ;;  %v1396_v44 = vsel %vm5117_vm8, %v5101_v21, 0.0  ;;  %v6204_v27 = vperm.slane %v5038_v43, 1 }
 0x29f   : > { %v1231_v33 = vrot.slane %v1230_v53, 1  ;;  %v991_v60 = vmul.f32 %v883_v38, %v4716_v20  ;;  %v993_v3 = vmul.f32 %v886_v13, %v4784_v63  ;;  %v975_v2 = vadd.f32 %v974_v4, %v973_v29  ;;  %v1166_v29 = vpop.f32.mrf.mxu0  ;;  %v1207_v4 = vpop.f32.mrf.mxu1 }
 0x2a0   : > { %vm1403_vm14 = vcmp.eq.s32.totalorder %v4088_v18, %v6204_v27  ;;  %v1238_v62 = vrot.slane %v1237_v51, 1  ;;  %v985_v22 = vrot.slane %v982_v31, 7  ;;  %v992_v39 = vmul.f32 %v924_v49, %v4788_v7 }
 0x2a1   : > { %v994_v59 = vmul.f32 %v927_v0, %v4797_v24  ;;  %v1248_v21 = vmul.f32 %v1163_v41, %v4993_v35  ;;  %v995_v43 = vadd.f32 %v993_v3, %v991_v60  ;;  %v6205_v42 = vperm.slane %v5035_v50, 1 }
 0x2a2   : > { %v1239_v15 = vadd.f32 %v1238_v62, %v1237_v51  ;;  %v986_v45 = vsel %vm6206_vm15, %v975_v2, %v985_v22  ;;  %v1232_v38 = vadd.f32 %v1231_v33, %v1230_v53  ;;  %v1249_v27 = vmul.f32 %v1204_v61, %v5021_v58  ;;  %v5167_v62 = vld [vmem:[%s4108_s22 + $0x30] sm:$0xff]  ;;  %vm6226_vm15 = vmmov %vm6219_vm1 }
 0x2a3   : > { %v1412_v6 = vsel %vm1403_vm14, %v6205_v42, 0.0  ;;  %v1002_v13 = vadd.f32 %v994_v59, %v992_v39  ;;  %989 = vst.msk [vmem:[#allocation3 + $0x1] ss:$8 sm:$0x3] %vm5053_vm6, %v986_v45  ;;  %v996_v31 = vrot.slane %v995_v43, 4  ;;  %v1250_v51 = vmul.f32 %v1166_v29, %v5030_v25  ;;  %3594 = vmatmul.msk.f32.gmra.mxu2 %vm417_vm4, %v5167_v62  ;;  %3602 = vmatmul.msk.f32.gmra.mxu3 %vm417_vm4, %v5167_v62 }
 0x2a4   : > { %v1242_v49 = vrot.slane %v1239_v15, 7  ;;  %v1251_v41 = vmul.f32 %v1207_v4, %v5044_v46  ;;  %v6207_v61 = vperm.slane %v4658_v47, 4  ;;  %v6208_v33 = vperm.slane %v4693_v37, 4  ;;  %3607 = vmatmul.msk.f32.gmra.mxu0 %vm417_vm4, %v5001_v26  ;;  %3615 = vmatmul.msk.f32.gmra.mxu1 %vm417_vm4, %v5001_v26 }
 0x2a5   : > { %v1003_v50 = vrot.slane %v1002_v13, 4  ;;  %v5182_v3 = vsub.f32 %v5048_v34, %v1622_v36  ;;  %v997_v2 = vadd.f32 %v996_v31, %v995_v43  ;;  %v1252_v22 = vadd.f32 %v1250_v51, %v1248_v21 }
 0x2a6   : > { %v5175_v53 = vmul.f32 %v6207_v61, %v1413_v28  ;;  %v5179_v60 = vmul.f32 %v6208_v33, %v1414_v16  ;;  %v1243_v0 = vsel %vm6209_vm3, %v1232_v38, %v1242_v49  ;;  %v1259_v39 = vadd.f32 %v1251_v41, %v1249_v27  ;;  %v889_v16 = vpop.f32.mrf.mxu2  ;;  %v930_v27 = vpop.f32.mrf.mxu3 }
 0x2a7   : > { %1246 = vst.msk [vmem:[#allocation3 + $0x4] ss:$8 sm:$0x3] %vm5053_vm6, %v1243_v0  ;;  %v1004_v28 = vadd.f32 %v1003_v50, %v1002_v13  ;;  %v6210_v59 = vmov %v6207_v61  ;;  %v5195_v15 = vadd.f32 %v1412_v6, %v1396_v44  ;;  %v5197_v43 = vcvt.f32.s32 %v1622_v36  ;;  %v1169_v51 = vpop.f32.mrf.mxu0 }
 0x2a8   : > { %v5193_v34 = vmul.f32 %v6210_v59, %v1415_v11  ;;  %v998_v21 = vrot.slane %v997_v2, 2  ;;  %v1253_v42 = vrot.slane %v1252_v22, 4  ;;  %v1260_v45 = vrot.slane %v1259_v39, 4 }
 0x2a9   : > { %v1017_v38 = vmul.f32 %v889_v16, %v4716_v20  ;;  %v1005_v29 = vrot.slane %v1004_v28, 2  ;;  %v1018_v13 = vmul.f32 %v930_v27, %v4788_v7  ;;  %v2793_v4 = vperm.slane %v4988_v5, 0 }
 0x2aa   : > { %v2799_v49 = vsub.f32 1.0, %v4709_v54  ;;  %v999_v11 = vadd.f32 %v998_v21, %v997_v2  ;;  %v1254_v31 = vadd.f32 %v1253_v42, %v1252_v22  ;;  %v1261_v44 = vadd.f32 %v1260_v45, %v1259_v39  ;;  %v1210_v2 = vpop.f32.mrf.mxu1  ;;  %v5216_v22 = vld [vmem:[%s4108_s22 + $0x38] sm:$0xff] }
 0x2ab   : > { %v5204_v36 = vadd.s32 1, %v4988_v5  ;;  %v1006_v6 = vadd.f32 %v1005_v29, %v1004_v28  ;;  %vm5207_vm9 = vcmp.eq.s32.totalorder %v4088_v18, %v2793_v4  ;;  %v1274_v0 = vmul.f32 %v1169_v51, %v4993_v35  ;;  %3595 = vmatmul.msk.f32.gmra.mxu2 %vm417_vm4, %v5216_v22  ;;  %3603 = vmatmul.msk.f32.gmra.mxu3 %vm417_vm4, %v5216_v22 }
 0x2ac   : > { %v5211_v41 = vperm.slane %v2799_v49, 0  ;;  %v1000_v50 = vrot.slane %v999_v11, 1  ;;  %v1255_v61 = vrot.slane %v1254_v31, 2  ;;  %v1262_v33 = vrot.slane %v1261_v44, 2  ;;  %3608 = vmatmul.msk.f32.gmra.mxu0 %vm417_vm4, %v5074_v48  ;;  %3616 = vmatmul.msk.f32.gmra.mxu1 %vm417_vm4, %v5074_v48 }
 0x2ad   : > { %v1007_v39 = vrot.slane %v1006_v6, 1  ;;  %v1275_v28 = vmul.f32 %v1210_v2, %v5021_v58  ;;  %v2810_v59 = vperm.slane %v5204_v36, 0  ;;  %v2794_v27 = vperm.slane %v4988_v5, 1 }
 0x2ae   : > { %v2807_v16 = vsel %vm5207_vm9, %v5211_v41, 0.0  ;;  %v1001_v21 = vadd.f32 %v1000_v50, %v999_v11  ;;  %v1256_v42 = vadd.f32 %v1255_v61, %v1254_v31  ;;  %v1263_v45 = vadd.f32 %v1262_v33, %v1261_v44  ;;  %v892_v51 = vpop.f32.mrf.mxu2  ;;  %v933_v44 = vpop.f32.mrf.mxu3  ;;  %vm6229_vm9 = vmmov %vm6219_vm1 }
 0x2af   : > { %v1008_v29 = vadd.f32 %v1007_v39, %v1006_v6  ;;  %vm2814_vm11 = vcmp.eq.s32.totalorder %v4088_v18, %v2810_v59  ;;  %v5233_v2 = vperm.slane %v2799_v49, 1  ;;  %v2811_v20 = vperm.slane %v5204_v36, 1 }
 0x2b0   : > { %v1257_v7 = vrot.slane %v1256_v42, 1  ;;  %v1264_v11 = vrot.slane %v1263_v45, 1  ;;  %v1019_v31 = vmul.f32 %v892_v51, %v4784_v63  ;;  %v6213_v50 = vperm.slane %v4709_v54, 0 }
 0x2b1   : > { %v1011_v5 = vrot.slane %v1008_v29, 7  ;;  %v1020_v6 = vmul.f32 %v933_v44, %v4797_v24  ;;  %vm5241_vm12 = vcmp.eq.s32.totalorder %v4088_v18, %v2794_v27  ;;  %vm2815_vm10 = vcmp.eq.s32.totalorder %v4088_v18, %v2811_v20 }
 0x2b2   : > { %v2823_v61 = vsel %vm2814_vm11, %v6213_v50, 0.0  ;;  %v1258_v49 = vadd.f32 %v1257_v7, %v1256_v42  ;;  %v1265_v32 = vadd.f32 %v1264_v11, %v1263_v45  ;;  %v1021_v36 = vadd.f32 %v1019_v31, %v1017_v38  ;;  %v1172_v50 = vpop.f32.mrf.mxu0  ;;  %v1213_v42 = vpop.f32.mrf.mxu1 }
 0x2b3   : > { %v2827_v33 = vadd.f32 %v2823_v61, %v2807_v16  ;;  %v2808_v63 = vsel %vm5241_vm12, %v5233_v2, 0.0  ;;  %v1012_v51 = vsel %vm6216_vm7, %v1001_v21, %v1011_v5  ;;  %v1028_v9 = vadd.f32 %v1020_v6, %v1018_v13  ;;  %3620 = vmatmul.msk.f32.vlgmr.msrb.gmra.mxu2 %vm417_vm4, %v5024_v8  ;;  %3628 = vmatmul.msk.f32.vlgmr.msrb.gmra.mxu3 %vm417_vm4, %v5024_v8 }
 0x2b4   : > { %v2818_v24 = vperm.slane %v4709_v54, 1  ;;  %1015 = vst.msk [vmem:[#allocation3 + $0x2] ss:$8 sm:$0x3] %vm5053_vm6, %v1012_v51  ;;  %v1268_v16 = vrot.slane %v1265_v32, 7  ;;  %v1022_v7 = vrot.slane %v1021_v36, 4  ;;  %v1276_v38 = vmul.f32 %v1172_v50, %v5030_v25  ;;  %3609 = vmatmul.msk.f32.gmra.mxu0 %vm417_vm4, %v5131_v12  ;;  %3617 = vmatmul.msk.f32.gmra.mxu1 %vm417_vm4, %v5131_v12 }
 0x2b5   : > { %2885 = vmatpush.msrb.mxu0 %v2827_v33  ;;  %vm5257_vm13 = vcmp.eq.s32.totalorder %v4085_v14, %v2793_v4  ;;  %v1029_v21 = vrot.slane %v1028_v9, 4  ;;  %v1277_v45 = vmul.f32 %v1213_v42, %v5044_v46  ;;  %vm2812_vm0 = vcmp.eq.s32.totalorder %v4085_v14, %v2810_v59 }
 0x2b6   : > { %v2824_v29 = vsel %vm2815_vm10, %v2818_v24, 0.0  ;;  %v2805_v32 = vsel %vm5257_vm13, %v5211_v41, 0.0  ;;  %v1269_v11 = vsel %vm6219_vm1, %v1258_v49, %v1268_v16  ;;  %v1023_v31 = vadd.f32 %v1022_v7, %v1021_v36  ;;  %v1440_v6 = vpop.f32.mrf.mxu2  ;;  %v1481_v39 = vpop.f32.mrf.mxu3 }
 0x2b7   : > { %v1278_v44 = vadd.f32 %v1276_v38, %v1274_v0  ;;  %v2828_v4 = vadd.f32 %v2824_v29, %v2808_v63  ;;  %1272 = vst.msk [vmem:[#allocation3 + $0x5] ss:$8 sm:$0x3] %vm5053_vm6, %v1269_v11  ;;  %v1030_v61 = vadd.f32 %v1029_v21, %v1028_v9  ;;  %v1285_v5 = vadd.f32 %v1277_v45, %v1275_v28 }
 0x2b8   : > { %v1024_v41 = vrot.slane %v1023_v31, 2  ;;  %v6220_v0 = vperm.slane %v4709_v54, 0  ;;  %v1664_v36 = vperm.slane %v5197_v43, 0  ;;  %v1670_v9 = vsub.f32 1.0, %v5182_v3 }
 0x2b9   : > { %v1279_v33 = vrot.slane %v1278_v44, 4  ;;  %2926 = vmatpush.msrb.mxu1 %v2828_v4  ;;  %v1031_v63 = vrot.slane %v1030_v61, 2  ;;  %v1286_v51 = vrot.slane %v1285_v5, 4  ;;  %vm2796_vm2 = vcmp.eq.s32.totalorder %v4085_v14, %v2794_v27 }
 0x2ba   : > { %v2821_v49 = vsel %vm2812_vm0, %v6220_v0, 0.0  ;;  %v1025_v28 = vadd.f32 %v1024_v41, %v1023_v31  ;;  %vm2813_vm5 = vcmp.eq.s32.totalorder %v4085_v14, %v2811_v20  ;;  %v1175_v38 = vpop.f32.mrf.mxu0  ;;  %v2806_v54 = vsel %vm2796_vm2, %v5233_v2, 0.0  ;;  %v1216_v45 = vpop.f32.mrf.mxu1  ;;  %vm6232_vm0 = vmmov %vm6219_vm1 }
 0x2bb   : > { %v2825_v50 = vadd.f32 %v2821_v49, %v2805_v32  ;;  %v1280_v16 = vadd.f32 %v1279_v33, %v1278_v44  ;;  %v1032_v59 = vadd.f32 %v1031_v63, %v1030_v61  ;;  %v1287_v7 = vadd.f32 %v1286_v51, %v1285_v5  ;;  %3621 = vmatmul.msk.f32.gmra.mxu2 %vm417_vm4, %v4869_v17  ;;  %vm6233_vm2 = vmmov %vm6232_vm0 }
 0x2bc   : > { %v2822_v42 = vsel %vm2813_vm5, %v2818_v24, 0.0  ;;  %v1026_v13 = vrot.slane %v1025_v28, 1  ;;  %v6221_v32 = vperm.slane %v4693_v37, 4  ;;  %3629 = vmatmul.msk.f32.gmra.mxu3 %vm417_vm4, %v4869_v17  ;;  %vm5292_vm8 = vcmp.eq.s32.totalorder %v4085_v14, %v1664_v36  ;;  %3610 = vmatmul.msk.f32.gmra.mxu0 %vm417_vm4, %v5167_v62  ;;  %vm6234_vm5 = vmmov %vm6232_vm0 }
 0x2bd   : > { %2886 = vmatpush.msrb.mxu0 %v2825_v50  ;;  %v1281_v21 = vrot.slane %v1280_v16, 2  ;;  %v2826_v29 = vadd.f32 %v2822_v42, %v2806_v54  ;;  %v1033_v20 = vrot.slane %v1032_v59, 1  ;;  %v1288_v11 = vrot.slane %v1287_v7, 2  ;;  %3618 = vmatmul.msk.f32.gmra.mxu1 %vm417_vm4, %v5167_v62 }
 0x2be   : > { %v5287_v27 = vmul.f32 %v6221_v32, %v5195_v15  ;;  %v5297_v24 = vadd.s32 1, %v5197_v43  ;;  %v5301_v15 = vperm.slane %v1670_v9, 0  ;;  %v1688_v44 = vperm.slane %v5182_v3, 0  ;;  %v1443_v41 = vpop.f32.mrf.mxu2 }
 0x2bf   : > { %v1282_v31 = vadd.f32 %v1281_v21, %v1280_v16  ;;  %2927 = vmatpush.msrb.mxu1 %v2826_v29  ;;  %v1665_v4 = vperm.slane %v5197_v43, 1  ;;  %v1034_v61 = vadd.f32 %v1033_v20, %v1032_v59  ;;  %v1289_v5 = vadd.f32 %v1288_v11, %v1287_v7  ;;  %v1484_v16 = vpop.f32.mrf.mxu3 }
 0x2c0   : > { %v5307_v33 = vperm.slane %v1670_v9, 1  ;;  %v1689_v0 = vperm.slane %v5182_v3, 1  ;;  %v1027_v49 = vadd.f32 %v1026_v13, %v1025_v28  ;;  %v1505_v63 = vmul.f32 %v1440_v6, %v5175_v53 }
 0x2c1   : > { %v1506_v51 = vmul.f32 %v1481_v39, %v5179_v60  ;;  %v1507_v50 = vmul.f32 %v1443_v41, %v5193_v34  ;;  %v1037_v54 = vrot.slane %v1034_v61, 7  ;;  %v1283_v43 = vrot.slane %v1282_v31, 1 }
 0x2c2   : > { %v1290_v59 = vrot.slane %v1289_v5, 1  ;;  %v1508_v7 = vmul.f32 %v1484_v16, %v5287_v27  ;;  %v1681_v21 = vperm.slane %v5297_v24, 0  ;;  %v1682_v9 = vperm.slane %v5297_v24, 1  ;;  %v1178_v29 = vpop.f32.mrf.mxu0  ;;  %v1219_v61 = vpop.f32.mrf.mxu1 }
 0x2c3   : > { %v1509_v42 = vadd.f32 %v1507_v50, %v1505_v63  ;;  %vm5317_vm14 = vcmp.eq.s32.totalorder %v4088_v18, %v1664_v36  ;;  %v1038_v6 = vsel %vm6226_vm15, %v1027_v49, %v1037_v54  ;;  %v1676_v32 = vsel %vm5292_vm8, %v5301_v15, 0.0  ;;  %3622 = vmatmul.msk.f32.gmra.mxu2 %vm417_vm4, %v4936_v56 }
 0x2c4   : > { %v1291_v39 = vadd.f32 %v1290_v59, %v1289_v5  ;;  %v1516_v13 = vadd.f32 %v1508_v7, %v1506_v51  ;;  %1041 = vst.msk [vmem:[#allocation3 + $0x3] ss:$8 sm:$0x3] %vm5053_vm6, %v1038_v6  ;;  %v1300_v20 = vmul.f32 %v1175_v38, %v4993_v35  ;;  %v1301_v11 = vmul.f32 %v1216_v45, %v5021_v58  ;;  %v5386_v35 = vld [vmem:[%s6054_s2] ss:$2 sm:$0x3] }
 0x2c5   : > { %v1510_v36 = vrot.slane %v1509_v42, 4  ;;  %v1302_v24 = vmul.f32 %v1178_v29, %v5030_v25  ;;  %v1284_v5 = vadd.f32 %v1283_v43, %v1282_v31  ;;  %v1303_v2 = vmul.f32 %v1219_v61, %v5044_v46  ;;  %3630 = vmatmul.msk.f32.gmra.mxu3 %vm417_vm4, %v4936_v56  ;;  %3611 = vmatmul.msk.f32.gmra.mxu0 %vm417_vm4, %v5216_v22 }
 0x2c6   : > { %v1294_v41 = vrot.slane %v1291_v39, 7  ;;  %v1517_v49 = vrot.slane %v1516_v13, 4  ;;  %vm5338_vm3 = vcmp.eq.s32.totalorder %v4085_v14, %v1665_v4  ;;  %v1678_v58 = vsel %vm5317_vm14, %v5301_v15, 0.0  ;;  %3619 = vmatmul.msk.f32.gmra.mxu1 %vm417_vm4, %v5216_v22  ;;  %v1446_v45 = vpop.f32.mrf.mxu2 }
 0x2c7   : > { %v1511_v63 = vadd.f32 %v1510_v36, %v1509_v42  ;;  %v1304_v51 = vadd.f32 %v1302_v24, %v1300_v20  ;;  %v1311_v38 = vadd.f32 %v1303_v2, %v1301_v11  ;;  %vm1683_vm11 = vcmp.eq.s32.totalorder %v4085_v14, %v1681_v21  ;;  %v1487_v16 = vpop.f32.mrf.mxu3 }
 0x2c8   : > { %v1295_v25 = vsel %vm6229_vm9, %v1284_v5, %v1294_v41  ;;  %v1518_v46 = vadd.f32 %v1517_v49, %v1516_v13  ;;  %vm1684_vm12 = vcmp.eq.s32.totalorder %v4085_v14, %v1682_v9  ;;  %vm1685_vm7 = vcmp.eq.s32.totalorder %v4088_v18, %v1681_v21 }
 0x2c9   : > { %1298 = vst.msk [vmem:[#allocation3 + $0x6] ss:$8 sm:$0x3] %vm5053_vm6, %v1295_v25  ;;  %v1512_v31 = vrot.slane %v1511_v63, 2  ;;  %v1305_v50 = vrot.slane %v1304_v51, 4  ;;  %v1312_v54 = vrot.slane %v1311_v38, 4  ;;  %vm5354_vm10 = vcmp.eq.s32.totalorder %v4088_v18, %v1665_v4 }
 0x2ca   : > { %v1519_v15 = vrot.slane %v1518_v46, 2  ;;  %vm1686_vm13 = vcmp.eq.s32.totalorder %v4088_v18, %v1682_v9  ;;  %v1692_v42 = vsel %vm1683_vm11, %v1688_v44, 0.0  ;;  %v1677_v28 = vsel %vm5338_vm3, %v5307_v33, 0.0  ;;  %v1723_v39 = vpop.f32.mrf.mxu0  ;;  %v1764_v20 = vpop.f32.mrf.mxu1 }
 0x2cb   : > { %v1513_v59 = vadd.f32 %v1512_v31, %v1511_v63  ;;  %v1306_v7 = vadd.f32 %v1305_v50, %v1304_v51  ;;  %v1313_v21 = vadd.f32 %v1312_v54, %v1311_v38  ;;  %v1693_v4 = vsel %vm1684_vm12, %v1689_v0, 0.0  ;;  %3623 = vmatmul.msk.f32.gmra.mxu2 %vm417_vm4, %v5001_v26 }
 0x2cc   : > { %v1520_v6 = vadd.f32 %v1519_v15, %v1518_v46  ;;  %v1694_v13 = vsel %vm1685_vm7, %v1688_v44, 0.0  ;;  %v1679_v11 = vsel %vm5354_vm10, %v5307_v33, 0.0  ;;  %v1695_v36 = vsel %vm1686_vm13, %v1689_v0, 0.0  ;;  %vm6245_vm10 = vmmov %vm6232_vm0 }
 0x2cd   : > { %v1514_v29 = vrot.slane %v1513_v59, 1  ;;  %v1307_v9 = vrot.slane %v1306_v7, 2  ;;  %v1314_v61 = vrot.slane %v1313_v21, 2  ;;  %v1700_v5 = vperm.slane %v4658_v47, 5  ;;  %3631 = vmatmul.msk.f32.gmra.mxu3 %vm417_vm4, %v5001_v26  ;;  %3636 = vmatmul.msk.f32.vlgmr.msrb.gmra.mxu0 %vm417_vm4, %v5024_v8  ;;  %vm6246_vm13 = vmmov %vm6232_vm0 }
 0x2ce   : > { %v1521_v24 = vrot.slane %v1520_v6, 1  ;;  %v1701_v41 = vperm.slane %v4693_v37, 5  ;;  %v1696_v49 = vadd.f32 %v1692_v42, %v1676_v32  ;;  %v1697_v2 = vadd.f32 %v1693_v4, %v1677_v28  ;;  %3644 = vmatmul.msk.f32.vlgmr.msrb.gmra.mxu1 %vm417_vm4, %v5024_v8  ;;  %v1449_v3 = vpop.f32.mrf.mxu2 }
 0x2cf   : > { %v1308_v44 = vadd.f32 %v1307_v9, %v1306_v7  ;;  %v1698_v63 = vadd.f32 %v1694_v13, %v1678_v58  ;;  %v1315_v51 = vadd.f32 %v1314_v61, %v1313_v21  ;;  %v1699_v0 = vadd.f32 %v1695_v36, %v1679_v11  ;;  %v1490_v31 = vpop.f32.mrf.mxu3 }
 0x2d0   : > { %v1522_v33 = vadd.f32 %v1521_v24, %v1520_v6  ;;  %v1897_v32 = vadd.f32 %v5386_v35, %v4251_v30  ;;  %v1515_v25 = vadd.f32 %v1514_v29, %v1513_v59  ;;  %v1531_v46 = vmul.f32 %v1446_v45, %v5175_v53 }
 0x2d1   : > { %v1532_v58 = vmul.f32 %v1487_v16, %v5179_v60  ;;  %v1533_v38 = vmul.f32 %v1449_v3, %v5193_v34  ;;  %v1309_v8 = vrot.slane %v1308_v44, 1  ;;  %v1316_v15 = vrot.slane %v1315_v51, 1 }
 0x2d2   : > { %v1525_v50 = vrot.slane %v1522_v33, 7  ;;  %v1534_v54 = vmul.f32 %v1490_v31, %v5287_v27  ;;  %v5394_v43 = vmul.f32 %v1700_v5, %v1696_v49  ;;  %v5396_v7 = vmul.f32 %v1701_v41, %v1697_v2  ;;  %v1726_v16 = vpop.f32.mrf.mxu0  ;;  %v1767_v9 = vpop.f32.mrf.mxu1 }
 0x2d3   : > { %v1535_v42 = vadd.f32 %v1533_v38, %v1531_v46  ;;  %v5398_v28 = vmul.f32 %v1700_v5, %v1698_v63  ;;  %v1317_v45 = vadd.f32 %v1316_v15, %v1315_v51  ;;  %v5401_v6 = vmul.f32 %v1701_v41, %v1699_v0  ;;  %3624 = vmatmul.msk.f32.gmra.mxu2 %vm417_vm4, %v5074_v48 }
 0x2d4   : > { %v1526_v30 = vsel %vm6219_vm1, %v1515_v25, %v1525_v50  ;;  %v1542_v59 = vadd.f32 %v1534_v54, %v1532_v58  ;;  %v1788_v21 = vmul.f32 %v1723_v39, %v5394_v43  ;;  %v1789_v4 = vmul.f32 %v1764_v20, %v5396_v7 }
 0x2d5   : > { %1529 = vst.msk [vmem:[#allocation3 + $0x10] ss:$8 sm:$0x3] %vm5053_vm6, %v1526_v30  ;;  %v1536_v13 = vrot.slane %v1535_v42, 4  ;;  %v1790_v29 = vmul.f32 %v1726_v16, %v5398_v28  ;;  %v1310_v11 = vadd.f32 %v1309_v8, %v1308_v44  ;;  %v1320_v36 = vrot.slane %v1317_v45, 7  ;;  %3632 = vmatmul.msk.f32.gmra.mxu3 %vm417_vm4, %v5074_v48  ;;  %3637 = vmatmul.msk.f32.gmra.mxu0 %vm417_vm4, %v4869_v17 }
 0x2d6   : > { %v1543_v24 = vrot.slane %v1542_v59, 4  ;;  %v1791_v61 = vmul.f32 %v1767_v9, %v5401_v6  ;;  %v1904_v39 = vfloor.f32 %v1897_v32  ;;  %3645 = vmatmul.msk.f32.gmra.mxu1 %vm417_vm4, %v4869_v17  ;;  %v1452_v44 = vpop.f32.mrf.mxu2  ;;  %v1983_v16 = vperm.slane %v4693_v37, 6 }
 0x2d7   : > { %v1537_v5 = vadd.f32 %v1536_v13, %v1535_v42  ;;  %v1792_v41 = vadd.f32 %v1790_v29, %v1788_v21  ;;  %v1321_v20 = vsel %vm6232_vm0, %v1310_v11, %v1320_v36  ;;  %v1493_v51 = vpop.f32.mrf.mxu3  ;;  %v1557_v36 = vmul.f32 %v1452_v44, %v5175_v53 }
 0x2d8   : > { %v1544_v49 = vadd.f32 %v1543_v24, %v1542_v59  ;;  %v1799_v2 = vadd.f32 %v1791_v61, %v1789_v4  ;;  %1324 = vst.msk [vmem:[#allocation3 + $0x7] ss:$8 sm:$0x3] %vm5053_vm6, %v1321_v20  ;;  %v5420_v58 = vsub.f32 %v1897_v32, %v1904_v39  ;;  %v5422_v8 = vcvt.f32.s32 %v1904_v39 }
 0x2d9   : > { %v1538_v63 = vrot.slane %v1537_v5, 2  ;;  %v1793_v33 = vrot.slane %v1792_v41, 4  ;;  %v1982_v59 = vperm.slane %v4658_v47, 6  ;;  %v1558_v24 = vmul.f32 %v1493_v51, %v5179_v60 }
 0x2da   : > { %v1545_v3 = vrot.slane %v1544_v49, 2  ;;  %v1800_v0 = vrot.slane %v1799_v2, 4  ;;  %v1729_v50 = vpop.f32.mrf.mxu0  ;;  %v1770_v54 = vpop.f32.mrf.mxu1  ;;  %v1952_v32 = vsub.f32 1.0, %v5420_v58  ;;  %v5436_v29 = vadd.s32 1, %v5422_v8 }
 0x2db   : > { %v1539_v25 = vadd.f32 %v1538_v63, %v1537_v5  ;;  %v1794_v46 = vadd.f32 %v1793_v33, %v1792_v41  ;;  %3625 = vmatmul.msk.f32.gmra.mxu2 %vm417_vm4, %v5131_v12  ;;  %v1970_v9 = vperm.slane %v5420_v58, 0  ;;  %v1947_v63 = vperm.slane %v5422_v8, 1 }
 0x2dc   : > { %v1546_v38 = vadd.f32 %v1545_v3, %v1544_v49  ;;  %v1801_v31 = vadd.f32 %v1800_v0, %v1799_v2  ;;  %v1946_v2 = vperm.slane %v5422_v8, 0  ;;  %v1971_v33 = vperm.slane %v5420_v58, 1 }
 0x2dd   : > { %v1540_v15 = vrot.slane %v1539_v25, 1  ;;  %v1795_v17 = vrot.slane %v1794_v46, 2  ;;  %3633 = vmatmul.msk.f32.gmra.mxu3 %vm417_vm4, %v5131_v12  ;;  %3638 = vmatmul.msk.f32.gmra.mxu0 %vm417_vm4, %v4936_v56  ;;  %vm5481_vm15 = vcmp.eq.s32.totalorder %v4085_v14, %v1947_v63  ;;  %vm5521_vm12 = vcmp.eq.s32.totalorder %v4088_v18, %v1947_v63 }
 0x2de   : > { %v1547_v42 = vrot.slane %v1546_v38, 1  ;;  %v1802_v30 = vrot.slane %v1801_v31, 2  ;;  %3646 = vmatmul.msk.f32.gmra.mxu1 %vm417_vm4, %v4936_v56  ;;  %v1455_v13 = vpop.f32.mrf.mxu2  ;;  %vm5470_vm8 = vcmp.eq.s32.totalorder %v4085_v14, %v1946_v2  ;;  %vm5491_vm3 = vcmp.eq.s32.totalorder %v4088_v18, %v1946_v2 }
 0x2df   : > { %v1796_v45 = vadd.f32 %v1795_v17, %v1794_v46  ;;  %v1541_v11 = vadd.f32 %v1540_v15, %v1539_v25  ;;  %v1559_v61 = vmul.f32 %v1455_v13, %v5193_v34  ;;  %v1496_v5 = vpop.f32.mrf.mxu3  ;;  %v1963_v25 = vperm.slane %v5436_v29, 0 }
 0x2e0   : > { %v1548_v21 = vadd.f32 %v1547_v42, %v1546_v38  ;;  %v1803_v4 = vadd.f32 %v1802_v30, %v1801_v31  ;;  %v1560_v49 = vmul.f32 %v1496_v5, %v5287_v27  ;;  %v1814_v46 = vmul.f32 %v1729_v50, %v5394_v43 }
 0x2e1   : > { %v1797_v39 = vrot.slane %v1796_v45, 1  ;;  %v1561_v56 = vadd.f32 %v1559_v61, %v1557_v36  ;;  %v1815_v38 = vmul.f32 %v1770_v54, %v5396_v7  ;;  %v5460_v50 = vperm.slane %v1952_v32, 0 }
 0x2e2   : > { %v1551_v41 = vrot.slane %v1548_v21, 7  ;;  %v1804_v20 = vrot.slane %v1803_v4, 1  ;;  %v1568_v0 = vadd.f32 %v1560_v49, %v1558_v24  ;;  %v1732_v51 = vpop.f32.mrf.mxu0  ;;  %v1773_v17 = vpop.f32.mrf.mxu1  ;;  %v5464_v54 = vadd.f32 %v5386_v35, %v4331_v40 }
 0x2e3   : > { %v1562_v31 = vrot.slane %v1561_v56, 4  ;;  %v1816_v15 = vmul.f32 %v1732_v51, %v5398_v28  ;;  %3626 = vmatmul.msk.f32.gmra.mxu2 %vm417_vm4, %v5167_v62  ;;  %v1798_v42 = vadd.f32 %v1797_v39, %v1796_v45  ;;  %vm1965_vm14 = vcmp.eq.s32.totalorder %v4085_v14, %v1963_v25 }
 0x2e4   : > { %v1552_v3 = vsel %vm6233_vm2, %v1541_v11, %v1551_v41  ;;  %v1805_v44 = vadd.f32 %v1804_v20, %v1803_v4  ;;  %v1569_v21 = vrot.slane %v1568_v0, 4  ;;  %v1817_v4 = vmul.f32 %v1773_v17, %v5401_v6 }
 0x2e5   : > { %1555 = vst.msk [vmem:[#allocation3 + $0x11] ss:$8 sm:$0x3] %vm5053_vm6, %v1552_v3  ;;  %3634 = vmatmul.msk.f32.gmra.mxu3 %vm417_vm4, %v5167_v62  ;;  %v1563_v13 = vadd.f32 %v1562_v31, %v1561_v56  ;;  %v1818_v11 = vadd.f32 %v1816_v15, %v1814_v46  ;;  %3639 = vmatmul.msk.f32.gmra.mxu0 %vm417_vm4, %v5001_v26  ;;  %v1964_v35 = vperm.slane %v5436_v29, 1  ;;  %v5485_v56 = vperm.slane %v1952_v32, 1 }
 0x2e6   : > { %v1808_v30 = vrot.slane %v1805_v44, 7  ;;  %v1570_v36 = vadd.f32 %v1569_v21, %v1568_v0  ;;  %v1825_v24 = vadd.f32 %v1817_v4, %v1815_v38  ;;  %3647 = vmatmul.msk.f32.gmra.mxu1 %vm417_vm4, %v5001_v26  ;;  %v1458_v61 = vpop.f32.mrf.mxu2  ;;  %v1958_v0 = vsel %vm5470_vm8, %v5460_v50, 0.0  ;;  %vm6255_vm8 = vmmov %vm6245_vm10 }
 0x2e7   : > { %v1564_v41 = vrot.slane %v1563_v13, 2  ;;  %v1819_v39 = vrot.slane %v1818_v11, 4  ;;  %v1499_v40 = vpop.f32.mrf.mxu3  ;;  %v1974_v31 = vsel %vm1965_vm14, %v1970_v9, 0.0  ;;  %vm1967_vm9 = vcmp.eq.s32.totalorder %v4088_v18, %v1963_v25 }
 0x2e8   : > { %v1809_v45 = vsel %vm6234_vm5, %v1798_v42, %v1808_v30  ;;  %v1571_v20 = vrot.slane %v1570_v36, 2  ;;  %v1826_v49 = vrot.slane %v1825_v24, 4  ;;  %vm5501_vm11 = vcmp.eq.s32.totalorder %v4085_v14, %v1964_v35 }
 0x2e9   : > { %1812 = vst.msk [vmem:[#allocation3 + $0x14] ss:$8 sm:$0x3] %vm5053_vm6, %v1809_v45  ;;  %v1565_v3 = vadd.f32 %v1564_v41, %v1563_v13  ;;  %v1820_v44 = vadd.f32 %v1819_v39, %v1818_v11  ;;  %v2186_v42 = vfloor.f32 %v5464_v54  ;;  %v1959_v25 = vsel %vm5481_vm15, %v5485_v56, 0.0  ;;  %vm6258_vm15 = vmmov %vm6255_vm8 }
 0x2ea   : > { %v1572_v51 = vadd.f32 %v1571_v20, %v1570_v36  ;;  %v1827_v46 = vadd.f32 %v1826_v49, %v1825_v24  ;;  %v1735_v38 = vpop.f32.mrf.mxu0  ;;  %v1776_v17 = vpop.f32.mrf.mxu1  ;;  %v1960_v4 = vsel %vm5491_vm3, %v5460_v50, 0.0  ;;  %v1978_v11 = vadd.f32 %v1974_v31, %v1958_v0 }
 0x2eb   : > { %v1566_v32 = vrot.slane %v1565_v3, 1  ;;  %v1821_v15 = vrot.slane %v1820_v44, 2  ;;  %3627 = vmatmul.msk.f32.gmra.mxu2 %vm417_vm4, %v5216_v22  ;;  %v1976_v45 = vsel %vm1967_vm9, %v1970_v9, 0.0  ;;  %v1975_v41 = vsel %vm5501_vm11, %v1971_v33, 0.0 }
 0x2ec   : > { %v1573_v30 = vrot.slane %v1572_v51, 1  ;;  %v1828_v21 = vrot.slane %v1827_v46, 2  ;;  %vm1968_vm7 = vcmp.eq.s32.totalorder %v4088_v18, %v1964_v35  ;;  %v1583_v8 = vmul.f32 %v1458_v61, %v5175_v53 }
 0x2ed   : > { %3635 = vmatmul.msk.f32.gmra.mxu3 %vm417_vm4, %v5216_v22  ;;  %v1822_v13 = vadd.f32 %v1821_v15, %v1820_v44  ;;  %3640 = vmatmul.msk.f32.gmra.mxu0 %vm417_vm4, %v5074_v48  ;;  %v1567_v9 = vadd.f32 %v1566_v32, %v1565_v3  ;;  %v1584_v63 = vmul.f32 %v1499_v40, %v5179_v60  ;;  %v1961_v29 = vsel %vm5521_vm12, %v5485_v56, 0.0  ;;  %vm6261_vm12 = vmmov %vm6255_vm8 }
 0x2ee   : > { %v1574_v24 = vadd.f32 %v1573_v30, %v1572_v51  ;;  %v1829_v5 = vadd.f32 %v1828_v21, %v1827_v46  ;;  %3648 = vmatmul.msk.f32.gmra.mxu1 %vm417_vm4, %v5074_v48  ;;  %v1461_v50 = vpop.f32.mrf.mxu2  ;;  %v1977_v35 = vsel %vm1968_vm7, %v1971_v33, 0.0  ;;  %v5542_v53 = vsub.f32 %v5464_v54, %v2186_v42  ;;  %v3803_v54 = vld [vmem:[%s4108_s22] sm:$0xff]  ;;  %vm6262_vm7 = vmmov %vm6255_vm8 }
 0x2ef   : > { %v1585_v39 = vmul.f32 %v1461_v50, %v5193_v34  ;;  %v1502_v20 = vpop.f32.mrf.mxu3  ;;  %v1823_v26 = vrot.slane %v1822_v13, 1  ;;  %v5545_v3 = vcvt.f32.s32 %v2186_v42  ;;  %v1841_v56 = vmul.f32 %v1776_v17, %v5396_v7 }
 0x2f0   : > { %v1577_v49 = vrot.slane %v1574_v24, 7  ;;  %v1830_v44 = vrot.slane %v1829_v5, 1  ;;  %v1586_v48 = vmul.f32 %v1502_v20, %v5287_v27  ;;  %v1840_v27 = vmul.f32 %v1735_v38, %v5394_v43 }
 0x2f1   : > { %v1587_v0 = vadd.f32 %v1585_v39, %v1583_v8  ;;  %v1824_v46 = vadd.f32 %v1823_v26, %v1822_v13  ;;  %v1979_v38 = vadd.f32 %v1975_v41, %v1959_v25  ;;  %v2264_v17 = vperm.slane %v4658_v47, 7 }
 0x2f2   : > { %v1578_v60 = vsel %vm6245_vm10, %v1567_v9, %v1577_v49  ;;  %v1831_v34 = vadd.f32 %v1830_v44, %v1829_v5  ;;  %v1594_v61 = vadd.f32 %v1586_v48, %v1584_v63  ;;  %v1738_v40 = vpop.f32.mrf.mxu0  ;;  %v1779_v33 = vpop.f32.mrf.mxu1  ;;  %v1980_v24 = vadd.f32 %v1976_v45, %v1960_v4  ;;  %vm6263_vm10 = vmmov %vm6262_vm7 }
 0x2f3   : > { %1581 = vst.msk [vmem:[#allocation3 + $0x12] ss:$8 sm:$0x3] %vm5053_vm6, %v1578_v60  ;;  %v1588_v51 = vrot.slane %v1587_v0, 4  ;;  %v1842_v58 = vmul.f32 %v1738_v40, %v5398_v28  ;;  %3652 = vmatmul.msk.f32.vlgmr.msra.gmra.mxu2 %vm417_vm4, %v3803_v54  ;;  %v1843_v15 = vmul.f32 %v1779_v33, %v5401_v6  ;;  %v5566_v9 = vmul.f32 %v1982_v59, %v1978_v11 }
 0x2f4   : > { %v1834_v31 = vrot.slane %v1831_v34, 7  ;;  %v1595_v32 = vrot.slane %v1594_v61, 4  ;;  %v1981_v41 = vadd.f32 %v1977_v35, %v1961_v29  ;;  %v2228_v39 = vperm.slane %v5545_v3, 0  ;;  %v3804_v34 = vld [vmem:[%s4108_s22 + $0x8] sm:$0xff] }
 0x2f5   : > { %3660 = vmatmul.msk.f32.vlgmr.msra.gmra.mxu3 %vm417_vm4, %v3803_v54  ;;  %v1589_v2 = vadd.f32 %v1588_v51, %v1587_v0  ;;  %v1844_v42 = vadd.f32 %v1842_v58, %v1840_v27  ;;  %3641 = vmatmul.msk.f32.gmra.mxu0 %vm417_vm4, %v5131_v12  ;;  %v1851_v36 = vadd.f32 %v1843_v15, %v1841_v56  ;;  %v5571_v45 = vadd.s32 1, %v5545_v3 }
 0x2f6   : > { %v1835_v30 = vsel %vm6246_vm13, %v1824_v46, %v1834_v31  ;;  %v1596_v21 = vadd.f32 %v1595_v32, %v1594_v61  ;;  %3649 = vmatmul.msk.f32.gmra.mxu1 %vm417_vm4, %v5131_v12  ;;  %v2005_v13 = vpop.f32.mrf.mxu2  ;;  %v2234_v12 = vsub.f32 1.0, %v5542_v53  ;;  %v2229_v49 = vperm.slane %v5545_v3, 1  ;;  %vm6264_vm13 = vmmov %vm6262_vm7 }
 0x2f7   : > { %1838 = vst.msk [vmem:[#allocation3 + $0x15] ss:$8 sm:$0x3] %vm5053_vm6, %v1835_v30  ;;  %v1590_v5 = vrot.slane %v1589_v2, 2  ;;  %v1845_v50 = vrot.slane %v1844_v42, 4  ;;  %v2046_v25 = vpop.f32.mrf.mxu3  ;;  %v1852_v63 = vrot.slane %v1851_v36, 4  ;;  %v5576_v11 = vmul.f32 %v1983_v16, %v1979_v38 }
 0x2f8   : > { %v1597_v8 = vrot.slane %v1596_v21, 2  ;;  %v5580_v0 = vmul.f32 %v1982_v59, %v1980_v24  ;;  %v5586_v61 = vmul.f32 %v1983_v16, %v1981_v41  ;;  %v2252_v40 = vperm.slane %v5542_v53, 0 }
 0x2f9   : > { %v1591_v20 = vadd.f32 %v1590_v5, %v1589_v2  ;;  %v1846_v4 = vadd.f32 %v1845_v50, %v1844_v42  ;;  %v1853_v44 = vadd.f32 %v1852_v63, %v1851_v36  ;;  %vm5591_vm1 = vcmp.eq.s32.totalorder %v4085_v14, %v2228_v39 }
 0x2fa   : > { %v1598_v26 = vadd.f32 %v1597_v8, %v1596_v21  ;;  %v1741_v48 = vpop.f32.mrf.mxu0  ;;  %v1782_v60 = vpop.f32.mrf.mxu1  ;;  %v2253_v51 = vperm.slane %v5542_v53, 1  ;;  %v5598_v33 = vperm.slane %v2234_v12, 0  ;;  %v2245_v16 = vperm.slane %v5571_v45, 0 }
 0x2fb   : > { %v1592_v29 = vrot.slane %v1591_v20, 1  ;;  %v1847_v35 = vrot.slane %v1846_v4, 2  ;;  %3653 = vmatmul.msk.f32.gmra.mxu2 %vm417_vm4, %v3804_v34  ;;  %v1854_v56 = vrot.slane %v1853_v44, 2  ;;  %vm5604_vm0 = vcmp.eq.s32.totalorder %v4085_v14, %v2229_v49 }
 0x2fc   : > { %v1599_v27 = vrot.slane %v1598_v26, 1  ;;  %v5610_v15 = vperm.slane %v2234_v12, 1  ;;  %vm5613_vm2 = vcmp.eq.s32.totalorder %v4088_v18, %v2228_v39  ;;  %v2070_v38 = vmul.f32 %v2005_v13, %v5566_v9 }
 0x2fd   : > { %3661 = vmatmul.msk.f32.gmra.mxu3 %vm417_vm4, %v3804_v34  ;;  %v1848_v58 = vadd.f32 %v1847_v35, %v1846_v4  ;;  %3642 = vmatmul.msk.f32.gmra.mxu0 %vm417_vm4, %v5167_v62  ;;  %v1855_v31 = vadd.f32 %v1854_v56, %v1853_v44  ;;  %v1593_v42 = vadd.f32 %v1592_v29, %v1591_v20  ;;  %v2240_v8 = vsel %vm5591_vm1, %v5598_v33, 0.0  ;;  %v3805_v34 = vld [vmem:[%s4108_s22 + $0x10] sm:$0xff] }
 0x2fe   : > { %v1600_v46 = vadd.f32 %v1599_v27, %v1598_v26  ;;  %3650 = vmatmul.msk.f32.gmra.mxu1 %vm417_vm4, %v5167_v62  ;;  %v2008_v32 = vpop.f32.mrf.mxu2  ;;  %v2071_v30 = vmul.f32 %v2046_v25, %v5576_v11  ;;  %vm5625_vm5 = vcmp.eq.s32.totalorder %v4085_v14, %v2245_v16  ;;  %v2246_v13 = vperm.slane %v5571_v45, 1 }
 0x2ff   : > { %v2072_v21 = vmul.f32 %v2008_v32, %v5580_v0  ;;  %v2049_v36 = vpop.f32.mrf.mxu3  ;;  %v1849_v5 = vrot.slane %v1848_v58, 1  ;;  %v1856_v50 = vrot.slane %v1855_v31, 1  ;;  %v2242_v4 = vsel %vm5613_vm2, %v5598_v33, 0.0 }
 0x300   : > { %v1603_v24 = vrot.slane %v1600_v46, 7  ;;  %v2073_v62 = vmul.f32 %v2049_v36, %v5586_v61  ;;  %v1866_v26 = vmul.f32 %v1741_v48, %v5394_v43  ;;  %v1867_v44 = vmul.f32 %v1782_v60, %v5396_v7 }
 0x301   : > { %v2074_v41 = vadd.f32 %v2072_v21, %v2070_v38  ;;  %v1857_v39 = vadd.f32 %v1856_v50, %v1855_v31  ;;  %v1850_v27 = vadd.f32 %v1849_v5, %v1848_v58  ;;  %v2256_v43 = vsel %vm5625_vm5, %v2252_v40, 0.0 }
 0x302   : > { %v1604_v25 = vsel %vm6255_vm8, %v1593_v42, %v1603_v24  ;;  %v2081_v12 = vadd.f32 %v2073_v62, %v2071_v30  ;;  %v1744_v20 = vpop.f32.mrf.mxu0  ;;  %v1785_v45 = vpop.f32.mrf.mxu1  ;;  %vm5650_vm14 = vcmp.eq.s32.totalorder %v4085_v14, %v2246_v13  ;;  %vm2249_vm3 = vcmp.eq.s32.totalorder %v4088_v18, %v2245_v16 }
 0x303   : > { %1607 = vst.msk [vmem:[#allocation3 + $0x13] ss:$8 sm:$0x3] %vm5053_vm6, %v1604_v25  ;;  %v2075_v29 = vrot.slane %v2074_v41, 4  ;;  %v1868_v35 = vmul.f32 %v1744_v20, %v5398_v28  ;;  %3654 = vmatmul.msk.f32.gmra.mxu2 %vm417_vm4, %v3805_v34  ;;  %v1860_v56 = vrot.slane %v1857_v39, 7  ;;  %v1869_v46 = vmul.f32 %v1785_v45, %v5401_v6 }
 0x304   : > { %v2082_v59 = vrot.slane %v2081_v12, 4  ;;  %vm5663_vm9 = vcmp.eq.s32.totalorder %v4088_v18, %v2229_v49  ;;  %vm2250_vm11 = vcmp.eq.s32.totalorder %v4088_v18, %v2246_v13  ;;  %v2260_v30 = vadd.f32 %v2256_v43, %v2240_v8  ;;  %v3806_v13 = vld [vmem:[%s4108_s22 + $0x18] sm:$0xff] }
 0x305   : > { %3662 = vmatmul.msk.f32.gmra.mxu3 %vm417_vm4, %v3805_v34  ;;  %v2076_v33 = vadd.f32 %v2075_v29, %v2074_v41  ;;  %v1870_v31 = vadd.f32 %v1868_v35, %v1866_v26  ;;  %3643 = vmatmul.msk.f32.gmra.mxu0 %vm417_vm4, %v5216_v22  ;;  %v1861_v28 = vsel %vm6258_vm15, %v1850_v27, %v1860_v56  ;;  %v2241_v16 = vsel %vm5604_vm0, %v5610_v15, 0.0 }
 0x306   : > { %v2083_v6 = vadd.f32 %v2082_v59, %v2081_v12  ;;  %v1877_v48 = vadd.f32 %v1869_v46, %v1867_v44  ;;  %3651 = vmatmul.msk.f32.gmra.mxu1 %vm417_vm4, %v5216_v22  ;;  %v2011_v60 = vpop.f32.mrf.mxu2  ;;  %1864 = vst.msk [vmem:[#allocation3 + $0x16] ss:$8 sm:$0x3] %vm5053_vm6, %v1861_v28  ;;  %v2257_v3 = vsel %vm5650_vm14, %v2253_v51, 0.0  ;;  %v2258_v49 = vsel %vm2249_vm3, %v2252_v40, 0.0  ;;  %vm6281_vm3 = vmmov %vm6262_vm7 }
 0x307   : > { %v2077_v58 = vrot.slane %v2076_v33, 2  ;;  %v1871_v32 = vrot.slane %v1870_v31, 4  ;;  %v2052_v2 = vpop.f32.mrf.mxu3  ;;  %v2243_v62 = vsel %vm5663_vm9, %v5610_v15, 0.0  ;;  %v2259_v54 = vsel %vm2250_vm11, %v2253_v51, 0.0  ;;  %vm6282_vm9 = vmmov %vm6281_vm3 }
 0x308   : > { %v2084_v38 = vrot.slane %v2083_v6, 2  ;;  %v1878_v22 = vrot.slane %v1877_v48, 4  ;;  %v2265_v40 = vperm.slane %v4693_v37, 7  ;;  %v2261_v20 = vadd.f32 %v2257_v3, %v2241_v16 }
 0x309   : > { %v2078_v21 = vadd.f32 %v2077_v58, %v2076_v33  ;;  %v1872_v36 = vadd.f32 %v1871_v32, %v1870_v31  ;;  %v2262_v26 = vadd.f32 %v2258_v49, %v2242_v4  ;;  %v2263_v44 = vadd.f32 %v2259_v54, %v2243_v62 }
 0x30a   : > { %v2085_v24 = vadd.f32 %v2084_v38, %v2083_v6  ;;  %v1879_v5 = vadd.f32 %v1878_v22, %v1877_v48  ;;  %v2287_v50 = vpop.f32.mrf.mxu0  ;;  %v2328_v63 = vpop.f32.mrf.mxu1  ;;  %v5688_v53 = vmul.f32 %v2264_v17, %v2260_v30  ;;  %v2096_v45 = vmul.f32 %v2011_v60, %v5566_v9  ;;  %v3807_v38 = vld [vmem:[%s4108_s22 + $0x20] sm:$0xff] }
 0x30b   : > { %v2079_v41 = vrot.slane %v2078_v21, 1  ;;  %v1873_v8 = vrot.slane %v1872_v36, 2  ;;  %3655 = vmatmul.msk.f32.gmra.mxu2 %vm417_vm4, %v3806_v13  ;;  %v2097_v34 = vmul.f32 %v2052_v2, %v5576_v11  ;;  %v5694_v33 = vmul.f32 %v2265_v40, %v2261_v20 }
 0x30c   : > { %v2086_v25 = vrot.slane %v2085_v24, 1  ;;  %v1880_v39 = vrot.slane %v1879_v5, 2  ;;  %v5698_v43 = vmul.f32 %v2264_v17, %v2262_v26  ;;  %v5700_v7 = vmul.f32 %v2265_v40, %v2263_v44 }
 0x30d   : > { %3663 = vmatmul.msk.f32.gmra.mxu3 %vm417_vm4, %v3806_v13  ;;  %v1874_v12 = vadd.f32 %v1873_v8, %v1872_v36  ;;  %v2080_v35 = vadd.f32 %v2079_v41, %v2078_v21  ;;  %v2498_v58 = vadd.f32 %v4411_v57, %v4792_v19  ;;  %v2352_v32 = vmul.f32 %v2287_v50, %v5688_v53 }
 0x30e   : > { %v2087_v15 = vadd.f32 %v2086_v25, %v2085_v24  ;;  %v1881_v29 = vadd.f32 %v1880_v39, %v1879_v5  ;;  %v2014_v51 = vpop.f32.mrf.mxu2  ;;  %v2353_v2 = vmul.f32 %v2328_v63, %v5694_v33 }
 0x30f   : > { %v2098_v37 = vmul.f32 %v2014_v51, %v5580_v0  ;;  %v2055_v27 = vpop.f32.mrf.mxu3  ;;  %v1875_v59 = vrot.slane %v1874_v12, 1  ;;  %v2505_v50 = vfloor.f32 %v2498_v58 }
 0x310   : > { %v2090_v56 = vrot.slane %v2087_v15, 7  ;;  %v1882_v46 = vrot.slane %v1881_v29, 1  ;;  %v2099_v4 = vmul.f32 %v2055_v27, %v5586_v61 }
 0x311   : > { %v2100_v31 = vadd.f32 %v2098_v37, %v2096_v45  ;;  %v1876_v22 = vadd.f32 %v1875_v59, %v1874_v12  ;;  %v5717_v20 = vcvt.f32.s32 %v2505_v50 }
 0x312   : > { %v2091_v28 = vsel %vm6261_vm12, %v2080_v35, %v2090_v56  ;;  %v1883_v6 = vadd.f32 %v1882_v46, %v1881_v29  ;;  %v2107_v48 = vadd.f32 %v2099_v4, %v2097_v34  ;;  %v2290_v60 = vpop.f32.mrf.mxu0  ;;  %v2331_v42 = vpop.f32.mrf.mxu1  ;;  %v3808_v29 = vld [vmem:[%s4108_s22 + $0x28] sm:$0xff]  ;;  %v5722_v34 = vsub.f32 %v2498_v58, %v2505_v50  ;;  %v3809_v50 = vld [vmem:[%s4108_s22 + $0x30] sm:$0xff] }
 0x313   : > { %2094 = vst.msk [vmem:[#allocation3 + $0x20] ss:$8 sm:$0x3] %vm5053_vm6, %v2091_v28  ;;  %v2101_v47 = vrot.slane %v2100_v31, 4  ;;  %v2354_v17 = vmul.f32 %v2290_v60, %v5698_v43  ;;  %3656 = vmatmul.msk.f32.gmra.mxu2 %vm417_vm4, %v3807_v38  ;;  %v2355_v21 = vmul.f32 %v2331_v42, %v5700_v7  ;;  %v5725_v59 = vadd.s32 1, %v5717_v20 }
 0x314   : > { %v1886_v30 = vrot.slane %v1883_v6, 7  ;;  %v2108_v16 = vrot.slane %v2107_v48, 4  ;;  %v2583_v46 = vperm.slane %v4894_v10, 0  ;;  %v2553_v42 = vsub.f32 1.0, %v5722_v34 }
 0x315   : > { %3664 = vmatmul.msk.f32.gmra.mxu3 %vm417_vm4, %v3807_v38  ;;  %v2102_v57 = vadd.f32 %v2101_v47, %v2100_v31  ;;  %v2356_v36 = vadd.f32 %v2354_v17, %v2352_v32  ;;  %v2363_v24 = vadd.f32 %v2355_v21, %v2353_v2  ;;  %v2547_v17 = vperm.slane %v5717_v20, 0 }
 0x316   : > { %v1887_v3 = vsel %vm6262_vm7, %v1876_v22, %v1886_v30  ;;  %v2109_v49 = vadd.f32 %v2108_v16, %v2107_v48  ;;  %v2017_v5 = vpop.f32.mrf.mxu2  ;;  %v2584_v38 = vperm.slane %v4926_v55, 0 }
 0x317   : > { %1890 = vst.msk [vmem:[#allocation3 + $0x17] ss:$8 sm:$0x3] %vm5053_vm6, %v1887_v3  ;;  %v2103_v62 = vrot.slane %v2102_v57, 2  ;;  %v2357_v54 = vrot.slane %v2356_v36, 4  ;;  %v2058_v41 = vpop.f32.mrf.mxu3  ;;  %v2364_v63 = vrot.slane %v2363_v24, 4  ;;  %v2122_v31 = vmul.f32 %v2017_v5, %v5566_v9 }
 0x318   : > { %v2110_v8 = vrot.slane %v2109_v49, 2  ;;  %v2123_v28 = vmul.f32 %v2058_v41, %v5576_v11  ;;  %vm5754_vm1 = vcmp.eq.s32.totalorder %v4085_v14, %v2547_v17  ;;  %vm5777_vm8 = vcmp.eq.s32.totalorder %v4088_v18, %v2547_v17 }
 0x319   : > { %v2104_v13 = vadd.f32 %v2103_v62, %v2102_v57  ;;  %v2358_v25 = vadd.f32 %v2357_v54, %v2356_v36  ;;  %v2365_v40 = vadd.f32 %v2364_v63, %v2363_v24  ;;  %v2564_v57 = vperm.slane %v5725_v59, 0 }
 0x31a   : > { %v2111_v39 = vadd.f32 %v2110_v8, %v2109_v49  ;;  %v2293_v12 = vpop.f32.mrf.mxu0  ;;  %v2334_v15 = vpop.f32.mrf.mxu1 }
 0x31b   : > { %v2105_v26 = vrot.slane %v2104_v13, 1  ;;  %v2359_v44 = vrot.slane %v2358_v25, 2  ;;  %3657 = vmatmul.msk.f32.gmra.mxu2 %vm417_vm4, %v3808_v29  ;;  %v2366_v35 = vrot.slane %v2365_v40, 2  ;;  %v2378_v36 = vmul.f32 %v2293_v12, %v5688_v53 }
 0x31c   : > { %v2112_v51 = vrot.slane %v2111_v39, 1  ;;  %v2379_v3 = vmul.f32 %v2334_v15, %v5694_v33  ;;  %v5749_v15 = vperm.slane %v2553_v42, 0  ;;  %vm5759_vm0 = vcmp.eq.s32.totalorder %v4085_v14, %v2564_v57 }
 0x31d   : > { %3665 = vmatmul.msk.f32.gmra.mxu3 %vm417_vm4, %v3808_v29  ;;  %v2360_v45 = vadd.f32 %v2359_v44, %v2358_v25  ;;  %v2367_v27 = vadd.f32 %v2366_v35, %v2365_v40  ;;  %v2106_v4 = vadd.f32 %v2105_v26, %v2104_v13  ;;  %v2548_v25 = vperm.slane %v5717_v20, 1 }
 0x31e   : > { %v2113_v37 = vadd.f32 %v2112_v51, %v2111_v39  ;;  %v2020_v56 = vpop.f32.mrf.mxu2  ;;  %v2565_v39 = vperm.slane %v5725_v59, 1  ;;  %v5764_v59 = vperm.slane %v2553_v42, 1  ;;  %vm5801_vm14 = vcmp.eq.s32.totalorder %v4088_v18, %v2564_v57 }
 0x31f   : > { %v2124_v6 = vmul.f32 %v2020_v56, %v5580_v0  ;;  %v2061_v48 = vpop.f32.mrf.mxu3  ;;  %v2361_v32 = vrot.slane %v2360_v45, 1  ;;  %v2368_v58 = vrot.slane %v2367_v27, 1  ;;  %v2571_v56 = vperm.slane %v5722_v34, 0 }
 0x320   : > { %v2116_v60 = vrot.slane %v2113_v37, 7  ;;  %v2125_v2 = vmul.f32 %v2061_v48, %v5586_v61  ;;  %vm5767_vm2 = vcmp.eq.s32.totalorder %v4085_v14, %v2548_v25  ;;  %vm5772_vm5 = vcmp.eq.s32.totalorder %v4085_v14, %v2565_v39 }
 0x321   : > { %v2126_v47 = vadd.f32 %v2124_v6, %v2122_v31  ;;  %v2369_v30 = vadd.f32 %v2368_v58, %v2367_v27  ;;  %v2362_v62 = vadd.f32 %v2361_v32, %v2360_v45  ;;  %vm5820_vm15 = vcmp.eq.s32.totalorder %v4088_v18, %v2565_v39 }
 0x322   : > { %v2117_v22 = vsel %vm6263_vm10, %v2106_v4, %v2116_v60  ;;  %v2133_v16 = vadd.f32 %v2125_v2, %v2123_v28  ;;  %v2296_v21 = vpop.f32.mrf.mxu0  ;;  %v2337_v5 = vpop.f32.mrf.mxu1  ;;  %v2780_v2 = vadd.f32 %v4562_v23, %v4792_v19  ;;  %v2560_v23 = vsel %vm5767_vm2, %v5764_v59, 0.0  ;;  %vm6287_vm10 = vmmov %vm6281_vm3 }
 0x323   : > { %2120 = vst.msk [vmem:[#allocation3 + $0x21] ss:$8 sm:$0x3] %vm5053_vm6, %v2117_v22  ;;  %v2127_v49 = vrot.slane %v2126_v47, 4  ;;  %v2380_v24 = vmul.f32 %v2296_v21, %v5698_v43  ;;  %3658 = vmatmul.msk.f32.gmra.mxu2 %vm417_vm4, %v3809_v50  ;;  %v2372_v54 = vrot.slane %v2369_v30, 7  ;;  %v2381_v8 = vmul.f32 %v2337_v5, %v5700_v7  ;;  %v3810_v30 = vld [vmem:[%s4108_s22 + $0x38] sm:$0xff] }
 0x324   : > { %v2134_v41 = vrot.slane %v2133_v16, 4  ;;  %v2572_v21 = vperm.slane %v5722_v34, 1  ;;  %s3678_s22 = sshll.u32 %s3956_s9, 4  ;;  %s3418_s9 = scalar_lea.sflag [#allocation5], %s311_s20 }
 0x325   : > { %3666 = vmatmul.msk.f32.gmra.mxu3 %vm417_vm4, %v3809_v50  ;;  %v2128_v63 = vadd.f32 %v2127_v49, %v2126_v47  ;;  %v2382_v13 = vadd.f32 %v2380_v24, %v2378_v36  ;;  %v2373_v40 = vsel %vm6264_vm13, %v2362_v62, %v2372_v54  ;;  %v2389_v26 = vadd.f32 %v2381_v8, %v2379_v3  ;;  %vm6288_vm13 = vmmov %vm6281_vm3  ;;  %s3429_s24 = scalar_lea.hbm %s6060_s8, %s3678_s22 }
 0x326   : > { %v2135_v12 = vadd.f32 %v2134_v41, %v2133_v16  ;;  %v2023_v44 = vpop.f32.mrf.mxu2  ;;  %2376 = vst.msk [vmem:[#allocation3 + $0x24] ss:$8 sm:$0x3] %vm5053_vm6, %v2373_v40  ;;  %v2559_v16 = vsel %vm5754_vm1, %v5749_v15, 0.0  ;;  %v2575_v3 = vsel %vm5759_vm0, %v2571_v56, 0.0  ;;  %v2576_v49 = vsel %vm5772_vm5, %v2572_v21, 0.0 }
 0x327   : > { %v2129_v29 = vrot.slane %v2128_v63, 2  ;;  %v2383_v51 = vrot.slane %v2382_v13, 4  ;;  %v2064_v35 = vpop.f32.mrf.mxu3  ;;  %v2390_v27 = vrot.slane %v2389_v26, 4  ;;  %v2561_v24 = vsel %vm5777_vm8, %v5749_v15, 0.0  ;;  %s3433_s10 = sshll.u32 %s3429_s24, 4  ;;  %s3434_s10 = int_to_ptr.hbm [resolvable:$true] %s3433_s10 }
 0x328   : > { %v2136_v37 = vrot.slane %v2135_v12, 2  ;;  %v2787_v41 = vfloor.f32 %v2780_v2  ;;  %v2580_v34 = vadd.f32 %v2576_v49, %v2560_v23  ;;  %s3825_s12 = sshra.s32 %s3434_s10, 4  ;;  %s3826_s12 = int_to_ptr.hbm [resolvable:$true] %s3825_s12 }
 0x329   : > { %v2130_v4 = vadd.f32 %v2129_v29, %v2128_v63  ;;  %v2384_v31 = vadd.f32 %v2383_v51, %v2382_v13  ;;  %v2391_v60 = vadd.f32 %v2390_v27, %v2389_v26  ;;  %v2148_v63 = vmul.f32 %v2023_v44, %v5566_v9  ;;  %s3827_s13 = scalar_lea.hbm %s3826_s12, 16  ;;  %p3832_p0 = scmp.lt.s32.totalorder %s3826_s12, %s6060_s8 }
 0x32a   : > { %v2137_v48 = vadd.f32 %v2136_v37, %v2135_v12  ;;  %v2299_v32 = vpop.f32.mrf.mxu0  ;;  %v2340_v22 = vpop.f32.mrf.mxu1  ;;  %v2149_v13 = vmul.f32 %v2064_v35, %v5576_v11  ;;  %v5825_v20 = vcvt.f32.s32 %v2787_v41  ;;  %v5835_v58 = vsub.f32 %v2780_v2, %v2787_v41  ;;  %p3828_p11 = scmp.ne.s32.totalorder %s3826_s12, %s3827_s13  ;;  %p3833_p1 = scmp.lt.s32.totalorder %s3831_s21, %s3827_s13 }
 0x32b   : > { %v2131_v47 = vrot.slane %v2130_v4, 1  ;;  %v2385_v42 = vrot.slane %v2384_v31, 2  ;;  %3659 = vmatmul.msk.f32.gmra.mxu2 %vm417_vm4, %v3810_v30  ;;  %v2392_v17 = vrot.slane %v2391_v60, 2  ;;  %v2405_v37 = vmul.f32 %v2340_v22, %v5694_v33 }
 0x32c   : > { %v2138_v36 = vrot.slane %v2137_v48, 1  ;;  %p3829_p12 = pnand %p3828_p11, %p3973_p5  ;;  %p3834_p2 = por %p3833_p1, %p3832_p0 }
 0x32d   : > { %3667 = vmatmul.msk.f32.gmra.mxu3 %vm417_vm4, %v3810_v30  ;;  %v2386_v19 = vadd.f32 %v2385_v42, %v2384_v31  ;;  %v2393_v50 = vadd.f32 %v2392_v17, %v2391_v60  ;;  %vm5806_vm4 = vcmp.eq.s32.totalorder %v4088_v18, %v2548_v25  ;;  %v2132_v8 = vadd.f32 %v2131_v47, %v2130_v4 }
 0x32e   : > { %v2139_v5 = vadd.f32 %v2138_v36, %v2137_v48  ;;  %v2026_v62 = vpop.f32.mrf.mxu2  ;;  %v2577_v25 = vsel %vm5801_vm14, %v2571_v56, 0.0  ;;  %v2562_v45 = vsel %vm5806_vm4, %v5764_v59, 0.0  ;;  %v2578_v60 = vsel %vm5820_vm15, %v2572_v21, 0.0  ;;  %vm6293_vm14 = vmmov %vm6281_vm3  ;;  %p3830_p13 = pneg %p3829_p12 }
 0x32f   : > { %v2150_v40 = vmul.f32 %v2026_v62, %v5580_v0  ;;  %v2067_v57 = vpop.f32.mrf.mxu3  ;;  %v2387_v26 = vrot.slane %v2386_v19, 1  ;;  %v2394_v15 = vrot.slane %v2393_v50, 1  ;;  %v5839_v30 = vadd.s32 1, %v5825_v20  ;;  %vm6294_vm4 = vmmov %vm6281_vm3 }
 0x330   : > { %v2142_v12 = vrot.slane %v2139_v5, 7  ;;  %v2151_v29 = vmul.f32 %v2067_v57, %v5586_v61  ;;  %v2404_v61 = vmul.f32 %v2299_v32, %v5688_v53  ;;  %v2581_v2 = vadd.f32 %v2577_v25, %v2561_v24  ;;  %vm6295_vm15 = vmmov %vm6281_vm3  ;;  %p3835_p3 = pnand %p3834_p2, %p3830_p13 }
 0x331   : > { %v2152_v51 = vadd.f32 %v2150_v40, %v2148_v63  ;;  %v2395_v0 = vadd.f32 %v2394_v15, %v2393_v50  ;;  %v2388_v59 = vadd.f32 %v2387_v26, %v2386_v19  ;;  %v2579_v19 = vadd.f32 %v2575_v3, %v2559_v16 }
 0x332   : > { %v2143_v11 = vsel %vm6281_vm3, %v2132_v8, %v2142_v12  ;;  %v2159_v44 = vadd.f32 %v2151_v29, %v2149_v13  ;;  %v2302_v35 = vpop.f32.mrf.mxu0  ;;  %v2343_v56 = vpop.f32.mrf.mxu1  ;;  %v2582_v62 = vadd.f32 %v2578_v60, %v2562_v45  ;;  %v2829_v8 = vperm.slane %v5825_v20, 0 }
 0x333   : > { %2146 = vst.msk [vmem:[#allocation3 + $0x22] ss:$8 sm:$0x3] %vm5053_vm6, %v2143_v11  ;;  %v2153_v27 = vrot.slane %v2152_v51, 4  ;;  %v2406_v39 = vmul.f32 %v2302_v35, %v5698_v43  ;;  %v2398_v4 = vrot.slane %v2395_v0, 7  ;;  %v2407_v28 = vmul.f32 %v2343_v56, %v5700_v7 }
 0x334   : > { %v2160_v31 = vrot.slane %v2159_v44, 4  ;;  %v2835_v63 = vsub.f32 1.0, %v5835_v58  ;;  %v2846_v12 = vperm.slane %v5839_v30, 0  ;;  %v5848_v16 = vmul.f32 %v2583_v46, %v2579_v19 }
 0x335   : > { %v2154_v6 = vadd.f32 %v2153_v27, %v2152_v51  ;;  %v2408_v48 = vadd.f32 %v2406_v39, %v2404_v61  ;;  %v2399_v32 = vsel %vm6282_vm9, %v2388_v59, %v2398_v4  ;;  %v2415_v42 = vadd.f32 %v2407_v28, %v2405_v37  ;;  %vm6296_vm9 = vmmov %vm6281_vm3 }
 0x336   : > { %v2161_v47 = vadd.f32 %v2160_v31, %v2159_v44  ;;  %v2606_v22 = vpop.f32.mrf.mxu2  ;;  %2402 = vst.msk [vmem:[#allocation3 + $0x25] ss:$8 sm:$0x3] %vm5053_vm6, %v2399_v32  ;;  %v5852_v3 = vmul.f32 %v2584_v38, %v2580_v34  ;;  %v5856_v29 = vmul.f32 %v2583_v46, %v2581_v2  ;;  %v5860_v51 = vmul.f32 %v2584_v38, %v2582_v62 }
 0x337   : > { %v2155_v36 = vrot.slane %v2154_v6, 2  ;;  %v2409_v17 = vrot.slane %v2408_v48, 4  ;;  %v2647_v5 = vpop.f32.mrf.mxu3  ;;  %v2416_v21 = vrot.slane %v2415_v42, 4  ;;  %vm5865_vm11 = vcmp.eq.s32.totalorder %v4085_v14, %v2829_v8 }
 0x338   : > { %v2162_v50 = vrot.slane %v2161_v47, 2  ;;  %v5869_v9 = vperm.slane %v2835_v63, 0  ;;  %v2830_v11 = vperm.slane %v5825_v20, 1  ;;  %vm2848_vm12 = vcmp.eq.s32.totalorder %v4085_v14, %v2846_v12 }
 0x339   : > { %v2156_v54 = vadd.f32 %v2155_v36, %v2154_v6  ;;  %v2410_v41 = vadd.f32 %v2409_v17, %v2408_v48  ;;  %v2417_v40 = vadd.f32 %v2416_v21, %v2415_v42  ;;  %v2853_v38 = vperm.slane %v5835_v58, 0 }
 0x33a   : > { %v2163_v13 = vadd.f32 %v2162_v50, %v2161_v47  ;;  %v2305_v57 = vpop.f32.mrf.mxu0  ;;  %v2346_v23 = vpop.f32.mrf.mxu1  ;;  %v2671_v61 = vmul.f32 %v2606_v22, %v5848_v16  ;;  %v2672_v37 = vmul.f32 %v2647_v5, %v5852_v3  ;;  %v2841_v6 = vsel %vm5865_vm11, %v5869_v9, 0.0  ;;  %vm6297_vm11 = vmmov %vm6281_vm3 }
 0x33b   : > { %v2157_v26 = vrot.slane %v2156_v54, 1  ;;  %v2411_v15 = vrot.slane %v2410_v41, 2  ;;  %v2418_v24 = vrot.slane %v2417_v40, 2  ;;  %v2857_v48 = vsel %vm2848_vm12, %v2853_v38, 0.0  ;;  %vm6301_vm12 = vmmov %vm6281_vm3 }
 0x33c   : > { %v2164_v49 = vrot.slane %v2163_v13, 1  ;;  %vm5882_vm7 = vcmp.eq.s32.totalorder %v4085_v14, %v2830_v11  ;;  %v2847_v36 = vperm.slane %v5839_v30, 1  ;;  %v2430_v17 = vmul.f32 %v2305_v57, %v5688_v53 }
 0x33d   : > { %v2412_v25 = vadd.f32 %v2411_v15, %v2410_v41  ;;  %v2419_v44 = vadd.f32 %v2418_v24, %v2417_v40  ;;  %v2158_v35 = vadd.f32 %v2157_v26, %v2156_v54  ;;  %v2431_v19 = vmul.f32 %v2346_v23, %v5694_v33 }
 0x33e   : > { %v2165_v0 = vadd.f32 %v2164_v49, %v2163_v13  ;;  %v2609_v46 = vpop.f32.mrf.mxu2  ;;  %v2838_v40 = vperm.slane %v2835_v63, 1  ;;  %v2854_v30 = vperm.slane %v5835_v58, 1  ;;  %vm2849_vm1 = vcmp.eq.s32.totalorder %v4085_v14, %v2847_v36 }
 0x33f   : > { %v2673_v27 = vmul.f32 %v2609_v46, %v5856_v29  ;;  %v2650_v39 = vpop.f32.mrf.mxu3  ;;  %v2413_v59 = vrot.slane %v2412_v25, 1  ;;  %v2420_v4 = vrot.slane %v2419_v44, 1  ;;  %vm5902_vm0 = vcmp.eq.s32.totalorder %v4088_v18, %v2829_v8 }
 0x340   : > { %v2168_v56 = vrot.slane %v2165_v0, 7  ;;  %v2674_v31 = vmul.f32 %v2650_v39, %v5860_v51  ;;  %vm2850_vm2 = vcmp.eq.s32.totalorder %v4088_v18, %v2846_v12  ;;  %vm5908_vm5 = vcmp.eq.s32.totalorder %v4088_v18, %v2830_v11 }
 0x341   : > { %v2675_v28 = vadd.f32 %v2673_v27, %v2671_v61  ;;  %v2421_v47 = vadd.f32 %v2420_v4, %v2419_v44  ;;  %v2414_v21 = vadd.f32 %v2413_v59, %v2412_v25  ;;  %vm2851_vm8 = vcmp.eq.s32.totalorder %v4088_v18, %v2847_v36 }
 0x342   : > { %v2169_v32 = vsel %vm6287_vm10, %v2158_v35, %v2168_v56  ;;  %v2682_v42 = vadd.f32 %v2674_v31, %v2672_v37  ;;  %v2308_v22 = vpop.f32.mrf.mxu0  ;;  %v2842_v20 = vsel %vm5882_vm7, %v2838_v40, 0.0  ;;  %v2858_v8 = vsel %vm2849_vm1, %v2854_v30, 0.0  ;;  %vm6302_vm7 = vmmov %vm6281_vm3 }
 0x343   : > { %2172 = vst.msk [vmem:[#allocation3 + $0x23] ss:$8 sm:$0x3] %vm5053_vm6, %v2169_v32  ;;  %v2676_v34 = vrot.slane %v2675_v28, 4  ;;  %v2432_v5 = vmul.f32 %v2308_v22, %v5698_v43  ;;  %v2349_v50 = vpop.f32.mrf.mxu1  ;;  %v2424_v2 = vrot.slane %v2421_v47, 7  ;;  %v2843_v12 = vsel %vm5902_vm0, %v5869_v9, 0.0  ;;  %vm6303_vm10 = vmmov %vm6281_vm3 }
 0x344   : > { %v2683_v62 = vrot.slane %v2682_v42, 4  ;;  %v2433_v54 = vmul.f32 %v2349_v50, %v5700_v7  ;;  %v2859_v44 = vsel %vm2850_vm2, %v2853_v38, 0.0  ;;  %v2844_v18 = vsel %vm5908_vm5, %v2838_v40, 0.0  ;;  %vm6305_vm1 = vmmov %vm6281_vm3 }
 0x345   : > { %v2677_v41 = vadd.f32 %v2676_v34, %v2675_v28  ;;  %v2434_v13 = vadd.f32 %v2432_v5, %v2430_v17  ;;  %v2425_v26 = vsel %vm6288_vm13, %v2414_v21, %v2424_v2  ;;  %v2860_v61 = vsel %vm2851_vm8, %v2854_v30, 0.0  ;;  %vm6304_vm13 = vmmov %vm6281_vm3 }
 0x346   : > { %v2684_v15 = vadd.f32 %v2683_v62, %v2682_v42  ;;  %v2441_v53 = vadd.f32 %v2433_v54, %v2431_v19  ;;  %v2612_v57 = vpop.f32.mrf.mxu2  ;;  %2428 = vst.msk [vmem:[#allocation3 + $0x26] ss:$8 sm:$0x3] %vm5053_vm6, %v2425_v26  ;;  %v2865_v39 = vperm.slane %v4894_v10, 1  ;;  %v2861_v59 = vadd.f32 %v2857_v48, %v2841_v6  ;;  %vm6306_vm0 = vmmov %vm6305_vm1 }
 0x347   : > { %v2678_v33 = vrot.slane %v2677_v41, 2  ;;  %v2435_v43 = vrot.slane %v2434_v13, 4  ;;  %v2862_v4 = vadd.f32 %v2858_v8, %v2842_v20  ;;  %v2863_v31 = vadd.f32 %v2859_v44, %v2843_v12  ;;  %vm6307_vm2 = vmmov %vm6306_vm0 }
 0x348   : > { %v2653_v23 = vpop.f32.mrf.mxu3  ;;  %v2685_v58 = vrot.slane %v2684_v15, 2  ;;  %v2442_v63 = vrot.slane %v2441_v53, 4  ;;  %v2866_v9 = vperm.slane %v4926_v55, 1  ;;  %v2864_v32 = vadd.f32 %v2860_v61, %v2844_v18 }
 0x349   : > { %v2679_v49 = vadd.f32 %v2678_v33, %v2677_v41  ;;  %v2436_v24 = vadd.f32 %v2435_v43, %v2434_v13  ;;  %v2697_v42 = vmul.f32 %v2612_v57, %v5848_v16  ;;  %v2698_v22 = vmul.f32 %v2653_v23, %v5852_v3 }
 0x34a   : > { %v2686_v25 = vadd.f32 %v2685_v58, %v2684_v15  ;;  %v2443_v45 = vadd.f32 %v2442_v63, %v2441_v53  ;;  %v2888_v0 = vpop.f32.mrf.mxu0  ;;  %v5926_v48 = vmul.f32 %v2865_v39, %v2861_v59  ;;  %v5928_v5 = vmul.f32 %v2866_v9, %v2862_v4 }
 0x34b   : > { %v2680_v11 = vrot.slane %v2679_v49, 1  ;;  %v2437_v46 = vrot.slane %v2436_v24, 2  ;;  %v2929_v35 = vpop.f32.mrf.mxu1  ;;  %v5930_v50 = vmul.f32 %v2865_v39, %v2863_v31  ;;  %v5933_v41 = vmul.f32 %v2866_v9, %v2864_v32 }
 0x34c   : > { %v2687_v37 = vrot.slane %v2686_v25, 1  ;;  %v2444_v27 = vrot.slane %v2443_v45, 2  ;;  %v2953_v13 = vmul.f32 %v2888_v0, %v5926_v48  ;;  %v2954_v40 = vmul.f32 %v2929_v35, %v5928_v5 }
 0x34d   : > { %v2438_v56 = vadd.f32 %v2437_v46, %v2436_v24  ;;  %v2681_v47 = vadd.f32 %v2680_v11, %v2679_v49  ;;  %vm6308_vm5 = vcmask 1043456  }
 0x34e   : > { %v2688_v28 = vadd.f32 %v2687_v37, %v2686_v25  ;;  %v2445_v60 = vadd.f32 %v2444_v27, %v2443_v45  ;;  %v2615_v38 = vpop.f32.mrf.mxu2  ;;  %vm6309_vm8 = vmmov %vm6308_vm5 }
 0x34f   : > { %v2699_v36 = vmul.f32 %v2615_v38, %v5856_v29  ;;  %v2439_v10 = vrot.slane %v2438_v56, 1 }
 0x350   : > { %v2656_v17 = vpop.f32.mrf.mxu3  ;;  %v2691_v19 = vrot.slane %v2688_v28, 7  ;;  %v2446_v34 = vrot.slane %v2445_v60, 1 }
 0x351   : > { %v2700_v6 = vmul.f32 %v2656_v17, %v5860_v51  ;;  %v2701_v55 = vadd.f32 %v2699_v36, %v2697_v42  ;;  %v2440_v53 = vadd.f32 %v2439_v10, %v2438_v56 }
 0x352   : > { %v2692_v21 = vsel %vm6293_vm14, %v2681_v47, %v2691_v19  ;;  %v2447_v2 = vadd.f32 %v2446_v34, %v2445_v60  ;;  %v2891_v54 = vpop.f32.mrf.mxu0 }
 0x353   : > { %v2708_v62 = vadd.f32 %v2700_v6, %v2698_v22  ;;  %2695 = vst.msk [vmem:[#allocation3 + $0x30] ss:$8 sm:$0x3] %vm5053_vm6, %v2692_v21  ;;  %v2702_v30 = vrot.slane %v2701_v55, 4  ;;  %v2955_v26 = vmul.f32 %v2891_v54, %v5930_v50  ;;  %v2932_v15 = vpop.f32.mrf.mxu1 }
 0x354   : > { %v2450_v57 = vrot.slane %v2447_v2, 7  ;;  %v2956_v43 = vmul.f32 %v2932_v15, %v5933_v41 }
 0x355   : > { %v2709_v33 = vrot.slane %v2708_v62, 4  ;;  %v2703_v23 = vadd.f32 %v2702_v30, %v2701_v55  ;;  %v2957_v7 = vadd.f32 %v2955_v26, %v2953_v13 }
 0x356   : > { %v2451_v58 = vsel %vm6294_vm4, %v2440_v53, %v2450_v57  ;;  %v2964_v14 = vadd.f32 %v2956_v43, %v2954_v40  ;;  %v2618_v49 = vpop.f32.mrf.mxu2 }
 0x357   : > { %v2710_v63 = vadd.f32 %v2709_v33, %v2708_v62  ;;  %2454 = vst.msk [vmem:[#allocation3 + $0x27] ss:$8 sm:$0x3] %vm5053_vm6, %v2451_v58  ;;  %v2704_v24 = vrot.slane %v2703_v23, 2  ;;  %v2958_v20 = vrot.slane %v2957_v7, 4  ;;  %v2723_v28 = vmul.f32 %v2618_v49, %v5848_v16 }
 0x358   : > { %v2659_v8 = vpop.f32.mrf.mxu3  ;;  %v2965_v45 = vrot.slane %v2964_v14, 4 }
 0x359   : > { %v2711_v25 = vrot.slane %v2710_v63, 2  ;;  %v2705_v0 = vadd.f32 %v2704_v24, %v2703_v23  ;;  %v2959_v12 = vadd.f32 %v2958_v20, %v2957_v7  ;;  %v2724_v60 = vmul.f32 %v2659_v8, %v5852_v3 }
 0x35a   : > { %v2966_v11 = vadd.f32 %v2965_v45, %v2964_v14  ;;  %v2894_v46 = vpop.f32.mrf.mxu0 }
 0x35b   : > { %v2712_v44 = vadd.f32 %v2711_v25, %v2710_v63  ;;  %v2706_v35 = vrot.slane %v2705_v0, 1  ;;  %v2960_v18 = vrot.slane %v2959_v12, 2  ;;  %v2935_v61 = vpop.f32.mrf.mxu1  ;;  %v2979_v6 = vmul.f32 %v2894_v46, %v5926_v48 }
 0x35c   : > { %v2967_v27 = vrot.slane %v2966_v11, 2  ;;  %v2980_v55 = vmul.f32 %v2935_v61, %v5928_v5 }
 0x35d   : > { %v2713_v37 = vrot.slane %v2712_v44, 1  ;;  %v2961_v39 = vadd.f32 %v2960_v18, %v2959_v12  ;;  %v2707_v31 = vadd.f32 %v2706_v35, %v2705_v0 }
 0x35e   : > { %v2968_v59 = vadd.f32 %v2967_v27, %v2966_v11  ;;  %v2621_v4 = vpop.f32.mrf.mxu2 }
 0x35f   : > { %v2714_v56 = vadd.f32 %v2713_v37, %v2712_v44  ;;  %v2725_v9 = vmul.f32 %v2621_v4, %v5856_v29  ;;  %v2962_v47 = vrot.slane %v2961_v39, 1 }
 0x360   : > { %v2662_v38 = vpop.f32.mrf.mxu3  ;;  %v2969_v42 = vrot.slane %v2968_v59, 1 }
 0x361   : > { %v2717_v32 = vrot.slane %v2714_v56, 7  ;;  %v2726_v22 = vmul.f32 %v2662_v38, %v5860_v51  ;;  %v2727_v36 = vadd.f32 %v2725_v9, %v2723_v28  ;;  %v2963_v54 = vadd.f32 %v2962_v47, %v2961_v39 }
 0x362   : > { %v2970_v19 = vadd.f32 %v2969_v42, %v2968_v59  ;;  %v2897_v34 = vpop.f32.mrf.mxu0 }
 0x363   : > { %v2718_v17 = vsel %vm6295_vm15, %v2707_v31, %v2717_v32  ;;  %v2734_v10 = vadd.f32 %v2726_v22, %v2724_v60  ;;  %v2728_v21 = vrot.slane %v2727_v36, 4  ;;  %v2981_v2 = vmul.f32 %v2897_v34, %v5930_v50  ;;  %v2938_v62 = vpop.f32.mrf.mxu1 }
 0x364   : > { %2721 = vst.msk [vmem:[#allocation3 + $0x31] ss:$8 sm:$0x3] %vm5053_vm6, %v2718_v17  ;;  %v2973_v13 = vrot.slane %v2970_v19, 7  ;;  %v2982_v30 = vmul.f32 %v2938_v62, %v5933_v41 }
 0x365   : > { %v2735_v40 = vrot.slane %v2734_v10, 4  ;;  %v2729_v26 = vadd.f32 %v2728_v21, %v2727_v36  ;;  %v2983_v15 = vadd.f32 %v2981_v2, %v2979_v6 }
 0x366   : > { %v2974_v53 = vsel %vm6281_vm3, %v2963_v54, %v2973_v13  ;;  %v2990_v33 = vadd.f32 %v2982_v30, %v2980_v55  ;;  %v2624_v43 = vpop.f32.mrf.mxu2 }
 0x367   : > { %v2736_v57 = vadd.f32 %v2735_v40, %v2734_v10  ;;  %2977 = vst.msk [vmem:[#allocation3 + $0x34] ss:$8 sm:$0x3] %vm5053_vm6, %v2974_v53  ;;  %v2730_v23 = vrot.slane %v2729_v26, 2  ;;  %v2984_v7 = vrot.slane %v2983_v15, 4  ;;  %v2749_v27 = vmul.f32 %v2624_v43, %v5848_v16 }
 0x368   : > { %v2665_v58 = vpop.f32.mrf.mxu3  ;;  %v2991_v14 = vrot.slane %v2990_v33, 4 }
 0x369   : > { %v2737_v63 = vrot.slane %v2736_v57, 2  ;;  %v2731_v49 = vadd.f32 %v2730_v23, %v2729_v26  ;;  %v2985_v24 = vadd.f32 %v2984_v7, %v2983_v15  ;;  %v2750_v39 = vmul.f32 %v2665_v58, %v5852_v3 }
 0x36a   : > { %v2992_v8 = vadd.f32 %v2991_v14, %v2990_v33  ;;  %v2900_v25 = vpop.f32.mrf.mxu0 }
 0x36b   : > { %v2738_v20 = vadd.f32 %v2737_v63, %v2736_v57  ;;  %v2732_v45 = vrot.slane %v2731_v49, 1  ;;  %v2986_v0 = vrot.slane %v2985_v24, 2  ;;  %v2941_v12 = vpop.f32.mrf.mxu1  ;;  %v3005_v16 = vmul.f32 %v2900_v25, %v5926_v48 }
 0x36c   : > { %v2993_v11 = vrot.slane %v2992_v8, 2  ;;  %v3006_v3 = vmul.f32 %v2941_v12, %v5928_v5 }
 0x36d   : > { %v2739_v44 = vrot.slane %v2738_v20, 1  ;;  %v2987_v46 = vadd.f32 %v2986_v0, %v2985_v24  ;;  %v2733_v37 = vadd.f32 %v2732_v45, %v2731_v49  ;;  %v6298_v0 = vld [vmem:[#allocation7_spill] sm:$0xff] }
 0x36e   : > { %v2994_v18 = vadd.f32 %v2993_v11, %v2992_v8  ;;  %v2627_v61 = vpop.f32.mrf.mxu2 }
 0x36f   : > { %v2740_v35 = vadd.f32 %v2739_v44, %v2738_v20  ;;  %v2751_v56 = vmul.f32 %v2627_v61, %v5856_v29  ;;  %v2988_v31 = vrot.slane %v2987_v46, 1  ;;  %v6299_v44 = vld [vmem:[#allocation8_spill] sm:$0xff] }
 0x370   : > { %v2668_v59 = vpop.f32.mrf.mxu3  ;;  %v2995_v28 = vrot.slane %v2994_v18, 1 }
 0x371   : > { %v2743_v4 = vrot.slane %v2740_v35, 7  ;;  %v2752_v60 = vmul.f32 %v2668_v59, %v5860_v51  ;;  %v2753_v9 = vadd.f32 %v2751_v56, %v2749_v27  ;;  %v2989_v17 = vadd.f32 %v2988_v31, %v2987_v46 }
 0x372   : > { %v2996_v32 = vadd.f32 %v2995_v28, %v2994_v18  ;;  %v2903_v42 = vpop.f32.mrf.mxu0 }
 0x373   : > { %v2744_v38 = vsel %vm6296_vm9, %v2733_v37, %v2743_v4  ;;  %v2760_v47 = vadd.f32 %v2752_v60, %v2750_v39  ;;  %v2754_v29 = vrot.slane %v2753_v9, 4  ;;  %v3007_v22 = vmul.f32 %v2903_v42, %v5930_v50  ;;  %v2944_v36 = vpop.f32.mrf.mxu1  ;;  %v6300_v37 = vld [vmem:[#allocation9_spill] sm:$0xff] }
 0x374   : > { %2747 = vst.msk [vmem:[#allocation3 + $0x32] ss:$8 sm:$0x3] %vm5053_vm6, %v2744_v38  ;;  %v2999_v19 = vrot.slane %v2996_v32, 7  ;;  %v3008_v10 = vmul.f32 %v2944_v36, %v5933_v41 }
 0x375   : > { %v2761_v51 = vrot.slane %v2760_v47, 4  ;;  %v2755_v34 = vadd.f32 %v2754_v29, %v2753_v9  ;;  %v3009_v6 = vadd.f32 %v3007_v22, %v3005_v16 }
 0x376   : > { %v3000_v55 = vsel %vm6297_vm11, %v2989_v17, %v2999_v19  ;;  %v3016_v2 = vadd.f32 %v3008_v10, %v3006_v3  ;;  %v3168_v62 = vpop.f32.mrf.mxu2 }
 0x377   : > { %v2762_v21 = vadd.f32 %v2761_v51, %v2760_v47  ;;  %3003 = vst.msk [vmem:[#allocation3 + $0x35] ss:$8 sm:$0x3] %vm5053_vm6, %v3000_v55  ;;  %v2756_v54 = vrot.slane %v2755_v34, 2  ;;  %v3010_v13 = vrot.slane %v3009_v6, 4  ;;  %v3233_v45 = vmul.f32 %v3168_v62, %v4979_v52 }
 0x378   : > { %v3209_v40 = vpop.f32.mrf.mxu3  ;;  %v3017_v26 = vrot.slane %v3016_v2, 4 }
 0x379   : > { %v2763_v30 = vrot.slane %v2762_v21, 2  ;;  %v2757_v15 = vadd.f32 %v2756_v54, %v2755_v34  ;;  %v3011_v53 = vadd.f32 %v3010_v13, %v3009_v6  ;;  %v3234_v12 = vmul.f32 %v3209_v40, %v6298_v0 }
 0x37a   : > { %v3018_v33 = vadd.f32 %v3017_v26, %v3016_v2  ;;  %v2906_v43 = vpop.f32.mrf.mxu0 }
 0x37b   : > { %v2764_v57 = vadd.f32 %v2763_v30, %v2762_v21  ;;  %v2758_v23 = vrot.slane %v2757_v15, 1  ;;  %v3012_v7 = vrot.slane %v3011_v53, 2  ;;  %v2947_v58 = vpop.f32.mrf.mxu1  ;;  %v3031_v28 = vmul.f32 %v2906_v43, %v5926_v48 }
 0x37c   : > { %v3019_v14 = vrot.slane %v3018_v33, 2  ;;  %v3032_v60 = vmul.f32 %v2947_v58, %v5928_v5 }
 0x37d   : > { %v2765_v63 = vrot.slane %v2764_v57, 1  ;;  %v3013_v49 = vadd.f32 %v3012_v7, %v3011_v53  ;;  %v2759_v25 = vadd.f32 %v2758_v23, %v2757_v15 }
 0x37e   : > { %v3020_v20 = vadd.f32 %v3019_v14, %v3018_v33  ;;  %v3171_v8 = vpop.f32.mrf.mxu2 }
 0x37f   : > { %v2766_v24 = vadd.f32 %v2765_v63, %v2764_v57  ;;  %v3235_v11 = vmul.f32 %v3171_v8, %v6299_v44  ;;  %v3014_v18 = vrot.slane %v3013_v49, 1 }
 0x380   : > { %v3212_v46 = vpop.f32.mrf.mxu3  ;;  %v3021_v61 = vrot.slane %v3020_v20, 1 }
 0x381   : > { %v2769_v35 = vrot.slane %v2766_v24, 7  ;;  %v3236_v27 = vmul.f32 %v3212_v46, %v6300_v37  ;;  %v3237_v39 = vadd.f32 %v3235_v11, %v3233_v45  ;;  %v3015_v47 = vadd.f32 %v3014_v18, %v3013_v49 }
 0x382   : > { %v3022_v59 = vadd.f32 %v3021_v61, %v3020_v20  ;;  %v2909_v31 = vpop.f32.mrf.mxu0 }
 0x383   : > { %v2770_v56 = vsel %vm6301_vm12, %v2759_v25, %v2769_v35  ;;  %v3244_v4 = vadd.f32 %v3236_v27, %v3234_v12  ;;  %v3238_v9 = vrot.slane %v3237_v39, 4  ;;  %v3033_v38 = vmul.f32 %v2909_v31, %v5930_v50  ;;  %v2950_v32 = vpop.f32.mrf.mxu1 }
 0x384   : > { %2773 = vst.msk [vmem:[#allocation3 + $0x33] ss:$8 sm:$0x3] %vm5053_vm6, %v2770_v56  ;;  %v3025_v42 = vrot.slane %v3022_v59, 7  ;;  %v3034_v3 = vmul.f32 %v2950_v32, %v5933_v41 }
 0x385   : > { %v3245_v16 = vrot.slane %v3244_v4, 4  ;;  %v3239_v29 = vadd.f32 %v3238_v9, %v3237_v39  ;;  %v3035_v22 = vadd.f32 %v3033_v38, %v3031_v28 }
 0x386   : > { %v3026_v36 = vsel %vm6302_vm7, %v3015_v47, %v3025_v42  ;;  %v3042_v19 = vadd.f32 %v3034_v3, %v3032_v60  ;;  %v3174_v51 = vpop.f32.mrf.mxu2 }
 0x387   : > { %v3246_v17 = vadd.f32 %v3245_v16, %v3244_v4  ;;  %3029 = vst.msk [vmem:[#allocation3 + $0x36] ss:$8 sm:$0x3] %vm5053_vm6, %v3026_v36  ;;  %v3240_v48 = vrot.slane %v3239_v29, 2  ;;  %v3036_v5 = vrot.slane %v3035_v22, 4  ;;  %v3259_v57 = vmul.f32 %v3174_v51, %v4979_v52 }
 0x388   : > { %v3215_v10 = vpop.f32.mrf.mxu3  ;;  %v3043_v34 = vrot.slane %v3042_v19, 4 }
 0x389   : > { %v3247_v50 = vrot.slane %v3246_v17, 2  ;;  %v3241_v6 = vadd.f32 %v3240_v48, %v3239_v29  ;;  %v3037_v55 = vadd.f32 %v3036_v5, %v3035_v22  ;;  %v3260_v33 = vmul.f32 %v3215_v10, %v6298_v0 }
 0x38a   : > { %v3044_v2 = vadd.f32 %v3043_v34, %v3042_v19 }
 0x38b   : > { %v3248_v21 = vadd.f32 %v3247_v50, %v3246_v17  ;;  %v3242_v41 = vrot.slane %v3241_v6, 1  ;;  %v3038_v62 = vrot.slane %v3037_v55, 2 }
 0x38c   : > { %v3045_v13 = vrot.slane %v3044_v2, 2 }
 0x38d   : > { %v3249_v54 = vrot.slane %v3248_v21, 1  ;;  %v3039_v40 = vadd.f32 %v3038_v62, %v3037_v55  ;;  %v3243_v53 = vadd.f32 %v3242_v41, %v3241_v6 }
 0x38e   : > { %v3046_v26 = vadd.f32 %v3045_v13, %v3044_v2  ;;  %v3177_v15 = vpop.f32.mrf.mxu2 }
 0x38f   : > { %v3250_v30 = vadd.f32 %v3249_v54, %v3248_v21  ;;  %v3261_v43 = vmul.f32 %v3177_v15, %v6299_v44  ;;  %v3040_v58 = vrot.slane %v3039_v40, 1 }
 0x390   : > { %v3218_v23 = vpop.f32.mrf.mxu3  ;;  %v3047_v63 = vrot.slane %v3046_v26, 1 }
 0x391   : > { %v3253_v7 = vrot.slane %v3250_v30, 7  ;;  %v3262_v14 = vmul.f32 %v3218_v23, %v6300_v37  ;;  %v3263_v49 = vadd.f32 %v3261_v43, %v3259_v57  ;;  %v3041_v45 = vadd.f32 %v3040_v58, %v3039_v40 }
 0x392   : > { %v3048_v20 = vadd.f32 %v3047_v63, %v3046_v26 }
 0x393   : > { %v3254_v24 = vsel %vm6303_vm10, %v3243_v53, %v3253_v7  ;;  %v3270_v8 = vadd.f32 %v3262_v14, %v3260_v33  ;;  %v3264_v25 = vrot.slane %v3263_v49, 4 }
 0x394   : > { %3257 = vst.msk [vmem:[#allocation3 + $0x40] ss:$8 sm:$0x3] %vm5053_vm6, %v3254_v24  ;;  %v3051_v12 = vrot.slane %v3048_v20, 7 }
 0x395   : > { %v3271_v11 = vrot.slane %v3270_v8, 4  ;;  %v3265_v46 = vadd.f32 %v3264_v25, %v3263_v49 }
 0x396   : > { %v3052_v35 = vsel %vm6304_vm13, %v3041_v45, %v3051_v12  ;;  %v3180_v61 = vpop.f32.mrf.mxu2 }
 0x397   : > { %v3272_v18 = vadd.f32 %v3271_v11, %v3270_v8  ;;  %3055 = vst.msk [vmem:[#allocation3 + $0x37] ss:$8 sm:$0x3] %vm5053_vm6, %v3052_v35  ;;  %v3266_v27 = vrot.slane %v3265_v46, 2  ;;  %v3285_v38 = vmul.f32 %v3180_v61, %v4979_v52  ;;  %v3343_v61 = vld [vmem:[#allocation3 + $0x28] sm:$0xff] }
 0x398   : > { %v3221_v39 = vpop.f32.mrf.mxu3 }
 0x399   : > { %v3273_v56 = vrot.slane %v3272_v18, 2  ;;  %v3267_v59 = vadd.f32 %v3266_v27, %v3265_v46  ;;  %v3286_v3 = vmul.f32 %v3221_v39, %v6298_v0  ;;  %v3340_v27 = vld [vmem:[#allocation3 + $0x10] sm:$0xff]  ;;  %v3341_v39 = vld [vmem:[#allocation3 + $0x18] sm:$0xff] }
 0x39b   : > { %v3274_v4 = vadd.f32 %v3273_v56, %v3272_v18  ;;  %v3268_v31 = vrot.slane %v3267_v59, 1  ;;  %v3342_v18 = vld [vmem:[#allocation3 + $0x20] sm:$0xff] }
 0x39c   : > { %v3338_v56 = vld [vmem:[#allocation3] sm:$0xff] }
 0x39d   : > { %v3275_v28 = vrot.slane %v3274_v4, 1  ;;  %v3269_v42 = vadd.f32 %v3268_v31, %v3267_v59  ;;  %v3339_v59 = vld [vmem:[#allocation3 + $0x8] sm:$0xff] }
 0x39e   : > { %v3183_v9 = vpop.f32.mrf.mxu2  ;;  %v3344_v46 = vld [vmem:[#allocation3 + $0x30] sm:$0xff]  ;;  %v3345_v35 = vld [vmem:[#allocation3 + $0x38] sm:$0xff] }
 0x39f   : > { %v3276_v60 = vadd.f32 %v3275_v28, %v3274_v4  ;;  %v3287_v32 = vmul.f32 %v3183_v9, %v6299_v44  ;;  %v3401_v4 = vpop.permute.xlu1 %3400 }
 0x3a0   : > { %v3224_v47 = vpop.f32.mrf.mxu3 }
 0x3a1   : > { %v3279_v16 = vrot.slane %v3276_v60, 7  ;;  %v3288_v29 = vmul.f32 %v3224_v47, %v6300_v37  ;;  %v3289_v22 = vadd.f32 %v3287_v32, %v3285_v38  ;;  %v3409_v38 = vpop.permute.xlu2 %3408 }
 0x3a3   : > { %v3280_v36 = vsel %vm6305_vm1, %v3269_v42, %v3279_v16  ;;  %v3296_v17 = vadd.f32 %v3288_v29, %v3286_v3  ;;  %v3290_v19 = vrot.slane %v3289_v22, 4 }
 0x3a4   : > { %3283 = vst.msk [vmem:[#allocation3 + $0x41] ss:$8 sm:$0x3] %vm5053_vm6, %v3280_v36 }
 0x3a5   : > { %v3297_v51 = vrot.slane %v3296_v17, 4  ;;  %v3291_v48 = vadd.f32 %v3290_v19, %v3289_v22 }
 0x3a6   : > { %v3186_v10 = vpop.f32.mrf.mxu2 }
 0x3a7   : > { %v3298_v5 = vadd.f32 %v3297_v51, %v3296_v17  ;;  %v3292_v50 = vrot.slane %v3291_v48, 2  ;;  %v3311_v13 = vmul.f32 %v3186_v10, %v4979_v52 }
 0x3a8   : > { %v3227_v34 = vpop.f32.mrf.mxu3 }
 0x3a9   : > { %v3299_v6 = vrot.slane %v3298_v5, 2  ;;  %v3293_v55 = vadd.f32 %v3292_v50, %v3291_v48  ;;  %v3312_v53 = vmul.f32 %v3227_v34, %v6298_v0 }
 0x3ab   : > { %v3300_v21 = vadd.f32 %v3299_v6, %v3298_v5  ;;  %v3294_v2 = vrot.slane %v3293_v55, 1 }
 0x3ad   : > { %v3301_v41 = vrot.slane %v3300_v21, 1  ;;  %v3295_v26 = vadd.f32 %v3294_v2, %v3293_v55 }
 0x3ae   : > { %v3189_v54 = vpop.f32.mrf.mxu2 }
 0x3af   : > { %v3302_v62 = vadd.f32 %v3301_v41, %v3300_v21  ;;  %v3313_v40 = vmul.f32 %v3189_v54, %v6299_v44 }
 0x3b0   : > { %v3230_v30 = vpop.f32.mrf.mxu3 }
 0x3b1   : > { %v3305_v15 = vrot.slane %v3302_v62, 7  ;;  %v3314_v57 = vmul.f32 %v3230_v30, %v6300_v37  ;;  %v3315_v33 = vadd.f32 %v3313_v40, %v3311_v13 }
 0x3b3   : > { %v3306_v43 = vsel %vm6306_vm0, %v3295_v26, %v3305_v15  ;;  %v3322_v23 = vadd.f32 %v3314_v57, %v3312_v53  ;;  %v3316_v7 = vrot.slane %v3315_v33, 4 }
 0x3b4   : > { %3309 = vst.msk [vmem:[#allocation3 + $0x42] ss:$8 sm:$0x3] %vm5053_vm6, %v3306_v43 }
 0x3b5   : > { %v3323_v58 = vrot.slane %v3322_v23, 4  ;;  %v3317_v63 = vadd.f32 %v3316_v7, %v3315_v33 }
 0x3b7   : > { %v3324_v52 = vadd.f32 %v3323_v58, %v3322_v23  ;;  %v3318_v14 = vrot.slane %v3317_v63, 2 }
 0x3b9   : > { %v3325_v44 = vrot.slane %v3324_v52, 2  ;;  %v3319_v49 = vadd.f32 %v3318_v14, %v3317_v63 }
 0x3bb   : > { %v3326_v24 = vadd.f32 %v3325_v44, %v3324_v52  ;;  %v3320_v20 = vrot.slane %v3319_v49, 1 }
 0x3bd   : > { %v3327_v8 = vrot.slane %v3326_v24, 1  ;;  %v3321_v25 = vadd.f32 %v3320_v20, %v3319_v49 }
 0x3bf   : > { %v3328_v0 = vadd.f32 %v3327_v8, %v3326_v24 }
 0x3c1   : > { %v3331_v37 = vrot.slane %v3328_v0, 7 }
 0x3c3   : > { %v3332_v45 = vsel %vm6307_vm2, %v3321_v25, %v3331_v37 }
 0x3c4   : > { %3335 = vst.msk [vmem:[#allocation3 + $0x43] ss:$8 sm:$0x3] %vm5053_vm6, %v3332_v45  ;;  %vm6310_vm6 = vcmask 293888  }
 0x3c5   : > { %vm6311_vm14 = vmmov %vm6310_vm6 }
 0x3cb   : > { %v3346_v12 = vld [vmem:[#allocation3 + $0x40] sm:$0xf]  ;;  %v3347_v11 = vld [vmem:[#allocation3 + $0x48] sm:$0xf] }
 0x3cc   : > { %3668 = vmatpush.msk.msra.mxu0 %vm6308_vm5, %v3346_v12  ;;  %3670 = vmatpush.msk.msra.mxu1 %vm6309_vm8, %v3347_v11 }
 0x3ce   : > { %3369 = vmatpush.msra.mxu0 %v3344_v46  ;;  %3389 = vmatpush.msra.mxu1 %v3345_v35 }
 0x3d0   : > { %3370 = vmatpush.msra.mxu0 %v3342_v18  ;;  %3390 = vmatpush.msra.mxu1 %v3343_v61 }
 0x3d2   : > { %3371 = vmatpush.msra.mxu0 %v3340_v27  ;;  %3391 = vmatpush.msra.mxu1 %v3341_v39 }
 0x3d4   : > { %3372 = vmatpush.msra.mxu0 %v3338_v56  ;;  %3392 = vmatpush.msra.mxu1 %v3339_v59 }
 0x3d5   : > { %3669 = vmatmul.msk.f32.vlgmr.msra.gmra.mxu0 %vm6310_vm6, %v3337_v1  ;;  %3671 = vmatmul.msk.f32.vlgmr.msra.gmra.mxu1 %vm6311_vm14, %v3337_v1 }
 0x452   : > { %v3374_v31 = vpop.f32.mrf.mxu0  ;;  %v3394_v28 = vpop.f32.mrf.mxu1 }
 0x453   : > { %v3403_v60 = vmul.f32 %v3401_v4, %v3374_v31  ;;  %v3404_v9 = vmul.f32 %v3401_v4, %v3394_v28 }
 0x455   : > { %v3411_v32 = vadd.f32 %v3409_v38, %v3403_v60  ;;  %v3412_v47 = vadd.f32 %v3409_v38, %v3404_v9 }
 0x457   : > { %v3413_v42 = vmax.f32 %v3411_v32, 0.0  ;;  %v3414_v16 = vmax.f32 %v3412_v47, 0.0 }
 0x459   : > { %3415 = vst [vmem:[%s313_s25] sm:$0xff] %v3413_v42 }
 0x45a   : > { %3416 = vst [vmem:[%s313_s25 + $0x8] sm:$0xff] %v3414_v16 }
 0x45b   : > { %3838 = shalt.err (!%p3835_p3)
}
 0x45c   : > { %3720 = dma.vmem_to_hbm [thread:$0]  (%p3973_p5), %s3432_s26, 256, %s3434_s10, %s3418_s9  }
 0x45d PF: > { %p3726_p4 = scmp.ge.s32.totalorder %s3873_s30, 2  ;;  %s3445_s20 = sand.u32 1, %s3861_s27  }
 0x45e   : > { %s3446_s23 = scalar_lea.sflag [#allocation5], %s3445_s20 }
 0x45f   : > { %p3723_p7 = pnand %p3726_p4, %p3977_p6 }
 0x461   : > { %p3724_p8 = pneg %p3723_p7 }
 0x463   : > { %3856 = dma.done.wait (%p3724_p8), %s3446_s23, 256  }
 0x464   : > { %3858 = vsyncadd (%p3724_p8), %s3446_s23, 4294967040  ;;  %p18_p9 = scmp.ge.s32.totalorder %s3960_s11, 4   ;;  %s6312_s27 = smov %s3865_s28 }
 0x465   : > { %s6313_s28 = smov %s3869_s29  ;;  %s6314_s29 = smov %s3971_s14 }
 0x466   : > { %s6315_s30 = smov %s3960_s11  ;;  %20 = sbr.rel (!%p18_p9) target bundleno = 3 (0x3), region = 153 }
 0x46b   :  { %3452 = vsyncpa [#allocation5], 1 }
 0x46c   :  { %3454 = vsyncpa [#allocation5 + $0x1], 1 }

</bundles_post_ra>
